<compile_context>
chip_gen: v7x
topology: tpu7x:2x2x1
jax: 0.10.0
libtpu: 0.0.40
codegen_flags: <defaults>
</compile_context>

<pallas_src>
import functools

import jax
import jax.numpy as jnp
from jax import lax
from jax.experimental import pallas as pl
from jax.experimental.pallas import tpu as pltpu

_LANE = 128
_SUBLANE = 8


def _round_up(x, m):
    return (x + m - 1) // m * m


def _gj_inverse(a):
    """Fully unrolled Gauss-Jordan inverse of a small SPD (K, K) f32 matrix.

    Uses static row/column slices (VPU mul/sub chains) instead of iota-mask
    reductions, so no XLU reduce sits on the serial dependency chain.
    Precondition: `a` is a well-conditioned SPD Gram matrix (requires
    num_features >= num_eigenvectors and full-rank features); otherwise the
    result contains inf/NaN (torch.inverse would raise loudly instead).
    """
    k_dim = a.shape[0]
    row_ids = lax.broadcasted_iota(jnp.int32, (k_dim, 1), 0)          # (K, 1)
    eye = (lax.broadcasted_iota(jnp.int32, (k_dim, k_dim), 0)
           == lax.broadcasted_iota(jnp.int32, (k_dim, k_dim), 1)).astype(jnp.float32)
    m, inv = a, eye
    for k in range(k_dim):                       # K is small & static: full unroll
        pr_m = m[k:k + 1, :]                     # (1, K) pivot row (static slice)
        pr_i = inv[k:k + 1, :]
        piv = m[k:k + 1, k:k + 1]                # (1, 1) pivot (SPD -> no pivoting)
        inv_p = 1.0 / piv
        pr_m = pr_m * inv_p
        pr_i = pr_i * inv_p
        col = m[:, k:k + 1]                      # (K, 1) elimination column
        is_piv = row_ids == k
        factor = jnp.where(is_piv, 0.0, col)
        m = m - factor * pr_m
        inv = inv - factor * pr_i
        m = jnp.where(is_piv, pr_m, m)
        inv = jnp.where(is_piv, pr_i, inv)
    return inv


def _fmap_kernel(etx_ref, fx_ref, ety_ref, fy_ref, c1_ref, c2_ref,
                 pf_acc, pg_acc, *, v_dim, tv, ragged, ridge_eps):
    """Fused spectral projection + functional-map solve for one batch element."""
    vi = pl.program_id(1)
    nvi = pl.num_programs(1)

    @pl.when(vi == 0)
    def _init():
        pf_acc[...] = jnp.zeros_like(pf_acc)
        pg_acc[...] = jnp.zeros_like(pg_acc)

    def accumulate(etx, fx, ety, fy):
        # Hot path: (K, TV) @ (TV, F) accumulated in f32 over vertex tiles.
        pf_acc[...] += jnp.dot(etx, fx, preferred_element_type=jnp.float32)
        pg_acc[...] += jnp.dot(ety, fy, preferred_element_type=jnp.float32)

    if ragged:
        # Full tiles pay no masking; only the final ragged tile is masked
        # (both operands, so undefined out-of-bounds VMEM data — even NaNs —
        # cannot leak into the sums).
        @pl.when(vi < nvi - 1)
        def _full_tiles():
            accumulate(etx_ref[...], fx_ref[...], ety_ref[...], fy_ref[...])

        @pl.when(vi == nvi - 1)
        def _ragged_tail():
            v0 = vi * tv
            rows = (v0 + lax.broadcasted_iota(jnp.int32, (tv, 1), 0)) < v_dim
            cols = (v0 + lax.broadcasted_iota(jnp.int32, (1, tv), 1)) < v_dim
            accumulate(jnp.where(cols, etx_ref[...], 0.0),
                       jnp.where(rows, fx_ref[...], 0.0),
                       jnp.where(cols, ety_ref[...], 0.0),
                       jnp.where(rows, fy_ref[...], 0.0))
    else:
        accumulate(etx_ref[...], fx_ref[...], ety_ref[...], fy_ref[...])

    @pl.when(vi == nvi - 1)
    def _solve():
        f_hat = pf_acc[...]                      # (K, F) f32
        g_hat = pg_acc[...]

        def gram_t(a, b):                        # a @ b.T : (K, F) x (K, F) -> (K, K)
            return lax.dot_general(a, b, (((1,), (1,)), ((), ())),
                                   preferred_element_type=jnp.float32)

        aff = gram_t(f_hat, f_hat)               # F_hat F_hat^T (SPD)
        agg = gram_t(g_hat, g_hat)               # G_hat G_hat^T (SPD)
        bfg = gram_t(f_hat, g_hat)               # F_hat G_hat^T
        bgf = gram_t(g_hat, f_hat)               # G_hat F_hat^T

        if ridge_eps:                            # optional SPD safety margin (off by default)
            k_dim = aff.shape[0]
            eye = (lax.broadcasted_iota(jnp.int32, (k_dim, k_dim), 0)
                   == lax.broadcasted_iota(jnp.int32, (k_dim, k_dim), 1)
                   ).astype(jnp.float32)
            aff = aff + ridge_eps * eye
            agg = agg + ridge_eps * eye

        aff_inv = _gj_inverse(aff)
        agg_inv = _gj_inverse(agg)

        # torch: C1 = (inv(Aff) @ Bfg)^T == Bgf @ inv(Aff)   (Aff symmetric)
        #        C2 = (inv(Agg) @ Bgf)^T == Bfg @ inv(Agg)
        c1_ref[...] = jnp.dot(bgf, aff_inv,
                              preferred_element_type=jnp.float32).astype(c1_ref.dtype)
        c2_ref[...] = jnp.dot(bfg, agg_inv,
                              preferred_element_type=jnp.float32).astype(c2_ref.dtype)


def functional_map_net(feat_x, feat_y, evecs_trans_x, evecs_trans_y, *,
                       max_tv=8192, ridge_eps=0.0):
    """Pallas implementation of FunctionalMapNet.forward. Returns (C1, C2)."""
    b, v_dim, f_dim = feat_x.shape
    k_dim = evecs_trans_x.shape[1]
    assert evecs_trans_x.shape == (b, k_dim, v_dim)
    assert evecs_trans_y.shape == (b, k_dim, v_dim)
    assert feat_y.shape == (b, v_dim, f_dim)

    out_dtype = feat_x.dtype
    itemsize = jnp.dtype(feat_x.dtype).itemsize
    # Note: inputs are consumed as-is (bf16 inputs halve Stage-1 HBM traffic
    # for free); no wrapper-side dtype cast is performed.

    # VMEM-aware vertex tile. The (tv, F) feature tiles occupy tv x 128 lanes
    # in VMEM regardless of F (lane padding), and the (K, tv) evecs tiles pad
    # K up to the 8-row sublane tile — account for both when budgeting.
    f_lane = _round_up(f_dim, _LANE)
    k_sub = _round_up(k_dim, _SUBLANE)
    stream_budget = 36 * 1024 * 1024                       # double-buffered input streams
    per_vertex_bytes = 2 * 2 * (f_lane + k_sub) * itemsize  # x+y streams, 2 buffers
    tv_budget = max(256, (stream_budget // per_vertex_bytes) // 256 * 256)
    tv_cap = max(256, min(int(max_tv), tv_budget) // 256 * 256)

    if v_dim <= tv_cap:
        # Single full-extent vertex block: exact, no masking, no padding.
        tv, v_tiles, ragged = v_dim, 1, False
    else:
        tv = tv_cap
        v_tiles = pl.cdiv(v_dim, tv)
        ragged = (v_dim % tv) != 0                          # mask final tile in-kernel

    # Explicit VMEM limit from *padded* tile footprints (+ margin), capped
    # below the 64 MiB v7x physical ceiling.
    feat_tile = _round_up(tv, _SUBLANE) * f_lane * itemsize
    et_tile = k_sub * _round_up(tv, _LANE) * itemsize
    in_bytes = 2 * 2 * (feat_tile + et_tile)                # 4 streams, double-buffered
    out_bytes = 2 * 2 * k_sub * _round_up(k_dim, _LANE) * 4
    scratch_bytes = 2 * k_sub * f_lane * 4
    vmem_limit = int(min(in_bytes + out_bytes + scratch_bytes + (8 << 20), 60 << 20))

    kernel = functools.partial(_fmap_kernel, v_dim=v_dim, tv=tv,
                               ragged=ragged, ridge_eps=float(ridge_eps))

    c1, c2 = pl.pallas_call(
        kernel,
        out_shape=(jax.ShapeDtypeStruct((b, k_dim, k_dim), out_dtype),
                   jax.ShapeDtypeStruct((b, k_dim, k_dim), out_dtype)),
        grid_spec=pltpu.PrefetchScalarGridSpec(
            num_scalar_prefetch=0,
            grid=(b, v_tiles),
            in_specs=[
                pl.BlockSpec((None, k_dim, tv), lambda bi, vi: (bi, 0, vi)),
                pl.BlockSpec((None, tv, f_dim), lambda bi, vi: (bi, vi, 0)),
                pl.BlockSpec((None, k_dim, tv), lambda bi, vi: (bi, 0, vi)),
                pl.BlockSpec((None, tv, f_dim), lambda bi, vi: (bi, vi, 0)),
            ],
            out_specs=[
                pl.BlockSpec((None, k_dim, k_dim), lambda bi, vi: (bi, 0, 0)),
                pl.BlockSpec((None, k_dim, k_dim), lambda bi, vi: (bi, 0, 0)),
            ],
            scratch_shapes=[pltpu.VMEM((k_dim, f_dim), jnp.float32),
                            pltpu.VMEM((k_dim, f_dim), jnp.float32)],
        ),
        compiler_params=pltpu.CompilerParams(
            dimension_semantics=("parallel", "arbitrary"),
            vmem_limit_bytes=vmem_limit),
    )(evecs_trans_x, feat_x, evecs_trans_y, feat_y)

    return c1, c2


if __name__ == "__main__":
    def reference(feat_x, feat_y, etx, ety):
        # Pure-JAX reference following the PyTorch code exactly.
        f_hat = jnp.einsum('bkv,bvf->bkf', etx, feat_x)
        g_hat = jnp.einsum('bkv,bvf->bkf', ety, feat_y)
        aff = jnp.einsum('bkf,blf->bkl', f_hat, f_hat)
        agg = jnp.einsum('bkf,blf->bkl', g_hat, g_hat)
        bfg = jnp.einsum('bkf,blf->bkl', f_hat, g_hat)
        bgf = jnp.einsum('bkf,blf->bkl', g_hat, f_hat)
        c1 = jnp.swapaxes(jnp.matmul(jnp.linalg.inv(aff), bfg), 1, 2)
        c2 = jnp.swapaxes(jnp.matmul(jnp.linalg.inv(agg), bgf), 1, 2)
        return c1, c2

    key = jax.random.PRNGKey(0)
    # Config 1: single full-extent vertex block (no masking, no padding).
    # Config 2: small forced tile -> multi-tile reduction + ragged-tail masking.
    for (B, V, K, F, kw) in [(2, 300, 16, 32, {}),
                             (1, 520, 16, 32, {"max_tv": 256})]:
        key, k1, k2, k3, k4 = jax.random.split(key, 5)
        feat_x = jax.random.normal(k1, (B, V, F), jnp.float32)
        feat_y = jax.random.normal(k2, (B, V, F), jnp.float32)
        evecs_trans_x = jax.random.normal(k3, (B, K, V), jnp.float32) / jnp.sqrt(V)
        evecs_trans_y = jax.random.normal(k4, (B, K, V), jnp.float32) / jnp.sqrt(V)

        c1, c2 = functional_map_net(feat_x, feat_y, evecs_trans_x, evecs_trans_y, **kw)
        jax.block_until_ready((c1, c2))

        c1_ref, c2_ref = reference(feat_x, feat_y, evecs_trans_x, evecs_trans_y)
        assert jnp.allclose(c1, c1_ref, rtol=1e-2, atol=1e-2), f"C1 mismatch B={B},V={V}"
        assert jnp.allclose(c2, c2_ref, rtol=1e-2, atol=1e-2), f"C2 mismatch B={B},V={V}"

    print("KERNEL_OK")
</pallas_src>

<mosaic_0001>
module attributes {stable_mosaic.version = 11 : i64} {
  func.func @_fmap_kernel(%arg0: i32, %arg1: i32, %arg2: memref<1x16x300xf32, #tpu.memory_space<vmem>>, %arg3: memref<1x300x32xf32, #tpu.memory_space<vmem>>, %arg4: memref<1x16x300xf32, #tpu.memory_space<vmem>>, %arg5: memref<1x300x32xf32, #tpu.memory_space<vmem>>, %arg6: memref<1x16x16xf32, #tpu.memory_space<vmem>>, %arg7: memref<1x16x16xf32, #tpu.memory_space<vmem>>, %arg8: memref<16x32xf32, #tpu.memory_space<vmem>>, %arg9: memref<16x32xf32, #tpu.memory_space<vmem>>) attributes {dimension_semantics = [#tpu.dimension_semantics<parallel>, #tpu.dimension_semantics<arbitrary>], iteration_bounds = array<i64: 2, 1>, scalar_prefetch = 0 : i64, scratch_operands = 2 : i64, tpu.core_type = #tpu.core_type<tc>, window_params = [{transform_indices = @transform_0, window_bounds = array<i64: 1, 16, 300>}, {transform_indices = @transform_1, window_bounds = array<i64: 1, 300, 32>}, {transform_indices = @transform_2, window_bounds = array<i64: 1, 16, 300>}, {transform_indices = @transform_3, window_bounds = array<i64: 1, 300, 32>}, {transform_indices = @transform_4, window_bounds = array<i64: 1, 16, 16>}, {transform_indices = @transform_5, window_bounds = array<i64: 1, 16, 16>}]} {
    %c0_i32 = arith.constant 0 : i32
    %0 = arith.cmpi eq, %arg1, %c0_i32 : i32
    %1 = arith.extui %0 : i1 to i32
    %c0_i32_0 = arith.constant 0 : i32
    %2 = arith.cmpi ne, %1, %c0_i32_0 : i32
    scf.if %2 {
      %cst_23 = arith.constant 0.000000e+00 : f32
      %22 = vector.broadcast %cst_23 : f32 to vector<16x32xf32>
      %c0_24 = arith.constant 0 : index
      %c0_25 = arith.constant 0 : index
      %23 = vector.load %arg8[%c0_24, %c0_25] : memref<16x32xf32, #tpu.memory_space<vmem>>, vector<16x32xf32>
      tpu.vector_store %arg8[%c0_24, %c0_25], %22 {strides = array<i32>} : memref<16x32xf32, #tpu.memory_space<vmem>>, vector<16x32xf32>,
      %cst_26 = arith.constant 0.000000e+00 : f32
      %24 = vector.broadcast %cst_26 : f32 to vector<16x32xf32>
      %c0_27 = arith.constant 0 : index
      %c0_28 = arith.constant 0 : index
      %25 = vector.load %arg9[%c0_27, %c0_28] : memref<16x32xf32, #tpu.memory_space<vmem>>, vector<16x32xf32>
      tpu.vector_store %arg9[%c0_27, %c0_28], %24 {strides = array<i32>} : memref<16x32xf32, #tpu.memory_space<vmem>>, vector<16x32xf32>,
    } else {
    }
    %c0 = arith.constant 0 : index
    %c0_1 = arith.constant 0 : index
    %c0_2 = arith.constant 0 : index
    %3 = vector.load %arg2[%c0, %c0_1, %c0_2] : memref<1x16x300xf32, #tpu.memory_space<vmem>>, vector<1x16x300xf32>
    %4 = vector.shape_cast %3 : vector<1x16x300xf32> to vector<16x300xf32>
    %c0_3 = arith.constant 0 : index
    %c0_4 = arith.constant 0 : index
    %c0_5 = arith.constant 0 : index
    %5 = vector.load %arg3[%c0_3, %c0_4, %c0_5] : memref<1x300x32xf32, #tpu.memory_space<vmem>>, vector<1x300x32xf32>
    %6 = vector.shape_cast %5 : vector<1x300x32xf32> to vector<300x32xf32>
    %c0_6 = arith.constant 0 : index
    %c0_7 = arith.constant 0 : index
    %c0_8 = arith.constant 0 : index
    %7 = vector.load %arg4[%c0_6, %c0_7, %c0_8] : memref<1x16x300xf32, #tpu.memory_space<vmem>>, vector<1x16x300xf32>
    %8 = vector.shape_cast %7 : vector<1x16x300xf32> to vector<16x300xf32>
    %c0_9 = arith.constant 0 : index
    %c0_10 = arith.constant 0 : index
    %c0_11 = arith.constant 0 : index
    %9 = vector.load %arg5[%c0_9, %c0_10, %c0_11] : memref<1x300x32xf32, #tpu.memory_space<vmem>>, vector<1x300x32xf32>
    %10 = vector.shape_cast %9 : vector<1x300x32xf32> to vector<300x32xf32>
    %c0_12 = arith.constant 0 : index
    %c0_13 = arith.constant 0 : index
    %11 = vector.load %arg8[%c0_12, %c0_13] : memref<16x32xf32, #tpu.memory_space<vmem>>, vector<16x32xf32>
    %cst = arith.constant dense<0.000000e+00> : vector<16x32xf32>
    %12 = tpu.matmul %4, %6, %cst {dimension_numbers = #tpu.dot_dimension_numbers<[1], [0], [0], [1], [0, 0, 1, 1], [], []>} : vector<16x300xf32>, vector<300x32xf32>, vector<16x32xf32> -> vector<16x32xf32>
    %13 = arith.addf %11, %12 : vector<16x32xf32>
    %c0_14 = arith.constant 0 : index
    %c0_15 = arith.constant 0 : index
    %14 = vector.load %arg8[%c0_14, %c0_15] : memref<16x32xf32, #tpu.memory_space<vmem>>, vector<16x32xf32>
    tpu.vector_store %arg8[%c0_14, %c0_15], %13 {strides = array<i32>} : memref<16x32xf32, #tpu.memory_space<vmem>>, vector<16x32xf32>,
    %c0_16 = arith.constant 0 : index
    %c0_17 = arith.constant 0 : index
    %15 = vector.load %arg9[%c0_16, %c0_17] : memref<16x32xf32, #tpu.memory_space<vmem>>, vector<16x32xf32>
    %cst_18 = arith.constant dense<0.000000e+00> : vector<16x32xf32>
    %16 = tpu.matmul %8, %10, %cst_18 {dimension_numbers = #tpu.dot_dimension_numbers<[1], [0], [0], [1], [0, 0, 1, 1], [], []>} : vector<16x300xf32>, vector<300x32xf32>, vector<16x32xf32> -> vector<16x32xf32>
    %17 = arith.addf %15, %16 : vector<16x32xf32>
    %c0_19 = arith.constant 0 : index
    %c0_20 = arith.constant 0 : index
    %18 = vector.load %arg9[%c0_19, %c0_20] : memref<16x32xf32, #tpu.memory_space<vmem>>, vector<16x32xf32>
    tpu.vector_store %arg9[%c0_19, %c0_20], %17 {strides = array<i32>} : memref<16x32xf32, #tpu.memory_space<vmem>>, vector<16x32xf32>,
    %c0_i32_21 = arith.constant 0 : i32
    %19 = arith.cmpi eq, %arg1, %c0_i32_21 : i32
    %20 = arith.extui %19 : i1 to i32
    %c0_i32_22 = arith.constant 0 : i32
    %21 = arith.cmpi ne, %20, %c0_i32_22 : i32
    scf.if %21 {
      %c0_23 = arith.constant 0 : index
      %c0_24 = arith.constant 0 : index
      %22 = vector.load %arg8[%c0_23, %c0_24] : memref<16x32xf32, #tpu.memory_space<vmem>>, vector<16x32xf32>
      %c0_25 = arith.constant 0 : index
      %c0_26 = arith.constant 0 : index
      %23 = vector.load %arg9[%c0_25, %c0_26] : memref<16x32xf32, #tpu.memory_space<vmem>>, vector<16x32xf32>
      %cst_27 = arith.constant dense<0.000000e+00> : vector<16x16xf32>
      %24 = tpu.matmul %22, %22, %cst_27 {dimension_numbers = #tpu.dot_dimension_numbers<[1], [1], [0], [0], [0, 0, 1, 0], [], []>} : vector<16x32xf32>, vector<16x32xf32>, vector<16x16xf32> -> vector<16x16xf32>
      %cst_28 = arith.constant dense<0.000000e+00> : vector<16x16xf32>
      %25 = tpu.matmul %23, %23, %cst_28 {dimension_numbers = #tpu.dot_dimension_numbers<[1], [1], [0], [0], [0, 0, 1, 0], [], []>} : vector<16x32xf32>, vector<16x32xf32>, vector<16x16xf32> -> vector<16x16xf32>
      %cst_29 = arith.constant dense<0.000000e+00> : vector<16x16xf32>
      %26 = tpu.matmul %22, %23, %cst_29 {dimension_numbers = #tpu.dot_dimension_numbers<[1], [1], [0], [0], [0, 0, 1, 0], [], []>} : vector<16x32xf32>, vector<16x32xf32>, vector<16x16xf32> -> vector<16x16xf32>
      %cst_30 = arith.constant dense<0.000000e+00> : vector<16x16xf32>
      %27 = tpu.matmul %23, %22, %cst_30 {dimension_numbers = #tpu.dot_dimension_numbers<[1], [1], [0], [0], [0, 0, 1, 0], [], []>} : vector<16x32xf32>, vector<16x32xf32>, vector<16x16xf32> -> vector<16x16xf32>
      %28 = tpu.iota {dimensions = array<i32: 0>} : vector<16x1xi32>
      %29 = tpu.iota {dimensions = array<i32: 0>} : vector<16x16xi32>
      %30 = tpu.iota {dimensions = array<i32: 1>} : vector<16x16xi32>
      %31 = arith.cmpi eq, %29, %30 : vector<16x16xi32>
      %32 = arith.extui %31 : vector<16x16xi1> to vector<16x16xi32>
      %33 = arith.sitofp %32 : vector<16x16xi32> to vector<16x16xf32>
      %34 = vector.extract_strided_slice %24 {offsets = [0, 0], sizes = [1, 16], strides = [1, 1]} : vector<16x16xf32> to vector<1x16xf32>
      %35 = vector.extract_strided_slice %33 {offsets = [0, 0], sizes = [1, 16], strides = [1, 1]} : vector<16x16xf32> to vector<1x16xf32>
      %36 = vector.extract_strided_slice %24 {offsets = [0, 0], sizes = [1, 1], strides = [1, 1]} : vector<16x16xf32> to vector<1x1xf32>
      %cst_31 = arith.constant 1.000000e+00 : f32
      %37 = vector.broadcast %cst_31 : f32 to vector<1x1xf32>
      %38 = arith.divf %37, %36 : vector<1x1xf32>
      %39 = vector.broadcast %38 : vector<1x1xf32> to vector<1x16xf32>
      %40 = arith.mulf %34, %39 : vector<1x16xf32>
      %41 = vector.broadcast %38 : vector<1x1xf32> to vector<1x16xf32>
      %42 = arith.mulf %35, %41 : vector<1x16xf32>
      %43 = vector.extract_strided_slice %24 {offsets = [0, 0], sizes = [16, 1], strides = [1, 1]} : vector<16x16xf32> to vector<16x1xf32>
      %c0_i32_32 = arith.constant 0 : i32
      %44 = vector.broadcast %c0_i32_32 : i32 to vector<16x1xi32>
      %45 = arith.cmpi eq, %28, %44 : vector<16x1xi32>
      %cst_33 = arith.constant 0.000000e+00 : f32
      %46 = vector.broadcast %cst_33 : f32 to vector<16x1xf32>
      %47 = arith.select %45, %46, %43 : vector<16x1xi1>, vector<16x1xf32>
      %48 = vector.broadcast %47 : vector<16x1xf32> to vector<16x16xf32>
      %49 = vector.broadcast %40 : vector<1x16xf32> to vector<16x16xf32>
      %50 = arith.mulf %48, %49 : vector<16x16xf32>
      %51 = arith.subf %24, %50 : vector<16x16xf32>
      %52 = vector.broadcast %47 : vector<16x1xf32> to vector<16x16xf32>
      %53 = vector.broadcast %42 : vector<1x16xf32> to vector<16x16xf32>
      %54 = arith.mulf %52, %53 : vector<16x16xf32>
      %55 = arith.subf %33, %54 : vector<16x16xf32>
      %56 = vector.shape_cast %45 : vector<16x1xi1> to vector<16x1xi1>
      %57 = vector.broadcast %56 : vector<16x1xi1> to vector<16x16xi1>
      %58 = vector.shape_cast %40 : vector<1x16xf32> to vector<1x16xf32>
      %59 = vector.broadcast %58 : vector<1x16xf32> to vector<16x16xf32>
      %60 = arith.select %57, %59, %51 : vector<16x16xi1>, vector<16x16xf32>
      %61 = vector.shape_cast %45 : vector<16x1xi1> to vector<16x1xi1>
      %62 = vector.broadcast %61 : vector<16x1xi1> to vector<16x16xi1>
      %63 = vector.shape_cast %42 : vector<1x16xf32> to vector<1x16xf32>
      %64 = vector.broadcast %63 : vector<1x16xf32> to vector<16x16xf32>
      %65 = arith.select %62, %64, %55 : vector<16x16xi1>, vector<16x16xf32>
      %66 = vector.extract_strided_slice %60 {offsets = [1, 0], sizes = [1, 16], strides = [1, 1]} : vector<16x16xf32> to vector<1x16xf32>
      %67 = vector.extract_strided_slice %65 {offsets = [1, 0], sizes = [1, 16], strides = [1, 1]} : vector<16x16xf32> to vector<1x16xf32>
      %68 = vector.extract_strided_slice %60 {offsets = [1, 1], sizes = [1, 1], strides = [1, 1]} : vector<16x16xf32> to vector<1x1xf32>
      %cst_34 = arith.constant 1.000000e+00 : f32
      %69 = vector.broadcast %cst_34 : f32 to vector<1x1xf32>
      %70 = arith.divf %69, %68 : vector<1x1xf32>
      %71 = vector.broadcast %70 : vector<1x1xf32> to vector<1x16xf32>
      %72 = arith.mulf %66, %71 : vector<1x16xf32>
      %73 = vector.broadcast %70 : vector<1x1xf32> to vector<1x16xf32>
      %74 = arith.mulf %67, %73 : vector<1x16xf32>
      %75 = vector.extract_strided_slice %60 {offsets = [0, 1], sizes = [16, 1], strides = [1, 1]} : vector<16x16xf32> to vector<16x1xf32>
      %c1_i32 = arith.constant 1 : i32
      %76 = vector.broadcast %c1_i32 : i32 to vector<16x1xi32>
      %77 = arith.cmpi eq, %28, %76 : vector<16x1xi32>
      %cst_35 = arith.constant 0.000000e+00 : f32
      %78 = vector.broadcast %cst_35 : f32 to vector<16x1xf32>
      %79 = arith.select %77, %78, %75 : vector<16x1xi1>, vector<16x1xf32>
      %80 = vector.broadcast %79 : vector<16x1xf32> to vector<16x16xf32>
      %81 = vector.broadcast %72 : vector<1x16xf32> to vector<16x16xf32>
      %82 = arith.mulf %80, %81 : vector<16x16xf32>
      %83 = arith.subf %60, %82 : vector<16x16xf32>
      %84 = vector.broadcast %79 : vector<16x1xf32> to vector<16x16xf32>
      %85 = vector.broadcast %74 : vector<1x16xf32> to vector<16x16xf32>
      %86 = arith.mulf %84, %85 : vector<16x16xf32>
      %87 = arith.subf %65, %86 : vector<16x16xf32>
      %88 = vector.shape_cast %77 : vector<16x1xi1> to vector<16x1xi1>
      %89 = vector.broadcast %88 : vector<16x1xi1> to vector<16x16xi1>
      %90 = vector.shape_cast %72 : vector<1x16xf32> to vector<1x16xf32>
      %91 = vector.broadcast %90 : vector<1x16xf32> to vector<16x16xf32>
      %92 = arith.select %89, %91, %83 : vector<16x16xi1>, vector<16x16xf32>
      %93 = vector.shape_cast %77 : vector<16x1xi1> to vector<16x1xi1>
      %94 = vector.broadcast %93 : vector<16x1xi1> to vector<16x16xi1>
      %95 = vector.shape_cast %74 : vector<1x16xf32> to vector<1x16xf32>
      %96 = vector.broadcast %95 : vector<1x16xf32> to vector<16x16xf32>
      %97 = arith.select %94, %96, %87 : vector<16x16xi1>, vector<16x16xf32>
      %98 = vector.extract_strided_slice %92 {offsets = [2, 0], sizes = [1, 16], strides = [1, 1]} : vector<16x16xf32> to vector<1x16xf32>
      %99 = vector.extract_strided_slice %97 {offsets = [2, 0], sizes = [1, 16], strides = [1, 1]} : vector<16x16xf32> to vector<1x16xf32>
      %100 = vector.extract_strided_slice %92 {offsets = [2, 2], sizes = [1, 1], strides = [1, 1]} : vector<16x16xf32> to vector<1x1xf32>
      %cst_36 = arith.constant 1.000000e+00 : f32
      %101 = vector.broadcast %cst_36 : f32 to vector<1x1xf32>
      %102 = arith.divf %101, %100 : vector<1x1xf32>
      %103 = vector.broadcast %102 : vector<1x1xf32> to vector<1x16xf32>
      %104 = arith.mulf %98, %103 : vector<1x16xf32>
      %105 = vector.broadcast %102 : vector<1x1xf32> to vector<1x16xf32>
      %106 = arith.mulf %99, %105 : vector<1x16xf32>
      %107 = vector.extract_strided_slice %92 {offsets = [0, 2], sizes = [16, 1], strides = [1, 1]} : vector<16x16xf32> to vector<16x1xf32>
      %c2_i32 = arith.constant 2 : i32
      %108 = vector.broadcast %c2_i32 : i32 to vector<16x1xi32>
      %109 = arith.cmpi eq, %28, %108 : vector<16x1xi32>
      %cst_37 = arith.constant 0.000000e+00 : f32
      %110 = vector.broadcast %cst_37 : f32 to vector<16x1xf32>
      %111 = arith.select %109, %110, %107 : vector<16x1xi1>, vector<16x1xf32>
      %112 = vector.broadcast %111 : vector<16x1xf32> to vector<16x16xf32>
      %113 = vector.broadcast %104 : vector<1x16xf32> to vector<16x16xf32>
      %114 = arith.mulf %112, %113 : vector<16x16xf32>
      %115 = arith.subf %92, %114 : vector<16x16xf32>
      %116 = vector.broadcast %111 : vector<16x1xf32> to vector<16x16xf32>
      %117 = vector.broadcast %106 : vector<1x16xf32> to vector<16x16xf32>
      %118 = arith.mulf %116, %117 : vector<16x16xf32>
      %119 = arith.subf %97, %118 : vector<16x16xf32>
      %120 = vector.shape_cast %109 : vector<16x1xi1> to vector<16x1xi1>
      %121 = vector.broadcast %120 : vector<16x1xi1> to vector<16x16xi1>
      %122 = vector.shape_cast %104 : vector<1x16xf32> to vector<1x16xf32>
      %123 = vector.broadcast %122 : vector<1x16xf32> to vector<16x16xf32>
      %124 = arith.select %121, %123, %115 : vector<16x16xi1>, vector<16x16xf32>
      %125 = vector.shape_cast %109 : vector<16x1xi1> to vector<16x1xi1>
      %126 = vector.broadcast %125 : vector<16x1xi1> to vector<16x16xi1>
      %127 = vector.shape_cast %106 : vector<1x16xf32> to vector<1x16xf32>
      %128 = vector.broadcast %127 : vector<1x16xf32> to vector<16x16xf32>
      %129 = arith.select %126, %128, %119 : vector<16x16xi1>, vector<16x16xf32>
      %130 = vector.extract_strided_slice %124 {offsets = [3, 0], sizes = [1, 16], strides = [1, 1]} : vector<16x16xf32> to vector<1x16xf32>
      %131 = vector.extract_strided_slice %129 {offsets = [3, 0], sizes = [1, 16], strides = [1, 1]} : vector<16x16xf32> to vector<1x16xf32>
      %132 = vector.extract_strided_slice %124 {offsets = [3, 3], sizes = [1, 1], strides = [1, 1]} : vector<16x16xf32> to vector<1x1xf32>
      %cst_38 = arith.constant 1.000000e+00 : f32
      %133 = vector.broadcast %cst_38 : f32 to vector<1x1xf32>
      %134 = arith.divf %133, %132 : vector<1x1xf32>
      %135 = vector.broadcast %134 : vector<1x1xf32> to vector<1x16xf32>
      %136 = arith.mulf %130, %135 : vector<1x16xf32>
      %137 = vector.broadcast %134 : vector<1x1xf32> to vector<1x16xf32>
      %138 = arith.mulf %131, %137 : vector<1x16xf32>
      %139 = vector.extract_strided_slice %124 {offsets = [0, 3], sizes = [16, 1], strides = [1, 1]} : vector<16x16xf32> to vector<16x1xf32>
      %c3_i32 = arith.constant 3 : i32
      %140 = vector.broadcast %c3_i32 : i32 to vector<16x1xi32>
      %141 = arith.cmpi eq, %28, %140 : vector<16x1xi32>
      %cst_39 = arith.constant 0.000000e+00 : f32
      %142 = vector.broadcast %cst_39 : f32 to vector<16x1xf32>
      %143 = arith.select %141, %142, %139 : vector<16x1xi1>, vector<16x1xf32>
      %144 = vector.broadcast %143 : vector<16x1xf32> to vector<16x16xf32>
      %145 = vector.broadcast %136 : vector<1x16xf32> to vector<16x16xf32>
      %146 = arith.mulf %144, %145 : vector<16x16xf32>
      %147 = arith.subf %124, %146 : vector<16x16xf32>
      %148 = vector.broadcast %143 : vector<16x1xf32> to vector<16x16xf32>
      %149 = vector.broadcast %138 : vector<1x16xf32> to vector<16x16xf32>
      %150 = arith.mulf %148, %149 : vector<16x16xf32>
      %151 = arith.subf %129, %150 : vector<16x16xf32>
      %152 = vector.shape_cast %141 : vector<16x1xi1> to vector<16x1xi1>
      %153 = vector.broadcast %152 : vector<16x1xi1> to vector<16x16xi1>
      %154 = vector.shape_cast %136 : vector<1x16xf32> to vector<1x16xf32>
      %155 = vector.broadcast %154 : vector<1x16xf32> to vector<16x16xf32>
      %156 = arith.select %153, %155, %147 : vector<16x16xi1>, vector<16x16xf32>
      %157 = vector.shape_cast %141 : vector<16x1xi1> to vector<16x1xi1>
      %158 = vector.broadcast %157 : vector<16x1xi1> to vector<16x16xi1>
      %159 = vector.shape_cast %138 : vector<1x16xf32> to vector<1x16xf32>
      %160 = vector.broadcast %159 : vector<1x16xf32> to vector<16x16xf32>
      %161 = arith.select %158, %160, %151 : vector<16x16xi1>, vector<16x16xf32>
      %162 = vector.extract_strided_slice %156 {offsets = [4, 0], sizes = [1, 16], strides = [1, 1]} : vector<16x16xf32> to vector<1x16xf32>
      %163 = vector.extract_strided_slice %161 {offsets = [4, 0], sizes = [1, 16], strides = [1, 1]} : vector<16x16xf32> to vector<1x16xf32>
      %164 = vector.extract_strided_slice %156 {offsets = [4, 4], sizes = [1, 1], strides = [1, 1]} : vector<16x16xf32> to vector<1x1xf32>
      %cst_40 = arith.constant 1.000000e+00 : f32
      %165 = vector.broadcast %cst_40 : f32 to vector<1x1xf32>
      %166 = arith.divf %165, %164 : vector<1x1xf32>
      %167 = vector.broadcast %166 : vector<1x1xf32> to vector<1x16xf32>
      %168 = arith.mulf %162, %167 : vector<1x16xf32>
      %169 = vector.broadcast %166 : vector<1x1xf32> to vector<1x16xf32>
      %170 = arith.mulf %163, %169 : vector<1x16xf32>
      %171 = vector.extract_strided_slice %156 {offsets = [0, 4], sizes = [16, 1], strides = [1, 1]} : vector<16x16xf32> to vector<16x1xf32>
      %c4_i32 = arith.constant 4 : i32
      %172 = vector.broadcast %c4_i32 : i32 to vector<16x1xi32>
      %173 = arith.cmpi eq, %28, %172 : vector<16x1xi32>
      %cst_41 = arith.constant 0.000000e+00 : f32
      %174 = vector.broadcast %cst_41 : f32 to vector<16x1xf32>
      %175 = arith.select %173, %174, %171 : vector<16x1xi1>, vector<16x1xf32>
      %176 = vector.broadcast %175 : vector<16x1xf32> to vector<16x16xf32>
      %177 = vector.broadcast %168 : vector<1x16xf32> to vector<16x16xf32>
      %178 = arith.mulf %176, %177 : vector<16x16xf32>
      %179 = arith.subf %156, %178 : vector<16x16xf32>
      %180 = vector.broadcast %175 : vector<16x1xf32> to vector<16x16xf32>
      %181 = vector.broadcast %170 : vector<1x16xf32> to vector<16x16xf32>
      %182 = arith.mulf %180, %181 : vector<16x16xf32>
      %183 = arith.subf %161, %182 : vector<16x16xf32>
      %184 = vector.shape_cast %173 : vector<16x1xi1> to vector<16x1xi1>
      %185 = vector.broadcast %184 : vector<16x1xi1> to vector<16x16xi1>
      %186 = vector.shape_cast %168 : vector<1x16xf32> to vector<1x16xf32>
      %187 = vector.broadcast %186 : vector<1x16xf32> to vector<16x16xf32>
      %188 = arith.select %185, %187, %179 : vector<16x16xi1>, vector<16x16xf32>
      %189 = vector.shape_cast %173 : vector<16x1xi1> to vector<16x1xi1>
      %190 = vector.broadcast %189 : vector<16x1xi1> to vector<16x16xi1>
      %191 = vector.shape_cast %170 : vector<1x16xf32> to vector<1x16xf32>
      %192 = vector.broadcast %191 : vector<1x16xf32> to vector<16x16xf32>
      %193 = arith.select %190, %192, %183 : vector<16x16xi1>, vector<16x16xf32>
      %194 = vector.extract_strided_slice %188 {offsets = [5, 0], sizes = [1, 16], strides = [1, 1]} : vector<16x16xf32> to vector<1x16xf32>
      %195 = vector.extract_strided_slice %193 {offsets = [5, 0], sizes = [1, 16], strides = [1, 1]} : vector<16x16xf32> to vector<1x16xf32>
      %196 = vector.extract_strided_slice %188 {offsets = [5, 5], sizes = [1, 1], strides = [1, 1]} : vector<16x16xf32> to vector<1x1xf32>
      %cst_42 = arith.constant 1.000000e+00 : f32
      %197 = vector.broadcast %cst_42 : f32 to vector<1x1xf32>
      %198 = arith.divf %197, %196 : vector<1x1xf32>
      %199 = vector.broadcast %198 : vector<1x1xf32> to vector<1x16xf32>
      %200 = arith.mulf %194, %199 : vector<1x16xf32>
      %201 = vector.broadcast %198 : vector<1x1xf32> to vector<1x16xf32>
      %202 = arith.mulf %195, %201 : vector<1x16xf32>
      %203 = vector.extract_strided_slice %188 {offsets = [0, 5], sizes = [16, 1], strides = [1, 1]} : vector<16x16xf32> to vector<16x1xf32>
      %c5_i32 = arith.constant 5 : i32
      %204 = vector.broadcast %c5_i32 : i32 to vector<16x1xi32>
      %205 = arith.cmpi eq, %28, %204 : vector<16x1xi32>
      %cst_43 = arith.constant 0.000000e+00 : f32
      %206 = vector.broadcast %cst_43 : f32 to vector<16x1xf32>
      %207 = arith.select %205, %206, %203 : vector<16x1xi1>, vector<16x1xf32>
      %208 = vector.broadcast %207 : vector<16x1xf32> to vector<16x16xf32>
      %209 = vector.broadcast %200 : vector<1x16xf32> to vector<16x16xf32>
      %210 = arith.mulf %208, %209 : vector<16x16xf32>
      %211 = arith.subf %188, %210 : vector<16x16xf32>
      %212 = vector.broadcast %207 : vector<16x1xf32> to vector<16x16xf32>
      %213 = vector.broadcast %202 : vector<1x16xf32> to vector<16x16xf32>
      %214 = arith.mulf %212, %213 : vector<16x16xf32>
      %215 = arith.subf %193, %214 : vector<16x16xf32>
      %216 = vector.shape_cast %205 : vector<16x1xi1> to vector<16x1xi1>
      %217 = vector.broadcast %216 : vector<16x1xi1> to vector<16x16xi1>
      %218 = vector.shape_cast %200 : vector<1x16xf32> to vector<1x16xf32>
      %219 = vector.broadcast %218 : vector<1x16xf32> to vector<16x16xf32>
      %220 = arith.select %217, %219, %211 : vector<16x16xi1>, vector<16x16xf32>
      %221 = vector.shape_cast %205 : vector<16x1xi1> to vector<16x1xi1>
      %222 = vector.broadcast %221 : vector<16x1xi1> to vector<16x16xi1>
      %223 = vector.shape_cast %202 : vector<1x16xf32> to vector<1x16xf32>
      %224 = vector.broadcast %223 : vector<1x16xf32> to vector<16x16xf32>
      %225 = arith.select %222, %224, %215 : vector<16x16xi1>, vector<16x16xf32>
      %226 = vector.extract_strided_slice %220 {offsets = [6, 0], sizes = [1, 16], strides = [1, 1]} : vector<16x16xf32> to vector<1x16xf32>
      %227 = vector.extract_strided_slice %225 {offsets = [6, 0], sizes = [1, 16], strides = [1, 1]} : vector<16x16xf32> to vector<1x16xf32>
      %228 = vector.extract_strided_slice %220 {offsets = [6, 6], sizes = [1, 1], strides = [1, 1]} : vector<16x16xf32> to vector<1x1xf32>
      %cst_44 = arith.constant 1.000000e+00 : f32
      %229 = vector.broadcast %cst_44 : f32 to vector<1x1xf32>
      %230 = arith.divf %229, %228 : vector<1x1xf32>
      %231 = vector.broadcast %230 : vector<1x1xf32> to vector<1x16xf32>
      %232 = arith.mulf %226, %231 : vector<1x16xf32>
      %233 = vector.broadcast %230 : vector<1x1xf32> to vector<1x16xf32>
      %234 = arith.mulf %227, %233 : vector<1x16xf32>
      %235 = vector.extract_strided_slice %220 {offsets = [0, 6], sizes = [16, 1], strides = [1, 1]} : vector<16x16xf32> to vector<16x1xf32>
      %c6_i32 = arith.constant 6 : i32
      %236 = vector.broadcast %c6_i32 : i32 to vector<16x1xi32>
      %237 = arith.cmpi eq, %28, %236 : vector<16x1xi32>
      %cst_45 = arith.constant 0.000000e+00 : f32
      %238 = vector.broadcast %cst_45 : f32 to vector<16x1xf32>
      %239 = arith.select %237, %238, %235 : vector<16x1xi1>, vector<16x1xf32>
      %240 = vector.broadcast %239 : vector<16x1xf32> to vector<16x16xf32>
      %241 = vector.broadcast %232 : vector<1x16xf32> to vector<16x16xf32>
      %242 = arith.mulf %240, %241 : vector<16x16xf32>
      %243 = arith.subf %220, %242 : vector<16x16xf32>
      %244 = vector.broadcast %239 : vector<16x1xf32> to vector<16x16xf32>
      %245 = vector.broadcast %234 : vector<1x16xf32> to vector<16x16xf32>
      %246 = arith.mulf %244, %245 : vector<16x16xf32>
      %247 = arith.subf %225, %246 : vector<16x16xf32>
      %248 = vector.shape_cast %237 : vector<16x1xi1> to vector<16x1xi1>
      %249 = vector.broadcast %248 : vector<16x1xi1> to vector<16x16xi1>
      %250 = vector.shape_cast %232 : vector<1x16xf32> to vector<1x16xf32>
      %251 = vector.broadcast %250 : vector<1x16xf32> to vector<16x16xf32>
      %252 = arith.select %249, %251, %243 : vector<16x16xi1>, vector<16x16xf32>
      %253 = vector.shape_cast %237 : vector<16x1xi1> to vector<16x1xi1>
      %254 = vector.broadcast %253 : vector<16x1xi1> to vector<16x16xi1>
      %255 = vector.shape_cast %234 : vector<1x16xf32> to vector<1x16xf32>
      %256 = vector.broadcast %255 : vector<1x16xf32> to vector<16x16xf32>
      %257 = arith.select %254, %256, %247 : vector<16x16xi1>, vector<16x16xf32>
      %258 = vector.extract_strided_slice %252 {offsets = [7, 0], sizes = [1, 16], strides = [1, 1]} : vector<16x16xf32> to vector<1x16xf32>
      %259 = vector.extract_strided_slice %257 {offsets = [7, 0], sizes = [1, 16], strides = [1, 1]} : vector<16x16xf32> to vector<1x16xf32>
      %260 = vector.extract_strided_slice %252 {offsets = [7, 7], sizes = [1, 1], strides = [1, 1]} : vector<16x16xf32> to vector<1x1xf32>
      %cst_46 = arith.constant 1.000000e+00 : f32
      %261 = vector.broadcast %cst_46 : f32 to vector<1x1xf32>
      %262 = arith.divf %261, %260 : vector<1x1xf32>
      %263 = vector.broadcast %262 : vector<1x1xf32> to vector<1x16xf32>
      %264 = arith.mulf %258, %263 : vector<1x16xf32>
      %265 = vector.broadcast %262 : vector<1x1xf32> to vector<1x16xf32>
      %266 = arith.mulf %259, %265 : vector<1x16xf32>
      %267 = vector.extract_strided_slice %252 {offsets = [0, 7], sizes = [16, 1], strides = [1, 1]} : vector<16x16xf32> to vector<16x1xf32>
      %c7_i32 = arith.constant 7 : i32
      %268 = vector.broadcast %c7_i32 : i32 to vector<16x1xi32>
      %269 = arith.cmpi eq, %28, %268 : vector<16x1xi32>
      %cst_47 = arith.constant 0.000000e+00 : f32
      %270 = vector.broadcast %cst_47 : f32 to vector<16x1xf32>
      %271 = arith.select %269, %270, %267 : vector<16x1xi1>, vector<16x1xf32>
      %272 = vector.broadcast %271 : vector<16x1xf32> to vector<16x16xf32>
      %273 = vector.broadcast %264 : vector<1x16xf32> to vector<16x16xf32>
      %274 = arith.mulf %272, %273 : vector<16x16xf32>
      %275 = arith.subf %252, %274 : vector<16x16xf32>
      %276 = vector.broadcast %271 : vector<16x1xf32> to vector<16x16xf32>
      %277 = vector.broadcast %266 : vector<1x16xf32> to vector<16x16xf32>
      %278 = arith.mulf %276, %277 : vector<16x16xf32>
      %279 = arith.subf %257, %278 : vector<16x16xf32>
      %280 = vector.shape_cast %269 : vector<16x1xi1> to vector<16x1xi1>
      %281 = vector.broadcast %280 : vector<16x1xi1> to vector<16x16xi1>
      %282 = vector.shape_cast %264 : vector<1x16xf32> to vector<1x16xf32>
      %283 = vector.broadcast %282 : vector<1x16xf32> to vector<16x16xf32>
      %284 = arith.select %281, %283, %275 : vector<16x16xi1>, vector<16x16xf32>
      %285 = vector.shape_cast %269 : vector<16x1xi1> to vector<16x1xi1>
      %286 = vector.broadcast %285 : vector<16x1xi1> to vector<16x16xi1>
      %287 = vector.shape_cast %266 : vector<1x16xf32> to vector<1x16xf32>
      %288 = vector.broadcast %287 : vector<1x16xf32> to vector<16x16xf32>
      %289 = arith.select %286, %288, %279 : vector<16x16xi1>, vector<16x16xf32>
      %290 = vector.extract_strided_slice %284 {offsets = [8, 0], sizes = [1, 16], strides = [1, 1]} : vector<16x16xf32> to vector<1x16xf32>
      %291 = vector.extract_strided_slice %289 {offsets = [8, 0], sizes = [1, 16], strides = [1, 1]} : vector<16x16xf32> to vector<1x16xf32>
      %292 = vector.extract_strided_slice %284 {offsets = [8, 8], sizes = [1, 1], strides = [1, 1]} : vector<16x16xf32> to vector<1x1xf32>
      %cst_48 = arith.constant 1.000000e+00 : f32
      %293 = vector.broadcast %cst_48 : f32 to vector<1x1xf32>
      %294 = arith.divf %293, %292 : vector<1x1xf32>
      %295 = vector.broadcast %294 : vector<1x1xf32> to vector<1x16xf32>
      %296 = arith.mulf %290, %295 : vector<1x16xf32>
      %297 = vector.broadcast %294 : vector<1x1xf32> to vector<1x16xf32>
      %298 = arith.mulf %291, %297 : vector<1x16xf32>
      %299 = vector.extract_strided_slice %284 {offsets = [0, 8], sizes = [16, 1], strides = [1, 1]} : vector<16x16xf32> to vector<16x1xf32>
      %c8_i32 = arith.constant 8 : i32
      %300 = vector.broadcast %c8_i32 : i32 to vector<16x1xi32>
      %301 = arith.cmpi eq, %28, %300 : vector<16x1xi32>
      %cst_49 = arith.constant 0.000000e+00 : f32
      %302 = vector.broadcast %cst_49 : f32 to vector<16x1xf32>
      %303 = arith.select %301, %302, %299 : vector<16x1xi1>, vector<16x1xf32>
      %304 = vector.broadcast %303 : vector<16x1xf32> to vector<16x16xf32>
      %305 = vector.broadcast %296 : vector<1x16xf32> to vector<16x16xf32>
      %306 = arith.mulf %304, %305 : vector<16x16xf32>
      %307 = arith.subf %284, %306 : vector<16x16xf32>
      %308 = vector.broadcast %303 : vector<16x1xf32> to vector<16x16xf32>
      %309 = vector.broadcast %298 : vector<1x16xf32> to vector<16x16xf32>
      %310 = arith.mulf %308, %309 : vector<16x16xf32>
      %311 = arith.subf %289, %310 : vector<16x16xf32>
      %312 = vector.shape_cast %301 : vector<16x1xi1> to vector<16x1xi1>
      %313 = vector.broadcast %312 : vector<16x1xi1> to vector<16x16xi1>
      %314 = vector.shape_cast %296 : vector<1x16xf32> to vector<1x16xf32>
      %315 = vector.broadcast %314 : vector<1x16xf32> to vector<16x16xf32>
      %316 = arith.select %313, %315, %307 : vector<16x16xi1>, vector<16x16xf32>
      %317 = vector.shape_cast %301 : vector<16x1xi1> to vector<16x1xi1>
      %318 = vector.broadcast %317 : vector<16x1xi1> to vector<16x16xi1>
      %319 = vector.shape_cast %298 : vector<1x16xf32> to vector<1x16xf32>
      %320 = vector.broadcast %319 : vector<1x16xf32> to vector<16x16xf32>
      %321 = arith.select %318, %320, %311 : vector<16x16xi1>, vector<16x16xf32>
      %322 = vector.extract_strided_slice %316 {offsets = [9, 0], sizes = [1, 16], strides = [1, 1]} : vector<16x16xf32> to vector<1x16xf32>
      %323 = vector.extract_strided_slice %321 {offsets = [9, 0], sizes = [1, 16], strides = [1, 1]} : vector<16x16xf32> to vector<1x16xf32>
      %324 = vector.extract_strided_slice %316 {offsets = [9, 9], sizes = [1, 1], strides = [1, 1]} : vector<16x16xf32> to vector<1x1xf32>
      %cst_50 = arith.constant 1.000000e+00 : f32
      %325 = vector.broadcast %cst_50 : f32 to vector<1x1xf32>
      %326 = arith.divf %325, %324 : vector<1x1xf32>
      %327 = vector.broadcast %326 : vector<1x1xf32> to vector<1x16xf32>
      %328 = arith.mulf %322, %327 : vector<1x16xf32>
      %329 = vector.broadcast %326 : vector<1x1xf32> to vector<1x16xf32>
      %330 = arith.mulf %323, %329 : vector<1x16xf32>
      %331 = vector.extract_strided_slice %316 {offsets = [0, 9], sizes = [16, 1], strides = [1, 1]} : vector<16x16xf32> to vector<16x1xf32>
      %c9_i32 = arith.constant 9 : i32
      %332 = vector.broadcast %c9_i32 : i32 to vector<16x1xi32>
      %333 = arith.cmpi eq, %28, %332 : vector<16x1xi32>
      %cst_51 = arith.constant 0.000000e+00 : f32
      %334 = vector.broadcast %cst_51 : f32 to vector<16x1xf32>
      %335 = arith.select %333, %334, %331 : vector<16x1xi1>, vector<16x1xf32>
      %336 = vector.broadcast %335 : vector<16x1xf32> to vector<16x16xf32>
      %337 = vector.broadcast %328 : vector<1x16xf32> to vector<16x16xf32>
      %338 = arith.mulf %336, %337 : vector<16x16xf32>
      %339 = arith.subf %316, %338 : vector<16x16xf32>
      %340 = vector.broadcast %335 : vector<16x1xf32> to vector<16x16xf32>
      %341 = vector.broadcast %330 : vector<1x16xf32> to vector<16x16xf32>
      %342 = arith.mulf %340, %341 : vector<16x16xf32>
      %343 = arith.subf %321, %342 : vector<16x16xf32>
      %344 = vector.shape_cast %333 : vector<16x1xi1> to vector<16x1xi1>
      %345 = vector.broadcast %344 : vector<16x1xi1> to vector<16x16xi1>
      %346 = vector.shape_cast %328 : vector<1x16xf32> to vector<1x16xf32>
      %347 = vector.broadcast %346 : vector<1x16xf32> to vector<16x16xf32>
      %348 = arith.select %345, %347, %339 : vector<16x16xi1>, vector<16x16xf32>
      %349 = vector.shape_cast %333 : vector<16x1xi1> to vector<16x1xi1>
      %350 = vector.broadcast %349 : vector<16x1xi1> to vector<16x16xi1>
      %351 = vector.shape_cast %330 : vector<1x16xf32> to vector<1x16xf32>
      %352 = vector.broadcast %351 : vector<1x16xf32> to vector<16x16xf32>
      %353 = arith.select %350, %352, %343 : vector<16x16xi1>, vector<16x16xf32>
      %354 = vector.extract_strided_slice %348 {offsets = [10, 0], sizes = [1, 16], strides = [1, 1]} : vector<16x16xf32> to vector<1x16xf32>
      %355 = vector.extract_strided_slice %353 {offsets = [10, 0], sizes = [1, 16], strides = [1, 1]} : vector<16x16xf32> to vector<1x16xf32>
      %356 = vector.extract_strided_slice %348 {offsets = [10, 10], sizes = [1, 1], strides = [1, 1]} : vector<16x16xf32> to vector<1x1xf32>
      %cst_52 = arith.constant 1.000000e+00 : f32
      %357 = vector.broadcast %cst_52 : f32 to vector<1x1xf32>
      %358 = arith.divf %357, %356 : vector<1x1xf32>
      %359 = vector.broadcast %358 : vector<1x1xf32> to vector<1x16xf32>
      %360 = arith.mulf %354, %359 : vector<1x16xf32>
      %361 = vector.broadcast %358 : vector<1x1xf32> to vector<1x16xf32>
      %362 = arith.mulf %355, %361 : vector<1x16xf32>
      %363 = vector.extract_strided_slice %348 {offsets = [0, 10], sizes = [16, 1], strides = [1, 1]} : vector<16x16xf32> to vector<16x1xf32>
      %c10_i32 = arith.constant 10 : i32
      %364 = vector.broadcast %c10_i32 : i32 to vector<16x1xi32>
      %365 = arith.cmpi eq, %28, %364 : vector<16x1xi32>
      %cst_53 = arith.constant 0.000000e+00 : f32
      %366 = vector.broadcast %cst_53 : f32 to vector<16x1xf32>
      %367 = arith.select %365, %366, %363 : vector<16x1xi1>, vector<16x1xf32>
      %368 = vector.broadcast %367 : vector<16x1xf32> to vector<16x16xf32>
      %369 = vector.broadcast %360 : vector<1x16xf32> to vector<16x16xf32>
      %370 = arith.mulf %368, %369 : vector<16x16xf32>
      %371 = arith.subf %348, %370 : vector<16x16xf32>
      %372 = vector.broadcast %367 : vector<16x1xf32> to vector<16x16xf32>
      %373 = vector.broadcast %362 : vector<1x16xf32> to vector<16x16xf32>
      %374 = arith.mulf %372, %373 : vector<16x16xf32>
      %375 = arith.subf %353, %374 : vector<16x16xf32>
      %376 = vector.shape_cast %365 : vector<16x1xi1> to vector<16x1xi1>
      %377 = vector.broadcast %376 : vector<16x1xi1> to vector<16x16xi1>
      %378 = vector.shape_cast %360 : vector<1x16xf32> to vector<1x16xf32>
      %379 = vector.broadcast %378 : vector<1x16xf32> to vector<16x16xf32>
      %380 = arith.select %377, %379, %371 : vector<16x16xi1>, vector<16x16xf32>
      %381 = vector.shape_cast %365 : vector<16x1xi1> to vector<16x1xi1>
      %382 = vector.broadcast %381 : vector<16x1xi1> to vector<16x16xi1>
      %383 = vector.shape_cast %362 : vector<1x16xf32> to vector<1x16xf32>
      %384 = vector.broadcast %383 : vector<1x16xf32> to vector<16x16xf32>
      %385 = arith.select %382, %384, %375 : vector<16x16xi1>, vector<16x16xf32>
      %386 = vector.extract_strided_slice %380 {offsets = [11, 0], sizes = [1, 16], strides = [1, 1]} : vector<16x16xf32> to vector<1x16xf32>
      %387 = vector.extract_strided_slice %385 {offsets = [11, 0], sizes = [1, 16], strides = [1, 1]} : vector<16x16xf32> to vector<1x16xf32>
      %388 = vector.extract_strided_slice %380 {offsets = [11, 11], sizes = [1, 1], strides = [1, 1]} : vector<16x16xf32> to vector<1x1xf32>
      %cst_54 = arith.constant 1.000000e+00 : f32
      %389 = vector.broadcast %cst_54 : f32 to vector<1x1xf32>
      %390 = arith.divf %389, %388 : vector<1x1xf32>
      %391 = vector.broadcast %390 : vector<1x1xf32> to vector<1x16xf32>
      %392 = arith.mulf %386, %391 : vector<1x16xf32>
      %393 = vector.broadcast %390 : vector<1x1xf32> to vector<1x16xf32>
      %394 = arith.mulf %387, %393 : vector<1x16xf32>
      %395 = vector.extract_strided_slice %380 {offsets = [0, 11], sizes = [16, 1], strides = [1, 1]} : vector<16x16xf32> to vector<16x1xf32>
      %c11_i32 = arith.constant 11 : i32
      %396 = vector.broadcast %c11_i32 : i32 to vector<16x1xi32>
      %397 = arith.cmpi eq, %28, %396 : vector<16x1xi32>
      %cst_55 = arith.constant 0.000000e+00 : f32
      %398 = vector.broadcast %cst_55 : f32 to vector<16x1xf32>
      %399 = arith.select %397, %398, %395 : vector<16x1xi1>, vector<16x1xf32>
      %400 = vector.broadcast %399 : vector<16x1xf32> to vector<16x16xf32>
      %401 = vector.broadcast %392 : vector<1x16xf32> to vector<16x16xf32>
      %402 = arith.mulf %400, %401 : vector<16x16xf32>
      %403 = arith.subf %380, %402 : vector<16x16xf32>
      %404 = vector.broadcast %399 : vector<16x1xf32> to vector<16x16xf32>
      %405 = vector.broadcast %394 : vector<1x16xf32> to vector<16x16xf32>
      %406 = arith.mulf %404, %405 : vector<16x16xf32>
      %407 = arith.subf %385, %406 : vector<16x16xf32>
      %408 = vector.shape_cast %397 : vector<16x1xi1> to vector<16x1xi1>
      %409 = vector.broadcast %408 : vector<16x1xi1> to vector<16x16xi1>
      %410 = vector.shape_cast %392 : vector<1x16xf32> to vector<1x16xf32>
      %411 = vector.broadcast %410 : vector<1x16xf32> to vector<16x16xf32>
      %412 = arith.select %409, %411, %403 : vector<16x16xi1>, vector<16x16xf32>
      %413 = vector.shape_cast %397 : vector<16x1xi1> to vector<16x1xi1>
      %414 = vector.broadcast %413 : vector<16x1xi1> to vector<16x16xi1>
      %415 = vector.shape_cast %394 : vector<1x16xf32> to vector<1x16xf32>
      %416 = vector.broadcast %415 : vector<1x16xf32> to vector<16x16xf32>
      %417 = arith.select %414, %416, %407 : vector<16x16xi1>, vector<16x16xf32>
      %418 = vector.extract_strided_slice %412 {offsets = [12, 0], sizes = [1, 16], strides = [1, 1]} : vector<16x16xf32> to vector<1x16xf32>
      %419 = vector.extract_strided_slice %417 {offsets = [12, 0], sizes = [1, 16], strides = [1, 1]} : vector<16x16xf32> to vector<1x16xf32>
      %420 = vector.extract_strided_slice %412 {offsets = [12, 12], sizes = [1, 1], strides = [1, 1]} : vector<16x16xf32> to vector<1x1xf32>
      %cst_56 = arith.constant 1.000000e+00 : f32
      %421 = vector.broadcast %cst_56 : f32 to vector<1x1xf32>
      %422 = arith.divf %421, %420 : vector<1x1xf32>
      %423 = vector.broadcast %422 : vector<1x1xf32> to vector<1x16xf32>
      %424 = arith.mulf %418, %423 : vector<1x16xf32>
      %425 = vector.broadcast %422 : vector<1x1xf32> to vector<1x16xf32>
      %426 = arith.mulf %419, %425 : vector<1x16xf32>
      %427 = vector.extract_strided_slice %412 {offsets = [0, 12], sizes = [16, 1], strides = [1, 1]} : vector<16x16xf32> to vector<16x1xf32>
      %c12_i32 = arith.constant 12 : i32
      %428 = vector.broadcast %c12_i32 : i32 to vector<16x1xi32>
      %429 = arith.cmpi eq, %28, %428 : vector<16x1xi32>
      %cst_57 = arith.constant 0.000000e+00 : f32
      %430 = vector.broadcast %cst_57 : f32 to vector<16x1xf32>
      %431 = arith.select %429, %430, %427 : vector<16x1xi1>, vector<16x1xf32>
      %432 = vector.broadcast %431 : vector<16x1xf32> to vector<16x16xf32>
      %433 = vector.broadcast %424 : vector<1x16xf32> to vector<16x16xf32>
      %434 = arith.mulf %432, %433 : vector<16x16xf32>
      %435 = arith.subf %412, %434 : vector<16x16xf32>
      %436 = vector.broadcast %431 : vector<16x1xf32> to vector<16x16xf32>
      %437 = vector.broadcast %426 : vector<1x16xf32> to vector<16x16xf32>
      %438 = arith.mulf %436, %437 : vector<16x16xf32>
      %439 = arith.subf %417, %438 : vector<16x16xf32>
      %440 = vector.shape_cast %429 : vector<16x1xi1> to vector<16x1xi1>
      %441 = vector.broadcast %440 : vector<16x1xi1> to vector<16x16xi1>
      %442 = vector.shape_cast %424 : vector<1x16xf32> to vector<1x16xf32>
      %443 = vector.broadcast %442 : vector<1x16xf32> to vector<16x16xf32>
      %444 = arith.select %441, %443, %435 : vector<16x16xi1>, vector<16x16xf32>
      %445 = vector.shape_cast %429 : vector<16x1xi1> to vector<16x1xi1>
      %446 = vector.broadcast %445 : vector<16x1xi1> to vector<16x16xi1>
      %447 = vector.shape_cast %426 : vector<1x16xf32> to vector<1x16xf32>
      %448 = vector.broadcast %447 : vector<1x16xf32> to vector<16x16xf32>
      %449 = arith.select %446, %448, %439 : vector<16x16xi1>, vector<16x16xf32>
      %450 = vector.extract_strided_slice %444 {offsets = [13, 0], sizes = [1, 16], strides = [1, 1]} : vector<16x16xf32> to vector<1x16xf32>
      %451 = vector.extract_strided_slice %449 {offsets = [13, 0], sizes = [1, 16], strides = [1, 1]} : vector<16x16xf32> to vector<1x16xf32>
      %452 = vector.extract_strided_slice %444 {offsets = [13, 13], sizes = [1, 1], strides = [1, 1]} : vector<16x16xf32> to vector<1x1xf32>
      %cst_58 = arith.constant 1.000000e+00 : f32
      %453 = vector.broadcast %cst_58 : f32 to vector<1x1xf32>
      %454 = arith.divf %453, %452 : vector<1x1xf32>
      %455 = vector.broadcast %454 : vector<1x1xf32> to vector<1x16xf32>
      %456 = arith.mulf %450, %455 : vector<1x16xf32>
      %457 = vector.broadcast %454 : vector<1x1xf32> to vector<1x16xf32>
      %458 = arith.mulf %451, %457 : vector<1x16xf32>
      %459 = vector.extract_strided_slice %444 {offsets = [0, 13], sizes = [16, 1], strides = [1, 1]} : vector<16x16xf32> to vector<16x1xf32>
      %c13_i32 = arith.constant 13 : i32
      %460 = vector.broadcast %c13_i32 : i32 to vector<16x1xi32>
      %461 = arith.cmpi eq, %28, %460 : vector<16x1xi32>
      %cst_59 = arith.constant 0.000000e+00 : f32
      %462 = vector.broadcast %cst_59 : f32 to vector<16x1xf32>
      %463 = arith.select %461, %462, %459 : vector<16x1xi1>, vector<16x1xf32>
      %464 = vector.broadcast %463 : vector<16x1xf32> to vector<16x16xf32>
      %465 = vector.broadcast %456 : vector<1x16xf32> to vector<16x16xf32>
      %466 = arith.mulf %464, %465 : vector<16x16xf32>
      %467 = arith.subf %444, %466 : vector<16x16xf32>
      %468 = vector.broadcast %463 : vector<16x1xf32> to vector<16x16xf32>
      %469 = vector.broadcast %458 : vector<1x16xf32> to vector<16x16xf32>
      %470 = arith.mulf %468, %469 : vector<16x16xf32>
      %471 = arith.subf %449, %470 : vector<16x16xf32>
      %472 = vector.shape_cast %461 : vector<16x1xi1> to vector<16x1xi1>
      %473 = vector.broadcast %472 : vector<16x1xi1> to vector<16x16xi1>
      %474 = vector.shape_cast %456 : vector<1x16xf32> to vector<1x16xf32>
      %475 = vector.broadcast %474 : vector<1x16xf32> to vector<16x16xf32>
      %476 = arith.select %473, %475, %467 : vector<16x16xi1>, vector<16x16xf32>
      %477 = vector.shape_cast %461 : vector<16x1xi1> to vector<16x1xi1>
      %478 = vector.broadcast %477 : vector<16x1xi1> to vector<16x16xi1>
      %479 = vector.shape_cast %458 : vector<1x16xf32> to vector<1x16xf32>
      %480 = vector.broadcast %479 : vector<1x16xf32> to vector<16x16xf32>
      %481 = arith.select %478, %480, %471 : vector<16x16xi1>, vector<16x16xf32>
      %482 = vector.extract_strided_slice %476 {offsets = [14, 0], sizes = [1, 16], strides = [1, 1]} : vector<16x16xf32> to vector<1x16xf32>
      %483 = vector.extract_strided_slice %481 {offsets = [14, 0], sizes = [1, 16], strides = [1, 1]} : vector<16x16xf32> to vector<1x16xf32>
      %484 = vector.extract_strided_slice %476 {offsets = [14, 14], sizes = [1, 1], strides = [1, 1]} : vector<16x16xf32> to vector<1x1xf32>
      %cst_60 = arith.constant 1.000000e+00 : f32
      %485 = vector.broadcast %cst_60 : f32 to vector<1x1xf32>
      %486 = arith.divf %485, %484 : vector<1x1xf32>
      %487 = vector.broadcast %486 : vector<1x1xf32> to vector<1x16xf32>
      %488 = arith.mulf %482, %487 : vector<1x16xf32>
      %489 = vector.broadcast %486 : vector<1x1xf32> to vector<1x16xf32>
      %490 = arith.mulf %483, %489 : vector<1x16xf32>
      %491 = vector.extract_strided_slice %476 {offsets = [0, 14], sizes = [16, 1], strides = [1, 1]} : vector<16x16xf32> to vector<16x1xf32>
      %c14_i32 = arith.constant 14 : i32
      %492 = vector.broadcast %c14_i32 : i32 to vector<16x1xi32>
      %493 = arith.cmpi eq, %28, %492 : vector<16x1xi32>
      %cst_61 = arith.constant 0.000000e+00 : f32
      %494 = vector.broadcast %cst_61 : f32 to vector<16x1xf32>
      %495 = arith.select %493, %494, %491 : vector<16x1xi1>, vector<16x1xf32>
      %496 = vector.broadcast %495 : vector<16x1xf32> to vector<16x16xf32>
      %497 = vector.broadcast %488 : vector<1x16xf32> to vector<16x16xf32>
      %498 = arith.mulf %496, %497 : vector<16x16xf32>
      %499 = arith.subf %476, %498 : vector<16x16xf32>
      %500 = vector.broadcast %495 : vector<16x1xf32> to vector<16x16xf32>
      %501 = vector.broadcast %490 : vector<1x16xf32> to vector<16x16xf32>
      %502 = arith.mulf %500, %501 : vector<16x16xf32>
      %503 = arith.subf %481, %502 : vector<16x16xf32>
      %504 = vector.shape_cast %493 : vector<16x1xi1> to vector<16x1xi1>
      %505 = vector.broadcast %504 : vector<16x1xi1> to vector<16x16xi1>
      %506 = vector.shape_cast %488 : vector<1x16xf32> to vector<1x16xf32>
      %507 = vector.broadcast %506 : vector<1x16xf32> to vector<16x16xf32>
      %508 = arith.select %505, %507, %499 : vector<16x16xi1>, vector<16x16xf32>
      %509 = vector.shape_cast %493 : vector<16x1xi1> to vector<16x1xi1>
      %510 = vector.broadcast %509 : vector<16x1xi1> to vector<16x16xi1>
      %511 = vector.shape_cast %490 : vector<1x16xf32> to vector<1x16xf32>
      %512 = vector.broadcast %511 : vector<1x16xf32> to vector<16x16xf32>
      %513 = arith.select %510, %512, %503 : vector<16x16xi1>, vector<16x16xf32>
      %514 = vector.extract_strided_slice %513 {offsets = [15, 0], sizes = [1, 16], strides = [1, 1]} : vector<16x16xf32> to vector<1x16xf32>
      %515 = vector.extract_strided_slice %508 {offsets = [15, 15], sizes = [1, 1], strides = [1, 1]} : vector<16x16xf32> to vector<1x1xf32>
      %cst_62 = arith.constant 1.000000e+00 : f32
      %516 = vector.broadcast %cst_62 : f32 to vector<1x1xf32>
      %517 = arith.divf %516, %515 : vector<1x1xf32>
      %518 = vector.broadcast %517 : vector<1x1xf32> to vector<1x16xf32>
      %519 = arith.mulf %514, %518 : vector<1x16xf32>
      %520 = vector.extract_strided_slice %508 {offsets = [0, 15], sizes = [16, 1], strides = [1, 1]} : vector<16x16xf32> to vector<16x1xf32>
      %c15_i32 = arith.constant 15 : i32
      %521 = vector.broadcast %c15_i32 : i32 to vector<16x1xi32>
      %522 = arith.cmpi eq, %28, %521 : vector<16x1xi32>
      %cst_63 = arith.constant 0.000000e+00 : f32
      %523 = vector.broadcast %cst_63 : f32 to vector<16x1xf32>
      %524 = arith.select %522, %523, %520 : vector<16x1xi1>, vector<16x1xf32>
      %525 = vector.broadcast %524 : vector<16x1xf32> to vector<16x16xf32>
      %526 = vector.broadcast %519 : vector<1x16xf32> to vector<16x16xf32>
      %527 = arith.mulf %525, %526 : vector<16x16xf32>
      %528 = arith.subf %513, %527 : vector<16x16xf32>
      %529 = vector.shape_cast %522 : vector<16x1xi1> to vector<16x1xi1>
      %530 = vector.broadcast %529 : vector<16x1xi1> to vector<16x16xi1>
      %531 = vector.shape_cast %519 : vector<1x16xf32> to vector<1x16xf32>
      %532 = vector.broadcast %531 : vector<1x16xf32> to vector<16x16xf32>
      %533 = arith.select %530, %532, %528 : vector<16x16xi1>, vector<16x16xf32>
      %534 = tpu.iota {dimensions = array<i32: 0>} : vector<16x1xi32>
      %535 = tpu.iota {dimensions = array<i32: 0>} : vector<16x16xi32>
      %536 = tpu.iota {dimensions = array<i32: 1>} : vector<16x16xi32>
      %537 = arith.cmpi eq, %535, %536 : vector<16x16xi32>
      %538 = arith.extui %537 : vector<16x16xi1> to vector<16x16xi32>
      %539 = arith.sitofp %538 : vector<16x16xi32> to vector<16x16xf32>
      %540 = vector.extract_strided_slice %25 {offsets = [0, 0], sizes = [1, 16], strides = [1, 1]} : vector<16x16xf32> to vector<1x16xf32>
      %541 = vector.extract_strided_slice %539 {offsets = [0, 0], sizes = [1, 16], strides = [1, 1]} : vector<16x16xf32> to vector<1x16xf32>
      %542 = vector.extract_strided_slice %25 {offsets = [0, 0], sizes = [1, 1], strides = [1, 1]} : vector<16x16xf32> to vector<1x1xf32>
      %cst_64 = arith.constant 1.000000e+00 : f32
      %543 = vector.broadcast %cst_64 : f32 to vector<1x1xf32>
      %544 = arith.divf %543, %542 : vector<1x1xf32>
      %545 = vector.broadcast %544 : vector<1x1xf32> to vector<1x16xf32>
      %546 = arith.mulf %540, %545 : vector<1x16xf32>
      %547 = vector.broadcast %544 : vector<1x1xf32> to vector<1x16xf32>
      %548 = arith.mulf %541, %547 : vector<1x16xf32>
      %549 = vector.extract_strided_slice %25 {offsets = [0, 0], sizes = [16, 1], strides = [1, 1]} : vector<16x16xf32> to vector<16x1xf32>
      %c0_i32_65 = arith.constant 0 : i32
      %550 = vector.broadcast %c0_i32_65 : i32 to vector<16x1xi32>
      %551 = arith.cmpi eq, %534, %550 : vector<16x1xi32>
      %cst_66 = arith.constant 0.000000e+00 : f32
      %552 = vector.broadcast %cst_66 : f32 to vector<16x1xf32>
      %553 = arith.select %551, %552, %549 : vector<16x1xi1>, vector<16x1xf32>
      %554 = vector.broadcast %553 : vector<16x1xf32> to vector<16x16xf32>
      %555 = vector.broadcast %546 : vector<1x16xf32> to vector<16x16xf32>
      %556 = arith.mulf %554, %555 : vector<16x16xf32>
      %557 = arith.subf %25, %556 : vector<16x16xf32>
      %558 = vector.broadcast %553 : vector<16x1xf32> to vector<16x16xf32>
      %559 = vector.broadcast %548 : vector<1x16xf32> to vector<16x16xf32>
      %560 = arith.mulf %558, %559 : vector<16x16xf32>
      %561 = arith.subf %539, %560 : vector<16x16xf32>
      %562 = vector.shape_cast %551 : vector<16x1xi1> to vector<16x1xi1>
      %563 = vector.broadcast %562 : vector<16x1xi1> to vector<16x16xi1>
      %564 = vector.shape_cast %546 : vector<1x16xf32> to vector<1x16xf32>
      %565 = vector.broadcast %564 : vector<1x16xf32> to vector<16x16xf32>
      %566 = arith.select %563, %565, %557 : vector<16x16xi1>, vector<16x16xf32>
      %567 = vector.shape_cast %551 : vector<16x1xi1> to vector<16x1xi1>
      %568 = vector.broadcast %567 : vector<16x1xi1> to vector<16x16xi1>
      %569 = vector.shape_cast %548 : vector<1x16xf32> to vector<1x16xf32>
      %570 = vector.broadcast %569 : vector<1x16xf32> to vector<16x16xf32>
      %571 = arith.select %568, %570, %561 : vector<16x16xi1>, vector<16x16xf32>
      %572 = vector.extract_strided_slice %566 {offsets = [1, 0], sizes = [1, 16], strides = [1, 1]} : vector<16x16xf32> to vector<1x16xf32>
      %573 = vector.extract_strided_slice %571 {offsets = [1, 0], sizes = [1, 16], strides = [1, 1]} : vector<16x16xf32> to vector<1x16xf32>
      %574 = vector.extract_strided_slice %566 {offsets = [1, 1], sizes = [1, 1], strides = [1, 1]} : vector<16x16xf32> to vector<1x1xf32>
      %cst_67 = arith.constant 1.000000e+00 : f32
      %575 = vector.broadcast %cst_67 : f32 to vector<1x1xf32>
      %576 = arith.divf %575, %574 : vector<1x1xf32>
      %577 = vector.broadcast %576 : vector<1x1xf32> to vector<1x16xf32>
      %578 = arith.mulf %572, %577 : vector<1x16xf32>
      %579 = vector.broadcast %576 : vector<1x1xf32> to vector<1x16xf32>
      %580 = arith.mulf %573, %579 : vector<1x16xf32>
      %581 = vector.extract_strided_slice %566 {offsets = [0, 1], sizes = [16, 1], strides = [1, 1]} : vector<16x16xf32> to vector<16x1xf32>
      %c1_i32_68 = arith.constant 1 : i32
      %582 = vector.broadcast %c1_i32_68 : i32 to vector<16x1xi32>
      %583 = arith.cmpi eq, %534, %582 : vector<16x1xi32>
      %cst_69 = arith.constant 0.000000e+00 : f32
      %584 = vector.broadcast %cst_69 : f32 to vector<16x1xf32>
      %585 = arith.select %583, %584, %581 : vector<16x1xi1>, vector<16x1xf32>
      %586 = vector.broadcast %585 : vector<16x1xf32> to vector<16x16xf32>
      %587 = vector.broadcast %578 : vector<1x16xf32> to vector<16x16xf32>
      %588 = arith.mulf %586, %587 : vector<16x16xf32>
      %589 = arith.subf %566, %588 : vector<16x16xf32>
      %590 = vector.broadcast %585 : vector<16x1xf32> to vector<16x16xf32>
      %591 = vector.broadcast %580 : vector<1x16xf32> to vector<16x16xf32>
      %592 = arith.mulf %590, %591 : vector<16x16xf32>
      %593 = arith.subf %571, %592 : vector<16x16xf32>
      %594 = vector.shape_cast %583 : vector<16x1xi1> to vector<16x1xi1>
      %595 = vector.broadcast %594 : vector<16x1xi1> to vector<16x16xi1>
      %596 = vector.shape_cast %578 : vector<1x16xf32> to vector<1x16xf32>
      %597 = vector.broadcast %596 : vector<1x16xf32> to vector<16x16xf32>
      %598 = arith.select %595, %597, %589 : vector<16x16xi1>, vector<16x16xf32>
      %599 = vector.shape_cast %583 : vector<16x1xi1> to vector<16x1xi1>
      %600 = vector.broadcast %599 : vector<16x1xi1> to vector<16x16xi1>
      %601 = vector.shape_cast %580 : vector<1x16xf32> to vector<1x16xf32>
      %602 = vector.broadcast %601 : vector<1x16xf32> to vector<16x16xf32>
      %603 = arith.select %600, %602, %593 : vector<16x16xi1>, vector<16x16xf32>
      %604 = vector.extract_strided_slice %598 {offsets = [2, 0], sizes = [1, 16], strides = [1, 1]} : vector<16x16xf32> to vector<1x16xf32>
      %605 = vector.extract_strided_slice %603 {offsets = [2, 0], sizes = [1, 16], strides = [1, 1]} : vector<16x16xf32> to vector<1x16xf32>
      %606 = vector.extract_strided_slice %598 {offsets = [2, 2], sizes = [1, 1], strides = [1, 1]} : vector<16x16xf32> to vector<1x1xf32>
      %cst_70 = arith.constant 1.000000e+00 : f32
      %607 = vector.broadcast %cst_70 : f32 to vector<1x1xf32>
      %608 = arith.divf %607, %606 : vector<1x1xf32>
      %609 = vector.broadcast %608 : vector<1x1xf32> to vector<1x16xf32>
      %610 = arith.mulf %604, %609 : vector<1x16xf32>
      %611 = vector.broadcast %608 : vector<1x1xf32> to vector<1x16xf32>
      %612 = arith.mulf %605, %611 : vector<1x16xf32>
      %613 = vector.extract_strided_slice %598 {offsets = [0, 2], sizes = [16, 1], strides = [1, 1]} : vector<16x16xf32> to vector<16x1xf32>
      %c2_i32_71 = arith.constant 2 : i32
      %614 = vector.broadcast %c2_i32_71 : i32 to vector<16x1xi32>
      %615 = arith.cmpi eq, %534, %614 : vector<16x1xi32>
      %cst_72 = arith.constant 0.000000e+00 : f32
      %616 = vector.broadcast %cst_72 : f32 to vector<16x1xf32>
      %617 = arith.select %615, %616, %613 : vector<16x1xi1>, vector<16x1xf32>
      %618 = vector.broadcast %617 : vector<16x1xf32> to vector<16x16xf32>
      %619 = vector.broadcast %610 : vector<1x16xf32> to vector<16x16xf32>
      %620 = arith.mulf %618, %619 : vector<16x16xf32>
      %621 = arith.subf %598, %620 : vector<16x16xf32>
      %622 = vector.broadcast %617 : vector<16x1xf32> to vector<16x16xf32>
      %623 = vector.broadcast %612 : vector<1x16xf32> to vector<16x16xf32>
      %624 = arith.mulf %622, %623 : vector<16x16xf32>
      %625 = arith.subf %603, %624 : vector<16x16xf32>
      %626 = vector.shape_cast %615 : vector<16x1xi1> to vector<16x1xi1>
      %627 = vector.broadcast %626 : vector<16x1xi1> to vector<16x16xi1>
      %628 = vector.shape_cast %610 : vector<1x16xf32> to vector<1x16xf32>
      %629 = vector.broadcast %628 : vector<1x16xf32> to vector<16x16xf32>
      %630 = arith.select %627, %629, %621 : vector<16x16xi1>, vector<16x16xf32>
      %631 = vector.shape_cast %615 : vector<16x1xi1> to vector<16x1xi1>
      %632 = vector.broadcast %631 : vector<16x1xi1> to vector<16x16xi1>
      %633 = vector.shape_cast %612 : vector<1x16xf32> to vector<1x16xf32>
      %634 = vector.broadcast %633 : vector<1x16xf32> to vector<16x16xf32>
      %635 = arith.select %632, %634, %625 : vector<16x16xi1>, vector<16x16xf32>
      %636 = vector.extract_strided_slice %630 {offsets = [3, 0], sizes = [1, 16], strides = [1, 1]} : vector<16x16xf32> to vector<1x16xf32>
      %637 = vector.extract_strided_slice %635 {offsets = [3, 0], sizes = [1, 16], strides = [1, 1]} : vector<16x16xf32> to vector<1x16xf32>
      %638 = vector.extract_strided_slice %630 {offsets = [3, 3], sizes = [1, 1], strides = [1, 1]} : vector<16x16xf32> to vector<1x1xf32>
      %cst_73 = arith.constant 1.000000e+00 : f32
      %639 = vector.broadcast %cst_73 : f32 to vector<1x1xf32>
      %640 = arith.divf %639, %638 : vector<1x1xf32>
      %641 = vector.broadcast %640 : vector<1x1xf32> to vector<1x16xf32>
      %642 = arith.mulf %636, %641 : vector<1x16xf32>
      %643 = vector.broadcast %640 : vector<1x1xf32> to vector<1x16xf32>
      %644 = arith.mulf %637, %643 : vector<1x16xf32>
      %645 = vector.extract_strided_slice %630 {offsets = [0, 3], sizes = [16, 1], strides = [1, 1]} : vector<16x16xf32> to vector<16x1xf32>
      %c3_i32_74 = arith.constant 3 : i32
      %646 = vector.broadcast %c3_i32_74 : i32 to vector<16x1xi32>
      %647 = arith.cmpi eq, %534, %646 : vector<16x1xi32>
      %cst_75 = arith.constant 0.000000e+00 : f32
      %648 = vector.broadcast %cst_75 : f32 to vector<16x1xf32>
      %649 = arith.select %647, %648, %645 : vector<16x1xi1>, vector<16x1xf32>
      %650 = vector.broadcast %649 : vector<16x1xf32> to vector<16x16xf32>
      %651 = vector.broadcast %642 : vector<1x16xf32> to vector<16x16xf32>
      %652 = arith.mulf %650, %651 : vector<16x16xf32>
      %653 = arith.subf %630, %652 : vector<16x16xf32>
      %654 = vector.broadcast %649 : vector<16x1xf32> to vector<16x16xf32>
      %655 = vector.broadcast %644 : vector<1x16xf32> to vector<16x16xf32>
      %656 = arith.mulf %654, %655 : vector<16x16xf32>
      %657 = arith.subf %635, %656 : vector<16x16xf32>
      %658 = vector.shape_cast %647 : vector<16x1xi1> to vector<16x1xi1>
      %659 = vector.broadcast %658 : vector<16x1xi1> to vector<16x16xi1>
      %660 = vector.shape_cast %642 : vector<1x16xf32> to vector<1x16xf32>
      %661 = vector.broadcast %660 : vector<1x16xf32> to vector<16x16xf32>
      %662 = arith.select %659, %661, %653 : vector<16x16xi1>, vector<16x16xf32>
      %663 = vector.shape_cast %647 : vector<16x1xi1> to vector<16x1xi1>
      %664 = vector.broadcast %663 : vector<16x1xi1> to vector<16x16xi1>
      %665 = vector.shape_cast %644 : vector<1x16xf32> to vector<1x16xf32>
      %666 = vector.broadcast %665 : vector<1x16xf32> to vector<16x16xf32>
      %667 = arith.select %664, %666, %657 : vector<16x16xi1>, vector<16x16xf32>
      %668 = vector.extract_strided_slice %662 {offsets = [4, 0], sizes = [1, 16], strides = [1, 1]} : vector<16x16xf32> to vector<1x16xf32>
      %669 = vector.extract_strided_slice %667 {offsets = [4, 0], sizes = [1, 16], strides = [1, 1]} : vector<16x16xf32> to vector<1x16xf32>
      %670 = vector.extract_strided_slice %662 {offsets = [4, 4], sizes = [1, 1], strides = [1, 1]} : vector<16x16xf32> to vector<1x1xf32>
      %cst_76 = arith.constant 1.000000e+00 : f32
      %671 = vector.broadcast %cst_76 : f32 to vector<1x1xf32>
      %672 = arith.divf %671, %670 : vector<1x1xf32>
      %673 = vector.broadcast %672 : vector<1x1xf32> to vector<1x16xf32>
      %674 = arith.mulf %668, %673 : vector<1x16xf32>
      %675 = vector.broadcast %672 : vector<1x1xf32> to vector<1x16xf32>
      %676 = arith.mulf %669, %675 : vector<1x16xf32>
      %677 = vector.extract_strided_slice %662 {offsets = [0, 4], sizes = [16, 1], strides = [1, 1]} : vector<16x16xf32> to vector<16x1xf32>
      %c4_i32_77 = arith.constant 4 : i32
      %678 = vector.broadcast %c4_i32_77 : i32 to vector<16x1xi32>
      %679 = arith.cmpi eq, %534, %678 : vector<16x1xi32>
      %cst_78 = arith.constant 0.000000e+00 : f32
      %680 = vector.broadcast %cst_78 : f32 to vector<16x1xf32>
      %681 = arith.select %679, %680, %677 : vector<16x1xi1>, vector<16x1xf32>
      %682 = vector.broadcast %681 : vector<16x1xf32> to vector<16x16xf32>
      %683 = vector.broadcast %674 : vector<1x16xf32> to vector<16x16xf32>
      %684 = arith.mulf %682, %683 : vector<16x16xf32>
      %685 = arith.subf %662, %684 : vector<16x16xf32>
      %686 = vector.broadcast %681 : vector<16x1xf32> to vector<16x16xf32>
      %687 = vector.broadcast %676 : vector<1x16xf32> to vector<16x16xf32>
      %688 = arith.mulf %686, %687 : vector<16x16xf32>
      %689 = arith.subf %667, %688 : vector<16x16xf32>
      %690 = vector.shape_cast %679 : vector<16x1xi1> to vector<16x1xi1>
      %691 = vector.broadcast %690 : vector<16x1xi1> to vector<16x16xi1>
      %692 = vector.shape_cast %674 : vector<1x16xf32> to vector<1x16xf32>
      %693 = vector.broadcast %692 : vector<1x16xf32> to vector<16x16xf32>
      %694 = arith.select %691, %693, %685 : vector<16x16xi1>, vector<16x16xf32>
      %695 = vector.shape_cast %679 : vector<16x1xi1> to vector<16x1xi1>
      %696 = vector.broadcast %695 : vector<16x1xi1> to vector<16x16xi1>
      %697 = vector.shape_cast %676 : vector<1x16xf32> to vector<1x16xf32>
      %698 = vector.broadcast %697 : vector<1x16xf32> to vector<16x16xf32>
      %699 = arith.select %696, %698, %689 : vector<16x16xi1>, vector<16x16xf32>
      %700 = vector.extract_strided_slice %694 {offsets = [5, 0], sizes = [1, 16], strides = [1, 1]} : vector<16x16xf32> to vector<1x16xf32>
      %701 = vector.extract_strided_slice %699 {offsets = [5, 0], sizes = [1, 16], strides = [1, 1]} : vector<16x16xf32> to vector<1x16xf32>
      %702 = vector.extract_strided_slice %694 {offsets = [5, 5], sizes = [1, 1], strides = [1, 1]} : vector<16x16xf32> to vector<1x1xf32>
      %cst_79 = arith.constant 1.000000e+00 : f32
      %703 = vector.broadcast %cst_79 : f32 to vector<1x1xf32>
      %704 = arith.divf %703, %702 : vector<1x1xf32>
      %705 = vector.broadcast %704 : vector<1x1xf32> to vector<1x16xf32>
      %706 = arith.mulf %700, %705 : vector<1x16xf32>
      %707 = vector.broadcast %704 : vector<1x1xf32> to vector<1x16xf32>
      %708 = arith.mulf %701, %707 : vector<1x16xf32>
      %709 = vector.extract_strided_slice %694 {offsets = [0, 5], sizes = [16, 1], strides = [1, 1]} : vector<16x16xf32> to vector<16x1xf32>
      %c5_i32_80 = arith.constant 5 : i32
      %710 = vector.broadcast %c5_i32_80 : i32 to vector<16x1xi32>
      %711 = arith.cmpi eq, %534, %710 : vector<16x1xi32>
      %cst_81 = arith.constant 0.000000e+00 : f32
      %712 = vector.broadcast %cst_81 : f32 to vector<16x1xf32>
      %713 = arith.select %711, %712, %709 : vector<16x1xi1>, vector<16x1xf32>
      %714 = vector.broadcast %713 : vector<16x1xf32> to vector<16x16xf32>
      %715 = vector.broadcast %706 : vector<1x16xf32> to vector<16x16xf32>
      %716 = arith.mulf %714, %715 : vector<16x16xf32>
      %717 = arith.subf %694, %716 : vector<16x16xf32>
      %718 = vector.broadcast %713 : vector<16x1xf32> to vector<16x16xf32>
      %719 = vector.broadcast %708 : vector<1x16xf32> to vector<16x16xf32>
      %720 = arith.mulf %718, %719 : vector<16x16xf32>
      %721 = arith.subf %699, %720 : vector<16x16xf32>
      %722 = vector.shape_cast %711 : vector<16x1xi1> to vector<16x1xi1>
      %723 = vector.broadcast %722 : vector<16x1xi1> to vector<16x16xi1>
      %724 = vector.shape_cast %706 : vector<1x16xf32> to vector<1x16xf32>
      %725 = vector.broadcast %724 : vector<1x16xf32> to vector<16x16xf32>
      %726 = arith.select %723, %725, %717 : vector<16x16xi1>, vector<16x16xf32>
      %727 = vector.shape_cast %711 : vector<16x1xi1> to vector<16x1xi1>
      %728 = vector.broadcast %727 : vector<16x1xi1> to vector<16x16xi1>
      %729 = vector.shape_cast %708 : vector<1x16xf32> to vector<1x16xf32>
      %730 = vector.broadcast %729 : vector<1x16xf32> to vector<16x16xf32>
      %731 = arith.select %728, %730, %721 : vector<16x16xi1>, vector<16x16xf32>
      %732 = vector.extract_strided_slice %726 {offsets = [6, 0], sizes = [1, 16], strides = [1, 1]} : vector<16x16xf32> to vector<1x16xf32>
      %733 = vector.extract_strided_slice %731 {offsets = [6, 0], sizes = [1, 16], strides = [1, 1]} : vector<16x16xf32> to vector<1x16xf32>
      %734 = vector.extract_strided_slice %726 {offsets = [6, 6], sizes = [1, 1], strides = [1, 1]} : vector<16x16xf32> to vector<1x1xf32>
      %cst_82 = arith.constant 1.000000e+00 : f32
      %735 = vector.broadcast %cst_82 : f32 to vector<1x1xf32>
      %736 = arith.divf %735, %734 : vector<1x1xf32>
      %737 = vector.broadcast %736 : vector<1x1xf32> to vector<1x16xf32>
      %738 = arith.mulf %732, %737 : vector<1x16xf32>
      %739 = vector.broadcast %736 : vector<1x1xf32> to vector<1x16xf32>
      %740 = arith.mulf %733, %739 : vector<1x16xf32>
      %741 = vector.extract_strided_slice %726 {offsets = [0, 6], sizes = [16, 1], strides = [1, 1]} : vector<16x16xf32> to vector<16x1xf32>
      %c6_i32_83 = arith.constant 6 : i32
      %742 = vector.broadcast %c6_i32_83 : i32 to vector<16x1xi32>
      %743 = arith.cmpi eq, %534, %742 : vector<16x1xi32>
      %cst_84 = arith.constant 0.000000e+00 : f32
      %744 = vector.broadcast %cst_84 : f32 to vector<16x1xf32>
      %745 = arith.select %743, %744, %741 : vector<16x1xi1>, vector<16x1xf32>
      %746 = vector.broadcast %745 : vector<16x1xf32> to vector<16x16xf32>
      %747 = vector.broadcast %738 : vector<1x16xf32> to vector<16x16xf32>
      %748 = arith.mulf %746, %747 : vector<16x16xf32>
      %749 = arith.subf %726, %748 : vector<16x16xf32>
      %750 = vector.broadcast %745 : vector<16x1xf32> to vector<16x16xf32>
      %751 = vector.broadcast %740 : vector<1x16xf32> to vector<16x16xf32>
      %752 = arith.mulf %750, %751 : vector<16x16xf32>
      %753 = arith.subf %731, %752 : vector<16x16xf32>
      %754 = vector.shape_cast %743 : vector<16x1xi1> to vector<16x1xi1>
      %755 = vector.broadcast %754 : vector<16x1xi1> to vector<16x16xi1>
      %756 = vector.shape_cast %738 : vector<1x16xf32> to vector<1x16xf32>
      %757 = vector.broadcast %756 : vector<1x16xf32> to vector<16x16xf32>
      %758 = arith.select %755, %757, %749 : vector<16x16xi1>, vector<16x16xf32>
      %759 = vector.shape_cast %743 : vector<16x1xi1> to vector<16x1xi1>
      %760 = vector.broadcast %759 : vector<16x1xi1> to vector<16x16xi1>
      %761 = vector.shape_cast %740 : vector<1x16xf32> to vector<1x16xf32>
      %762 = vector.broadcast %761 : vector<1x16xf32> to vector<16x16xf32>
      %763 = arith.select %760, %762, %753 : vector<16x16xi1>, vector<16x16xf32>
      %764 = vector.extract_strided_slice %758 {offsets = [7, 0], sizes = [1, 16], strides = [1, 1]} : vector<16x16xf32> to vector<1x16xf32>
      %765 = vector.extract_strided_slice %763 {offsets = [7, 0], sizes = [1, 16], strides = [1, 1]} : vector<16x16xf32> to vector<1x16xf32>
      %766 = vector.extract_strided_slice %758 {offsets = [7, 7], sizes = [1, 1], strides = [1, 1]} : vector<16x16xf32> to vector<1x1xf32>
      %cst_85 = arith.constant 1.000000e+00 : f32
      %767 = vector.broadcast %cst_85 : f32 to vector<1x1xf32>
      %768 = arith.divf %767, %766 : vector<1x1xf32>
      %769 = vector.broadcast %768 : vector<1x1xf32> to vector<1x16xf32>
      %770 = arith.mulf %764, %769 : vector<1x16xf32>
      %771 = vector.broadcast %768 : vector<1x1xf32> to vector<1x16xf32>
      %772 = arith.mulf %765, %771 : vector<1x16xf32>
      %773 = vector.extract_strided_slice %758 {offsets = [0, 7], sizes = [16, 1], strides = [1, 1]} : vector<16x16xf32> to vector<16x1xf32>
      %c7_i32_86 = arith.constant 7 : i32
      %774 = vector.broadcast %c7_i32_86 : i32 to vector<16x1xi32>
      %775 = arith.cmpi eq, %534, %774 : vector<16x1xi32>
      %cst_87 = arith.constant 0.000000e+00 : f32
      %776 = vector.broadcast %cst_87 : f32 to vector<16x1xf32>
      %777 = arith.select %775, %776, %773 : vector<16x1xi1>, vector<16x1xf32>
      %778 = vector.broadcast %777 : vector<16x1xf32> to vector<16x16xf32>
      %779 = vector.broadcast %770 : vector<1x16xf32> to vector<16x16xf32>
      %780 = arith.mulf %778, %779 : vector<16x16xf32>
      %781 = arith.subf %758, %780 : vector<16x16xf32>
      %782 = vector.broadcast %777 : vector<16x1xf32> to vector<16x16xf32>
      %783 = vector.broadcast %772 : vector<1x16xf32> to vector<16x16xf32>
      %784 = arith.mulf %782, %783 : vector<16x16xf32>
      %785 = arith.subf %763, %784 : vector<16x16xf32>
      %786 = vector.shape_cast %775 : vector<16x1xi1> to vector<16x1xi1>
      %787 = vector.broadcast %786 : vector<16x1xi1> to vector<16x16xi1>
      %788 = vector.shape_cast %770 : vector<1x16xf32> to vector<1x16xf32>
      %789 = vector.broadcast %788 : vector<1x16xf32> to vector<16x16xf32>
      %790 = arith.select %787, %789, %781 : vector<16x16xi1>, vector<16x16xf32>
      %791 = vector.shape_cast %775 : vector<16x1xi1> to vector<16x1xi1>
      %792 = vector.broadcast %791 : vector<16x1xi1> to vector<16x16xi1>
      %793 = vector.shape_cast %772 : vector<1x16xf32> to vector<1x16xf32>
      %794 = vector.broadcast %793 : vector<1x16xf32> to vector<16x16xf32>
      %795 = arith.select %792, %794, %785 : vector<16x16xi1>, vector<16x16xf32>
      %796 = vector.extract_strided_slice %790 {offsets = [8, 0], sizes = [1, 16], strides = [1, 1]} : vector<16x16xf32> to vector<1x16xf32>
      %797 = vector.extract_strided_slice %795 {offsets = [8, 0], sizes = [1, 16], strides = [1, 1]} : vector<16x16xf32> to vector<1x16xf32>
      %798 = vector.extract_strided_slice %790 {offsets = [8, 8], sizes = [1, 1], strides = [1, 1]} : vector<16x16xf32> to vector<1x1xf32>
      %cst_88 = arith.constant 1.000000e+00 : f32
      %799 = vector.broadcast %cst_88 : f32 to vector<1x1xf32>
      %800 = arith.divf %799, %798 : vector<1x1xf32>
      %801 = vector.broadcast %800 : vector<1x1xf32> to vector<1x16xf32>
      %802 = arith.mulf %796, %801 : vector<1x16xf32>
      %803 = vector.broadcast %800 : vector<1x1xf32> to vector<1x16xf32>
      %804 = arith.mulf %797, %803 : vector<1x16xf32>
      %805 = vector.extract_strided_slice %790 {offsets = [0, 8], sizes = [16, 1], strides = [1, 1]} : vector<16x16xf32> to vector<16x1xf32>
      %c8_i32_89 = arith.constant 8 : i32
      %806 = vector.broadcast %c8_i32_89 : i32 to vector<16x1xi32>
      %807 = arith.cmpi eq, %534, %806 : vector<16x1xi32>
      %cst_90 = arith.constant 0.000000e+00 : f32
      %808 = vector.broadcast %cst_90 : f32 to vector<16x1xf32>
      %809 = arith.select %807, %808, %805 : vector<16x1xi1>, vector<16x1xf32>
      %810 = vector.broadcast %809 : vector<16x1xf32> to vector<16x16xf32>
      %811 = vector.broadcast %802 : vector<1x16xf32> to vector<16x16xf32>
      %812 = arith.mulf %810, %811 : vector<16x16xf32>
      %813 = arith.subf %790, %812 : vector<16x16xf32>
      %814 = vector.broadcast %809 : vector<16x1xf32> to vector<16x16xf32>
      %815 = vector.broadcast %804 : vector<1x16xf32> to vector<16x16xf32>
      %816 = arith.mulf %814, %815 : vector<16x16xf32>
      %817 = arith.subf %795, %816 : vector<16x16xf32>
      %818 = vector.shape_cast %807 : vector<16x1xi1> to vector<16x1xi1>
      %819 = vector.broadcast %818 : vector<16x1xi1> to vector<16x16xi1>
      %820 = vector.shape_cast %802 : vector<1x16xf32> to vector<1x16xf32>
      %821 = vector.broadcast %820 : vector<1x16xf32> to vector<16x16xf32>
      %822 = arith.select %819, %821, %813 : vector<16x16xi1>, vector<16x16xf32>
      %823 = vector.shape_cast %807 : vector<16x1xi1> to vector<16x1xi1>
      %824 = vector.broadcast %823 : vector<16x1xi1> to vector<16x16xi1>
      %825 = vector.shape_cast %804 : vector<1x16xf32> to vector<1x16xf32>
      %826 = vector.broadcast %825 : vector<1x16xf32> to vector<16x16xf32>
      %827 = arith.select %824, %826, %817 : vector<16x16xi1>, vector<16x16xf32>
      %828 = vector.extract_strided_slice %822 {offsets = [9, 0], sizes = [1, 16], strides = [1, 1]} : vector<16x16xf32> to vector<1x16xf32>
      %829 = vector.extract_strided_slice %827 {offsets = [9, 0], sizes = [1, 16], strides = [1, 1]} : vector<16x16xf32> to vector<1x16xf32>
      %830 = vector.extract_strided_slice %822 {offsets = [9, 9], sizes = [1, 1], strides = [1, 1]} : vector<16x16xf32> to vector<1x1xf32>
      %cst_91 = arith.constant 1.000000e+00 : f32
      %831 = vector.broadcast %cst_91 : f32 to vector<1x1xf32>
      %832 = arith.divf %831, %830 : vector<1x1xf32>
      %833 = vector.broadcast %832 : vector<1x1xf32> to vector<1x16xf32>
      %834 = arith.mulf %828, %833 : vector<1x16xf32>
      %835 = vector.broadcast %832 : vector<1x1xf32> to vector<1x16xf32>
      %836 = arith.mulf %829, %835 : vector<1x16xf32>
      %837 = vector.extract_strided_slice %822 {offsets = [0, 9], sizes = [16, 1], strides = [1, 1]} : vector<16x16xf32> to vector<16x1xf32>
      %c9_i32_92 = arith.constant 9 : i32
      %838 = vector.broadcast %c9_i32_92 : i32 to vector<16x1xi32>
      %839 = arith.cmpi eq, %534, %838 : vector<16x1xi32>
      %cst_93 = arith.constant 0.000000e+00 : f32
      %840 = vector.broadcast %cst_93 : f32 to vector<16x1xf32>
      %841 = arith.select %839, %840, %837 : vector<16x1xi1>, vector<16x1xf32>
      %842 = vector.broadcast %841 : vector<16x1xf32> to vector<16x16xf32>
      %843 = vector.broadcast %834 : vector<1x16xf32> to vector<16x16xf32>
      %844 = arith.mulf %842, %843 : vector<16x16xf32>
      %845 = arith.subf %822, %844 : vector<16x16xf32>
      %846 = vector.broadcast %841 : vector<16x1xf32> to vector<16x16xf32>
      %847 = vector.broadcast %836 : vector<1x16xf32> to vector<16x16xf32>
      %848 = arith.mulf %846, %847 : vector<16x16xf32>
      %849 = arith.subf %827, %848 : vector<16x16xf32>
      %850 = vector.shape_cast %839 : vector<16x1xi1> to vector<16x1xi1>
      %851 = vector.broadcast %850 : vector<16x1xi1> to vector<16x16xi1>
      %852 = vector.shape_cast %834 : vector<1x16xf32> to vector<1x16xf32>
      %853 = vector.broadcast %852 : vector<1x16xf32> to vector<16x16xf32>
      %854 = arith.select %851, %853, %845 : vector<16x16xi1>, vector<16x16xf32>
      %855 = vector.shape_cast %839 : vector<16x1xi1> to vector<16x1xi1>
      %856 = vector.broadcast %855 : vector<16x1xi1> to vector<16x16xi1>
      %857 = vector.shape_cast %836 : vector<1x16xf32> to vector<1x16xf32>
      %858 = vector.broadcast %857 : vector<1x16xf32> to vector<16x16xf32>
      %859 = arith.select %856, %858, %849 : vector<16x16xi1>, vector<16x16xf32>
      %860 = vector.extract_strided_slice %854 {offsets = [10, 0], sizes = [1, 16], strides = [1, 1]} : vector<16x16xf32> to vector<1x16xf32>
      %861 = vector.extract_strided_slice %859 {offsets = [10, 0], sizes = [1, 16], strides = [1, 1]} : vector<16x16xf32> to vector<1x16xf32>
      %862 = vector.extract_strided_slice %854 {offsets = [10, 10], sizes = [1, 1], strides = [1, 1]} : vector<16x16xf32> to vector<1x1xf32>
      %cst_94 = arith.constant 1.000000e+00 : f32
      %863 = vector.broadcast %cst_94 : f32 to vector<1x1xf32>
      %864 = arith.divf %863, %862 : vector<1x1xf32>
      %865 = vector.broadcast %864 : vector<1x1xf32> to vector<1x16xf32>
      %866 = arith.mulf %860, %865 : vector<1x16xf32>
      %867 = vector.broadcast %864 : vector<1x1xf32> to vector<1x16xf32>
      %868 = arith.mulf %861, %867 : vector<1x16xf32>
      %869 = vector.extract_strided_slice %854 {offsets = [0, 10], sizes = [16, 1], strides = [1, 1]} : vector<16x16xf32> to vector<16x1xf32>
      %c10_i32_95 = arith.constant 10 : i32
      %870 = vector.broadcast %c10_i32_95 : i32 to vector<16x1xi32>
      %871 = arith.cmpi eq, %534, %870 : vector<16x1xi32>
      %cst_96 = arith.constant 0.000000e+00 : f32
      %872 = vector.broadcast %cst_96 : f32 to vector<16x1xf32>
      %873 = arith.select %871, %872, %869 : vector<16x1xi1>, vector<16x1xf32>
      %874 = vector.broadcast %873 : vector<16x1xf32> to vector<16x16xf32>
      %875 = vector.broadcast %866 : vector<1x16xf32> to vector<16x16xf32>
      %876 = arith.mulf %874, %875 : vector<16x16xf32>
      %877 = arith.subf %854, %876 : vector<16x16xf32>
      %878 = vector.broadcast %873 : vector<16x1xf32> to vector<16x16xf32>
      %879 = vector.broadcast %868 : vector<1x16xf32> to vector<16x16xf32>
      %880 = arith.mulf %878, %879 : vector<16x16xf32>
      %881 = arith.subf %859, %880 : vector<16x16xf32>
      %882 = vector.shape_cast %871 : vector<16x1xi1> to vector<16x1xi1>
      %883 = vector.broadcast %882 : vector<16x1xi1> to vector<16x16xi1>
      %884 = vector.shape_cast %866 : vector<1x16xf32> to vector<1x16xf32>
      %885 = vector.broadcast %884 : vector<1x16xf32> to vector<16x16xf32>
      %886 = arith.select %883, %885, %877 : vector<16x16xi1>, vector<16x16xf32>
      %887 = vector.shape_cast %871 : vector<16x1xi1> to vector<16x1xi1>
      %888 = vector.broadcast %887 : vector<16x1xi1> to vector<16x16xi1>
      %889 = vector.shape_cast %868 : vector<1x16xf32> to vector<1x16xf32>
      %890 = vector.broadcast %889 : vector<1x16xf32> to vector<16x16xf32>
      %891 = arith.select %888, %890, %881 : vector<16x16xi1>, vector<16x16xf32>
      %892 = vector.extract_strided_slice %886 {offsets = [11, 0], sizes = [1, 16], strides = [1, 1]} : vector<16x16xf32> to vector<1x16xf32>
      %893 = vector.extract_strided_slice %891 {offsets = [11, 0], sizes = [1, 16], strides = [1, 1]} : vector<16x16xf32> to vector<1x16xf32>
      %894 = vector.extract_strided_slice %886 {offsets = [11, 11], sizes = [1, 1], strides = [1, 1]} : vector<16x16xf32> to vector<1x1xf32>
      %cst_97 = arith.constant 1.000000e+00 : f32
      %895 = vector.broadcast %cst_97 : f32 to vector<1x1xf32>
      %896 = arith.divf %895, %894 : vector<1x1xf32>
      %897 = vector.broadcast %896 : vector<1x1xf32> to vector<1x16xf32>
      %898 = arith.mulf %892, %897 : vector<1x16xf32>
      %899 = vector.broadcast %896 : vector<1x1xf32> to vector<1x16xf32>
      %900 = arith.mulf %893, %899 : vector<1x16xf32>
      %901 = vector.extract_strided_slice %886 {offsets = [0, 11], sizes = [16, 1], strides = [1, 1]} : vector<16x16xf32> to vector<16x1xf32>
      %c11_i32_98 = arith.constant 11 : i32
      %902 = vector.broadcast %c11_i32_98 : i32 to vector<16x1xi32>
      %903 = arith.cmpi eq, %534, %902 : vector<16x1xi32>
      %cst_99 = arith.constant 0.000000e+00 : f32
      %904 = vector.broadcast %cst_99 : f32 to vector<16x1xf32>
      %905 = arith.select %903, %904, %901 : vector<16x1xi1>, vector<16x1xf32>
      %906 = vector.broadcast %905 : vector<16x1xf32> to vector<16x16xf32>
      %907 = vector.broadcast %898 : vector<1x16xf32> to vector<16x16xf32>
      %908 = arith.mulf %906, %907 : vector<16x16xf32>
      %909 = arith.subf %886, %908 : vector<16x16xf32>
      %910 = vector.broadcast %905 : vector<16x1xf32> to vector<16x16xf32>
      %911 = vector.broadcast %900 : vector<1x16xf32> to vector<16x16xf32>
      %912 = arith.mulf %910, %911 : vector<16x16xf32>
      %913 = arith.subf %891, %912 : vector<16x16xf32>
      %914 = vector.shape_cast %903 : vector<16x1xi1> to vector<16x1xi1>
      %915 = vector.broadcast %914 : vector<16x1xi1> to vector<16x16xi1>
      %916 = vector.shape_cast %898 : vector<1x16xf32> to vector<1x16xf32>
      %917 = vector.broadcast %916 : vector<1x16xf32> to vector<16x16xf32>
      %918 = arith.select %915, %917, %909 : vector<16x16xi1>, vector<16x16xf32>
      %919 = vector.shape_cast %903 : vector<16x1xi1> to vector<16x1xi1>
      %920 = vector.broadcast %919 : vector<16x1xi1> to vector<16x16xi1>
      %921 = vector.shape_cast %900 : vector<1x16xf32> to vector<1x16xf32>
      %922 = vector.broadcast %921 : vector<1x16xf32> to vector<16x16xf32>
      %923 = arith.select %920, %922, %913 : vector<16x16xi1>, vector<16x16xf32>
      %924 = vector.extract_strided_slice %918 {offsets = [12, 0], sizes = [1, 16], strides = [1, 1]} : vector<16x16xf32> to vector<1x16xf32>
      %925 = vector.extract_strided_slice %923 {offsets = [12, 0], sizes = [1, 16], strides = [1, 1]} : vector<16x16xf32> to vector<1x16xf32>
      %926 = vector.extract_strided_slice %918 {offsets = [12, 12], sizes = [1, 1], strides = [1, 1]} : vector<16x16xf32> to vector<1x1xf32>
      %cst_100 = arith.constant 1.000000e+00 : f32
      %927 = vector.broadcast %cst_100 : f32 to vector<1x1xf32>
      %928 = arith.divf %927, %926 : vector<1x1xf32>
      %929 = vector.broadcast %928 : vector<1x1xf32> to vector<1x16xf32>
      %930 = arith.mulf %924, %929 : vector<1x16xf32>
      %931 = vector.broadcast %928 : vector<1x1xf32> to vector<1x16xf32>
      %932 = arith.mulf %925, %931 : vector<1x16xf32>
      %933 = vector.extract_strided_slice %918 {offsets = [0, 12], sizes = [16, 1], strides = [1, 1]} : vector<16x16xf32> to vector<16x1xf32>
      %c12_i32_101 = arith.constant 12 : i32
      %934 = vector.broadcast %c12_i32_101 : i32 to vector<16x1xi32>
      %935 = arith.cmpi eq, %534, %934 : vector<16x1xi32>
      %cst_102 = arith.constant 0.000000e+00 : f32
      %936 = vector.broadcast %cst_102 : f32 to vector<16x1xf32>
      %937 = arith.select %935, %936, %933 : vector<16x1xi1>, vector<16x1xf32>
      %938 = vector.broadcast %937 : vector<16x1xf32> to vector<16x16xf32>
      %939 = vector.broadcast %930 : vector<1x16xf32> to vector<16x16xf32>
      %940 = arith.mulf %938, %939 : vector<16x16xf32>
      %941 = arith.subf %918, %940 : vector<16x16xf32>
      %942 = vector.broadcast %937 : vector<16x1xf32> to vector<16x16xf32>
      %943 = vector.broadcast %932 : vector<1x16xf32> to vector<16x16xf32>
      %944 = arith.mulf %942, %943 : vector<16x16xf32>
      %945 = arith.subf %923, %944 : vector<16x16xf32>
      %946 = vector.shape_cast %935 : vector<16x1xi1> to vector<16x1xi1>
      %947 = vector.broadcast %946 : vector<16x1xi1> to vector<16x16xi1>
      %948 = vector.shape_cast %930 : vector<1x16xf32> to vector<1x16xf32>
      %949 = vector.broadcast %948 : vector<1x16xf32> to vector<16x16xf32>
      %950 = arith.select %947, %949, %941 : vector<16x16xi1>, vector<16x16xf32>
      %951 = vector.shape_cast %935 : vector<16x1xi1> to vector<16x1xi1>
      %952 = vector.broadcast %951 : vector<16x1xi1> to vector<16x16xi1>
      %953 = vector.shape_cast %932 : vector<1x16xf32> to vector<1x16xf32>
      %954 = vector.broadcast %953 : vector<1x16xf32> to vector<16x16xf32>
      %955 = arith.select %952, %954, %945 : vector<16x16xi1>, vector<16x16xf32>
      %956 = vector.extract_strided_slice %950 {offsets = [13, 0], sizes = [1, 16], strides = [1, 1]} : vector<16x16xf32> to vector<1x16xf32>
      %957 = vector.extract_strided_slice %955 {offsets = [13, 0], sizes = [1, 16], strides = [1, 1]} : vector<16x16xf32> to vector<1x16xf32>
      %958 = vector.extract_strided_slice %950 {offsets = [13, 13], sizes = [1, 1], strides = [1, 1]} : vector<16x16xf32> to vector<1x1xf32>
      %cst_103 = arith.constant 1.000000e+00 : f32
      %959 = vector.broadcast %cst_103 : f32 to vector<1x1xf32>
      %960 = arith.divf %959, %958 : vector<1x1xf32>
      %961 = vector.broadcast %960 : vector<1x1xf32> to vector<1x16xf32>
      %962 = arith.mulf %956, %961 : vector<1x16xf32>
      %963 = vector.broadcast %960 : vector<1x1xf32> to vector<1x16xf32>
      %964 = arith.mulf %957, %963 : vector<1x16xf32>
      %965 = vector.extract_strided_slice %950 {offsets = [0, 13], sizes = [16, 1], strides = [1, 1]} : vector<16x16xf32> to vector<16x1xf32>
      %c13_i32_104 = arith.constant 13 : i32
      %966 = vector.broadcast %c13_i32_104 : i32 to vector<16x1xi32>
      %967 = arith.cmpi eq, %534, %966 : vector<16x1xi32>
      %cst_105 = arith.constant 0.000000e+00 : f32
      %968 = vector.broadcast %cst_105 : f32 to vector<16x1xf32>
      %969 = arith.select %967, %968, %965 : vector<16x1xi1>, vector<16x1xf32>
      %970 = vector.broadcast %969 : vector<16x1xf32> to vector<16x16xf32>
      %971 = vector.broadcast %962 : vector<1x16xf32> to vector<16x16xf32>
      %972 = arith.mulf %970, %971 : vector<16x16xf32>
      %973 = arith.subf %950, %972 : vector<16x16xf32>
      %974 = vector.broadcast %969 : vector<16x1xf32> to vector<16x16xf32>
      %975 = vector.broadcast %964 : vector<1x16xf32> to vector<16x16xf32>
      %976 = arith.mulf %974, %975 : vector<16x16xf32>
      %977 = arith.subf %955, %976 : vector<16x16xf32>
      %978 = vector.shape_cast %967 : vector<16x1xi1> to vector<16x1xi1>
      %979 = vector.broadcast %978 : vector<16x1xi1> to vector<16x16xi1>
      %980 = vector.shape_cast %962 : vector<1x16xf32> to vector<1x16xf32>
      %981 = vector.broadcast %980 : vector<1x16xf32> to vector<16x16xf32>
      %982 = arith.select %979, %981, %973 : vector<16x16xi1>, vector<16x16xf32>
      %983 = vector.shape_cast %967 : vector<16x1xi1> to vector<16x1xi1>
      %984 = vector.broadcast %983 : vector<16x1xi1> to vector<16x16xi1>
      %985 = vector.shape_cast %964 : vector<1x16xf32> to vector<1x16xf32>
      %986 = vector.broadcast %985 : vector<1x16xf32> to vector<16x16xf32>
      %987 = arith.select %984, %986, %977 : vector<16x16xi1>, vector<16x16xf32>
      %988 = vector.extract_strided_slice %982 {offsets = [14, 0], sizes = [1, 16], strides = [1, 1]} : vector<16x16xf32> to vector<1x16xf32>
      %989 = vector.extract_strided_slice %987 {offsets = [14, 0], sizes = [1, 16], strides = [1, 1]} : vector<16x16xf32> to vector<1x16xf32>
      %990 = vector.extract_strided_slice %982 {offsets = [14, 14], sizes = [1, 1], strides = [1, 1]} : vector<16x16xf32> to vector<1x1xf32>
      %cst_106 = arith.constant 1.000000e+00 : f32
      %991 = vector.broadcast %cst_106 : f32 to vector<1x1xf32>
      %992 = arith.divf %991, %990 : vector<1x1xf32>
      %993 = vector.broadcast %992 : vector<1x1xf32> to vector<1x16xf32>
      %994 = arith.mulf %988, %993 : vector<1x16xf32>
      %995 = vector.broadcast %992 : vector<1x1xf32> to vector<1x16xf32>
      %996 = arith.mulf %989, %995 : vector<1x16xf32>
      %997 = vector.extract_strided_slice %982 {offsets = [0, 14], sizes = [16, 1], strides = [1, 1]} : vector<16x16xf32> to vector<16x1xf32>
      %c14_i32_107 = arith.constant 14 : i32
      %998 = vector.broadcast %c14_i32_107 : i32 to vector<16x1xi32>
      %999 = arith.cmpi eq, %534, %998 : vector<16x1xi32>
      %cst_108 = arith.constant 0.000000e+00 : f32
      %1000 = vector.broadcast %cst_108 : f32 to vector<16x1xf32>
      %1001 = arith.select %999, %1000, %997 : vector<16x1xi1>, vector<16x1xf32>
      %1002 = vector.broadcast %1001 : vector<16x1xf32> to vector<16x16xf32>
      %1003 = vector.broadcast %994 : vector<1x16xf32> to vector<16x16xf32>
      %1004 = arith.mulf %1002, %1003 : vector<16x16xf32>
      %1005 = arith.subf %982, %1004 : vector<16x16xf32>
      %1006 = vector.broadcast %1001 : vector<16x1xf32> to vector<16x16xf32>
      %1007 = vector.broadcast %996 : vector<1x16xf32> to vector<16x16xf32>
      %1008 = arith.mulf %1006, %1007 : vector<16x16xf32>
      %1009 = arith.subf %987, %1008 : vector<16x16xf32>
      %1010 = vector.shape_cast %999 : vector<16x1xi1> to vector<16x1xi1>
      %1011 = vector.broadcast %1010 : vector<16x1xi1> to vector<16x16xi1>
      %1012 = vector.shape_cast %994 : vector<1x16xf32> to vector<1x16xf32>
      %1013 = vector.broadcast %1012 : vector<1x16xf32> to vector<16x16xf32>
      %1014 = arith.select %1011, %1013, %1005 : vector<16x16xi1>, vector<16x16xf32>
      %1015 = vector.shape_cast %999 : vector<16x1xi1> to vector<16x1xi1>
      %1016 = vector.broadcast %1015 : vector<16x1xi1> to vector<16x16xi1>
      %1017 = vector.shape_cast %996 : vector<1x16xf32> to vector<1x16xf32>
      %1018 = vector.broadcast %1017 : vector<1x16xf32> to vector<16x16xf32>
      %1019 = arith.select %1016, %1018, %1009 : vector<16x16xi1>, vector<16x16xf32>
      %1020 = vector.extract_strided_slice %1019 {offsets = [15, 0], sizes = [1, 16], strides = [1, 1]} : vector<16x16xf32> to vector<1x16xf32>
      %1021 = vector.extract_strided_slice %1014 {offsets = [15, 15], sizes = [1, 1], strides = [1, 1]} : vector<16x16xf32> to vector<1x1xf32>
      %cst_109 = arith.constant 1.000000e+00 : f32
      %1022 = vector.broadcast %cst_109 : f32 to vector<1x1xf32>
      %1023 = arith.divf %1022, %1021 : vector<1x1xf32>
      %1024 = vector.broadcast %1023 : vector<1x1xf32> to vector<1x16xf32>
      %1025 = arith.mulf %1020, %1024 : vector<1x16xf32>
      %1026 = vector.extract_strided_slice %1014 {offsets = [0, 15], sizes = [16, 1], strides = [1, 1]} : vector<16x16xf32> to vector<16x1xf32>
      %c15_i32_110 = arith.constant 15 : i32
      %1027 = vector.broadcast %c15_i32_110 : i32 to vector<16x1xi32>
      %1028 = arith.cmpi eq, %534, %1027 : vector<16x1xi32>
      %cst_111 = arith.constant 0.000000e+00 : f32
      %1029 = vector.broadcast %cst_111 : f32 to vector<16x1xf32>
      %1030 = arith.select %1028, %1029, %1026 : vector<16x1xi1>, vector<16x1xf32>
      %1031 = vector.broadcast %1030 : vector<16x1xf32> to vector<16x16xf32>
      %1032 = vector.broadcast %1025 : vector<1x16xf32> to vector<16x16xf32>
      %1033 = arith.mulf %1031, %1032 : vector<16x16xf32>
      %1034 = arith.subf %1019, %1033 : vector<16x16xf32>
      %1035 = vector.shape_cast %1028 : vector<16x1xi1> to vector<16x1xi1>
      %1036 = vector.broadcast %1035 : vector<16x1xi1> to vector<16x16xi1>
      %1037 = vector.shape_cast %1025 : vector<1x16xf32> to vector<1x16xf32>
      %1038 = vector.broadcast %1037 : vector<1x16xf32> to vector<16x16xf32>
      %1039 = arith.select %1036, %1038, %1034 : vector<16x16xi1>, vector<16x16xf32>
      %cst_112 = arith.constant dense<0.000000e+00> : vector<16x16xf32>
      %1040 = tpu.matmul %27, %533, %cst_112 {dimension_numbers = #tpu.dot_dimension_numbers<[1], [0], [0], [1], [0, 0, 1, 1], [], []>} : vector<16x16xf32>, vector<16x16xf32>, vector<16x16xf32> -> vector<16x16xf32>
      %c0_113 = arith.constant 0 : index
      %c0_114 = arith.constant 0 : index
      %c0_115 = arith.constant 0 : index
      %1041 = vector.load %arg6[%c0_113, %c0_114, %c0_115] : memref<1x16x16xf32, #tpu.memory_space<vmem>>, vector<1x16x16xf32>
      %1042 = vector.shape_cast %1041 : vector<1x16x16xf32> to vector<16x16xf32>
      %1043 = vector.shape_cast %1040 : vector<16x16xf32> to vector<1x16x16xf32>
      tpu.vector_store %arg6[%c0_113, %c0_114, %c0_115], %1043 {strides = array<i32>} : memref<1x16x16xf32, #tpu.memory_space<vmem>>, vector<1x16x16xf32>,
      %cst_116 = arith.constant dense<0.000000e+00> : vector<16x16xf32>
      %1044 = tpu.matmul %26, %1039, %cst_116 {dimension_numbers = #tpu.dot_dimension_numbers<[1], [0], [0], [1], [0, 0, 1, 1], [], []>} : vector<16x16xf32>, vector<16x16xf32>, vector<16x16xf32> -> vector<16x16xf32>
      %c0_117 = arith.constant 0 : index
      %c0_118 = arith.constant 0 : index
      %c0_119 = arith.constant 0 : index
      %1045 = vector.load %arg7[%c0_117, %c0_118, %c0_119] : memref<1x16x16xf32, #tpu.memory_space<vmem>>, vector<1x16x16xf32>
      %1046 = vector.shape_cast %1045 : vector<1x16x16xf32> to vector<16x16xf32>
      %1047 = vector.shape_cast %1044 : vector<16x16xf32> to vector<1x16x16xf32>
      tpu.vector_store %arg7[%c0_117, %c0_118, %c0_119], %1047 {strides = array<i32>} : memref<1x16x16xf32, #tpu.memory_space<vmem>>, vector<1x16x16xf32>,
    } else {
    }
    return
  }
  func.func @transform_0(%arg0: i32, %arg1: i32) -> (i32, i32, i32) {
    %c0_i32 = arith.constant 0 : i32
    %c0_i32_0 = arith.constant 0 : i32
    return %arg0, %c0_i32, %arg1 : i32, i32, i32
  }
  func.func @transform_1(%arg0: i32, %arg1: i32) -> (i32, i32, i32) {
    %c0_i32 = arith.constant 0 : i32
    %c0_i32_0 = arith.constant 0 : i32
    return %arg0, %arg1, %c0_i32 : i32, i32, i32
  }
  func.func @transform_2(%arg0: i32, %arg1: i32) -> (i32, i32, i32) {
    %c0_i32 = arith.constant 0 : i32
    %c0_i32_0 = arith.constant 0 : i32
    return %arg0, %c0_i32, %arg1 : i32, i32, i32
  }
  func.func @transform_3(%arg0: i32, %arg1: i32) -> (i32, i32, i32) {
    %c0_i32 = arith.constant 0 : i32
    %c0_i32_0 = arith.constant 0 : i32
    return %arg0, %arg1, %c0_i32 : i32, i32, i32
  }
  func.func @transform_4(%arg0: i32, %arg1: i32) -> (i32, i32, i32) {
    %c0_i32 = arith.constant 0 : i32
    %c0_i32_0 = arith.constant 0 : i32
    %c0_i32_1 = arith.constant 0 : i32
    return %arg0, %c0_i32, %c0_i32_0 : i32, i32, i32
  }
  func.func @transform_5(%arg0: i32, %arg1: i32) -> (i32, i32, i32) {
    %c0_i32 = arith.constant 0 : i32
    %c0_i32_0 = arith.constant 0 : i32
    %c0_i32_1 = arith.constant 0 : i32
    return %arg0, %c0_i32, %c0_i32_0 : i32, i32, i32
  }
}

</mosaic_0001>

<bundles_post_ra>
// kernel: tpu_custom_call.1
= control target key start
LH: loop header
LB: loop body
LE: loop exit
PB: predicated region body
PF: predicated region fallthrough
CT: control target
= control target key end

     0   :  { %11 = vsyncpa [#allocation5], 0  ;;  %s4495_s0 = inlined_call_operand.vmem [shape: f32[2,16,300], index: 0, kind: input, shape index: {}]   ;;  %s4496_s1 = inlined_call_operand.vmem [shape: f32[2,300,32], index: 1, kind: input, shape index: {}]   ;;  %s4497_s2 = inlined_call_operand.vmem [shape: f32[2,16,300], index: 2, kind: input, shape index: {}]   ;;  %s4498_s3 = inlined_call_operand.vmem [shape: f32[2,300,32], index: 3, kind: input, shape index: {}]   ;;  %s4499_s4 = inlined_call_operand.hbm [shape: f32[2,16,16], index: 4, kind: output, shape index: {0}]   ;;  %s4500_s5 = inlined_call_operand.hbm [shape: f32[2,16,16], index: 5, kind: output, shape index: {1}]  }
   0x1   :  { %13 = vsyncpa [#allocation5 + $0x1], 0 }
   0x2   :  { %14 = vsyncpa [#allocation7], 0 }
   0x3   :  { %16 = vsyncpa [#allocation7 + $0x1], 0  ;;  %s3595_s18 = smov 0   ;;  %s3597_s19 = smov 0  }
   0x4   :  { %s3599_s20 = smov 0   ;;  %s3601_s21 = smov 0  }
   0x5   :  { %s3603_s22 = smov 0   ;;  %s3605_s23 = smov 0  }
   0x6 LB: > { %s2880_s24 = sadd.s32 4294967295, %s3541_s23   ;;  %s2881_s25 = sadd.s32 4294967294, %s3541_s23   ;;  %s3541_s23 = sphi %s3605_s23, %s22_s23   ;;  %s3537_s22 = sphi %s3603_s22, %s4511_s22   ;;  %s3533_s21 = sphi %s3601_s21, %s4510_s21   ;;  %s3529_s20 = sphi %s3599_s20, %s4509_s20   ;;  %s3525_s19 = sphi %s3597_s19, %s4508_s19   ;;  %s3521_s18 = sphi %s3595_s18, %s4507_s18  }
   0x7   : > { %s34_s26 = sadd.s32 1, %s3537_s22  ;;  %s153_s27 = sadd.s32 1, %s3529_s20 }
   0x8   : > { %p36_p0 = scmp.ge.s32.totalorder %s34_s26, 2  ;;  %p163_p1 = scmp.ne.s32.totalorder %s3529_s20, %s3525_s19 }
   0x9   : > { %p164_p2 = scmp.eq.s32.totalorder %s2880_s24, 1  ;;  %p169_p3 = scmp.ne.s32.totalorder %s3525_s19, %s3521_s18 }
   0xa   : > { %s4513_s26 = smov (%p36_p0, %s34_s26), 0  ;;  %p170_p5 = scmp.eq.s32.totalorder %s2881_s25, 1 }
   0xb   : > { %p3635_p4 = por %p164_p2, %p163_p1  ;;  %s150_s29 = ssub.s32 %s3537_s22, %s4513_s26 }
   0xc   : > { %p2884_p6 = scmp.ge.s32.totalorder %s3541_s23, 1  ;;  %p151_p7 = scmp.eq.s32.totalorder %s150_s29, 0 }
   0xd   : > { %p3642_p8 = por %p170_p5, %p169_p3  ;;  %p266_p9 = scmp.lt.s32.totalorder %s3541_s23, 3 }
   0xe   : > { %s3648_s6 = scalar_select %p151_p7, %s3529_s20, %s153_s27  }
   0xf   : > { %p267_p10 = pnand %p2884_p6, %p266_p9 }
  0x10   : > { %p331_p11 = scmp.lt.s32.totalorder (!%p267_p10), %s3533_s21, 1  ;;  %vm476_vm0 = vcmask (!%p267_p10), 1043456   ;;  %vm469_vm1 = vcmask (!%p267_p10), 359424   ;;  %vm3543_vm2 = vmmov (!%p267_p10), 1   ;;  %vm374_vm4 = vcmask (!%p267_p10), 261120   ;;  %s3561_s25 = smov (!%p267_p10), [#allocation4]  }
  0x11   : > { %270 = sbr.rel (%p267_p10) target bundleno = 3273 (0xcc9), region = 36  ;;  %vm3699_vm3 = vmpackc.low (!%p267_p10), %vm476_vm0, %vm3543_vm2  ;;  %vm2516_vm7 = vcmask (!%p267_p10), 130048   ;;  %s3435_s27 = sshll.u32 (!%p267_p10), %s3561_s25, 4  ;;  %s3436_s27 = int_to_ptr.vmem [resolvable:$false] %s3435_s27 }
  0x12   : > { %vm3802_vm5 = vmpackc.low (!%p267_p10), %vm374_vm4, %vm374_vm4 }
  0x18   : > { %s3652_s7 = scalar_select %p331_p11, %s3533_s21, 1 }
  0x1a   : > { %s3242_s8 = smul.u32 304, %s3652_s7 }
  0x1b   : > { %s3241_s12 = smul.u32 48, %s3652_s7  ;;  %s4386_s7 = sand.u32 1, %s3525_s19  }
  0x1c   : > { %s3660_s11 = scalar_lea.vmem %s4496_s1, %s3242_s8  ;;  %s3690_s24 = scalar_lea.vmem %s4498_s3, %s3242_s8 }
  0x1d   : > { %v401_v0 = vld [vmem:[%s3660_s11 + $0x80] sm:$0xff]  ;;  %v402_v1 = vld [vmem:[%s3660_s11 + $0x88] sm:$0xff]  ;;  %v403_v9 = vld [vmem:[%s3660_s11 + $0x90] sm:$0xff]  ;;  %s3680_s15 = scalar_lea.vmem %s4495_s0, %s3241_s12  ;;  %s3750_s29 = scalar_lea.vmem %s4497_s2, %s3241_s12 }
  0x1e   : > { %v417_v2 = vld [vmem:[%s3660_s11 + $0x100] sm:$0xff]  ;;  %v3117_v3 = vpack.c.bf16 %v402_v1, %v401_v0  ;;  %v418_v4 = vld [vmem:[%s3660_s11 + $0x108] sm:$0xff]  ;;  %v404_v10 = vld [vmem:[%s3660_s11 + $0x98] sm:$0xff]  ;;  %s2885_s8 = sshll.u32 %s4386_s7, 4  ;;  %s2684_s17 = scalar_lea.sflag [#allocation5], %s4386_s7 }
  0x1f   : > { %v385_v5 = vld [vmem:[%s3660_s11] sm:$0xff]  ;;  %v386_v6 = vld [vmem:[%s3660_s11 + $0x8] sm:$0xff]  ;;  %v3149_v7 = vpack.c.bf16 %v418_v4, %v417_v2  ;;  %v419_v11 = vld [vmem:[%s3660_s11 + $0x110] sm:$0xff]  ;;  %v3121_v12 = vpack.c.bf16 %v404_v10, %v403_v9  ;;  %s322_s9 = scalar_lea.vmem [#allocation4], %s2885_s8 }
  0x20   : > { %v3119_v8 = vpack.c.bf16 %v386_v6, %v385_v5  ;;  %3118 = vmatprep.subr.bf16.mxu0 %v3117_v3  ;;  %v420_v13 = vld [vmem:[%s3660_s11 + $0x118] sm:$0xff]  ;;  %v387_v14 = vld [vmem:[%s3660_s11 + $0x10] sm:$0xff]  ;;  %v405_v18 = vld [vmem:[%s3660_s11 + $0xa0] sm:$0xff]  ;;  %s2702_s10 = sshll.u32 %s322_s9, 4  ;;  %s4390_s10 = int_to_ptr.vmem [resolvable:$true] %s2702_s10 }
  0x21   : > { %v388_v15 = vld [vmem:[%s3660_s11 + $0x18] sm:$0xff]  ;;  %3150 = vmatprep.subr.bf16.mxu1 %v3149_v7  ;;  %v3153_v16 = vpack.c.bf16 %v420_v13, %v419_v11  ;;  %v406_v19 = vld [vmem:[%s3660_s11 + $0xa8] sm:$0xff]  ;;  %v421_v20 = vld [vmem:[%s3660_s11 + $0x120] sm:$0xff]  ;;  %p3438_p1 = scmp.lt.s32.totalorder %s4390_s10, %s3436_s27 }
  0x22   : > { %3120 = vmatpush3.bf16.msra.mxu0 %v3119_v8  ;;  %v3123_v17 = vpack.c.bf16 %v388_v15, %v387_v14  ;;  %3152 = vmatpush3.bf16.msra.mxu1 %v3149_v7  ;;  %v3125_v21 = vpack.c.bf16 %v406_v19, %v405_v18  ;;  %v422_v22 = vld [vmem:[%s3660_s11 + $0x128] sm:$0xf]  ;;  %v389_v23 = vld [vmem:[%s3660_s11 + $0x20] sm:$0xff]  ;;  %v381_v26 = vld [vmem:[%s3680_s15 + $0x10] sm:$0xff] }
  0x23   : > { %3122 = vmatprep.subr.bf16.mxu0 %v3121_v12  ;;  %v390_v24 = vld [vmem:[%s3660_s11 + $0x28] sm:$0xff]  ;;  %3154 = vmatprep.subr.bf16.mxu1 %v3153_v16  ;;  %v3157_v25 = vpack.c.bf16 %v422_v22, %v421_v20  ;;  %v407_v27 = vld [vmem:[%s3660_s11 + $0xb0] sm:$0xff]  ;;  %v408_v28 = vld [vmem:[%s3660_s11 + $0xb8] sm:$0xff] }
  0x24   : > { %3057 = vmatprep.mubr.msk.f32.mxu1 %vm469_vm1, %v381_v26  ;;  %v445_v30 = vld [vmem:[%s3690_s24 + $0x80] sm:$0xff]  ;;  %v446_v31 = vld [vmem:[%s3690_s24 + $0x88] sm:$0xff]  ;;  %v3127_v32 = vpack.c.bf16 %v390_v24, %v389_v23  ;;  %v3129_v33 = vpack.c.bf16 %v408_v28, %v407_v27  ;;  %v391_v34 = vld [vmem:[%s3660_s11 + $0x30] sm:$0xff] }
  0x25   : > { %v392_v35 = vld [vmem:[%s3660_s11 + $0x38] sm:$0xff]  ;;  %v429_v36 = vld [vmem:[%s3690_s24] sm:$0xff]  ;;  %v3163_v37 = vpack.c.bf16 %v446_v31, %v445_v30  ;;  %v430_v38 = vld [vmem:[%s3690_s24 + $0x8] sm:$0xff] }
  0x26   : > { %3124 = vmatpush3.bf16.msra.mxu0 %v3123_v17  ;;  %3156 = vmatpush3.bf16.msra.mxu1 %v3153_v16  ;;  %v409_v39 = vld [vmem:[%s3660_s11 + $0xc0] sm:$0xff]  ;;  %v410_v40 = vld [vmem:[%s3660_s11 + $0xc8] sm:$0xff]  ;;  %v447_v41 = vld [vmem:[%s3690_s24 + $0x90] sm:$0xff]  ;;  %v3131_v44 = vpack.c.bf16 %v392_v35, %v391_v34  ;;  %v3165_v45 = vpack.c.bf16 %v430_v38, %v429_v36 }
  0x27   : > { %3126 = vmatprep.subr.bf16.mxu0 %v3125_v21  ;;  %3159 = vmatprep.subr.msk.bf16.mxu1 %vm3699_vm3, %v3157_v25  ;;  %v448_v42 = vld [vmem:[%s3690_s24 + $0x98] sm:$0xff]  ;;  %v384_v43 = vld [vmem:[%s3680_s15 + $0x28] sm:$0xff]  ;;  %v3133_v46 = vpack.c.bf16 %v410_v40, %v409_v39  ;;  %v393_v47 = vld [vmem:[%s3660_s11 + $0x40] sm:$0xff] }
  0x28   : > { %v394_v48 = vld [vmem:[%s3660_s11 + $0x48] sm:$0xff]  ;;  %v431_v49 = vld [vmem:[%s3690_s24 + $0x10] sm:$0xff]  ;;  %v3167_v50 = vpack.c.bf16 %v448_v42, %v447_v41  ;;  %v432_v51 = vld [vmem:[%s3690_s24 + $0x18] sm:$0xff] }
  0x29   : > { %v411_v52 = vld [vmem:[%s3660_s11 + $0xd0] sm:$0xff]  ;;  %v412_v53 = vld [vmem:[%s3660_s11 + $0xd8] sm:$0xff]  ;;  %v449_v54 = vld [vmem:[%s3690_s24 + $0xa0] sm:$0xff]  ;;  %v3135_v56 = vpack.c.bf16 %v394_v48, %v393_v47  ;;  %v3169_v57 = vpack.c.bf16 %v432_v51, %v431_v49 }
  0x2a   : > { %3128 = vmatpush3.bf16.msra.mxu0 %v3127_v32  ;;  %3162 = vmatpush3.bf16.msk.msra.mxu1 %vm3699_vm3, %v3157_v25  ;;  %v450_v55 = vld [vmem:[%s3690_s24 + $0xa8] sm:$0xff]  ;;  %v3137_v58 = vpack.c.bf16 %v412_v53, %v411_v52  ;;  %v395_v59 = vld [vmem:[%s3660_s11 + $0x50] sm:$0xff]  ;;  %v396_v60 = vld [vmem:[%s3660_s11 + $0x58] sm:$0xff] }
  0x2b   : > { %3130 = vmatprep.subr.bf16.mxu0 %v3129_v33  ;;  %3164 = vmatprep.subr.bf16.mxu1 %v3163_v37  ;;  %v433_v61 = vld [vmem:[%s3690_s24 + $0x20] sm:$0xff]  ;;  %v3171_v62 = vpack.c.bf16 %v450_v55, %v449_v54  ;;  %v434_v63 = vld [vmem:[%s3690_s24 + $0x28] sm:$0xff]  ;;  %v451_v2 = vld [vmem:[%s3690_s24 + $0xb0] sm:$0xff]  ;;  %v3139_v4 = vpack.c.bf16 %v396_v60, %v395_v59 }
  0x2c   : > { %v413_v0 = vld [vmem:[%s3660_s11 + $0xe0] sm:$0xff]  ;;  %v414_v1 = vld [vmem:[%s3660_s11 + $0xe8] sm:$0xff]  ;;  %v452_v3 = vld [vmem:[%s3690_s24 + $0xb8] sm:$0xff]  ;;  %v3173_v6 = vpack.c.bf16 %v434_v63, %v433_v61 }
  0x2d   : > { %3058 = vmatmul.mubr.msk.f32.vlgmr.msra.gmra.mrb[0].mxu1 %vm469_vm1, %v384_v43  ;;  %v380_v5 = vld [vmem:[%s3680_s15 + $0x8] sm:$0xff]  ;;  %v3141_v7 = vpack.c.bf16 %v414_v1, %v413_v0  ;;  %v397_v8 = vld [vmem:[%s3660_s11 + $0x60] sm:$0xff]  ;;  %v435_v10 = vld [vmem:[%s3690_s24 + $0x30] sm:$0xff]  ;;  %v3175_v11 = vpack.c.bf16 %v452_v3, %v451_v2  ;;  %v3544_v0 = vmov 0.0  }
  0x2e   : > { %3132 = vmatpush3.bf16.msra.mxu0 %v3131_v44  ;;  %3166 = vmatpush3.bf16.msra.mxu1 %v3165_v45  ;;  %v398_v9 = vld [vmem:[%s3660_s11 + $0x68] sm:$0xff]  ;;  %v436_v12 = vld [vmem:[%s3690_s24 + $0x38] sm:$0xff]  ;;  %v415_v13 = vld [vmem:[%s3660_s11 + $0xf0] sm:$0xff]  ;;  %375 = vst.msk [vmem:[#allocation2] sm:$0xff] %vm374_vm4, %v3544_v0 }
  0x2f   : > { %3134 = vmatprep.subr.bf16.mxu0 %v3133_v46  ;;  %3168 = vmatprep.subr.bf16.mxu1 %v3167_v50  ;;  %v416_v14 = vld [vmem:[%s3660_s11 + $0xf8] sm:$0xff]  ;;  %v453_v15 = vld [vmem:[%s3690_s24 + $0xc0] sm:$0xff]  ;;  %v454_v16 = vld [vmem:[%s3690_s24 + $0xc8] sm:$0xff]  ;;  %v3143_v17 = vpack.c.bf16 %v398_v9, %v397_v8  ;;  %v3177_v18 = vpack.c.bf16 %v436_v12, %v435_v10  ;;  %376 = vst.msk [vmem:[#allocation2 + $0x8] sm:$0xff] %vm374_vm4, %v3544_v0 }
  0x30   : > { %544 = vmatprep.mubr.f32.mxu0 %v380_v5  ;;  %v3145_v19 = vpack.c.bf16 %v416_v14, %v415_v13  ;;  %v399_v20 = vld [vmem:[%s3660_s11 + $0x70] sm:$0xff]  ;;  %v400_v21 = vld [vmem:[%s3660_s11 + $0x78] sm:$0xff]  ;;  %v437_v22 = vld [vmem:[%s3690_s24 + $0x40] sm:$0xff]  ;;  %v3179_v23 = vpack.c.bf16 %v454_v16, %v453_v15  ;;  %377 = vst.msk [vmem:[#allocation3] sm:$0xff] %vm374_vm4, %v3544_v0  ;;  %s2927_s11 = sshll.u32 %s3533_s21, 8 }
  0x31   : > { %v438_v24 = vld [vmem:[%s3690_s24 + $0x48] sm:$0xff]  ;;  %v461_v25 = vld [vmem:[%s3690_s24 + $0x100] sm:$0xff]  ;;  %v455_v27 = vld [vmem:[%s3690_s24 + $0xd0] sm:$0xff]  ;;  %v3147_v31 = vpack.c.bf16 %v400_v21, %v399_v20  ;;  %378 = vst.msk [vmem:[#allocation3 + $0x8] sm:$0xff] %vm374_vm4, %v3544_v0  ;;  %s4397_s14 = scalar_lea.hbm %s4499_s4, %s2927_s11 }
  0x32   : > { %3136 = vmatpush3.bf16.msra.mxu0 %v3135_v56  ;;  %3170 = vmatpush3.bf16.msra.mxu1 %v3169_v57  ;;  %v462_v26 = vld [vmem:[%s3690_s24 + $0x108] sm:$0xff]  ;;  %v456_v28 = vld [vmem:[%s3690_s24 + $0xd8] sm:$0xff]  ;;  %v3181_v32 = vpack.c.bf16 %v438_v24, %v437_v22  ;;  %v439_v33 = vld [vmem:[%s3690_s24 + $0x50] sm:$0xff] }
  0x33   : > { %3138 = vmatprep.subr.bf16.mxu0 %v3137_v58  ;;  %3172 = vmatprep.subr.bf16.mxu1 %v3171_v62  ;;  %v424_v30 = vld [vmem:[%s3750_s29 + $0x8] sm:$0xff]  ;;  %v3195_v34 = vpack.c.bf16 %v462_v26, %v461_v25  ;;  %v3183_v35 = vpack.c.bf16 %v456_v28, %v455_v27  ;;  %v440_v36 = vld [vmem:[%s3690_s24 + $0x58] sm:$0xff]  ;;  %v463_v37 = vld [vmem:[%s3690_s24 + $0x110] sm:$0xff] }
  0x34   : > { %710 = vmatprep.mubr.f32.mxu1 %v424_v30  ;;  %v464_v38 = vld [vmem:[%s3690_s24 + $0x118] sm:$0xff]  ;;  %v457_v39 = vld [vmem:[%s3690_s24 + $0xe0] sm:$0xff]  ;;  %v458_v40 = vld [vmem:[%s3690_s24 + $0xe8] sm:$0xff]  ;;  %v3185_v42 = vpack.c.bf16 %v440_v36, %v439_v33  ;;  %v3545_v36 = vmov 0  }
  0x35   : > { %v379_v41 = vld [vmem:[%s3680_s15] sm:$0xff]  ;;  %v3199_v45 = vpack.c.bf16 %v464_v38, %v463_v37  ;;  %v3187_v46 = vpack.c.bf16 %v458_v40, %v457_v39  ;;  %v442_v47 = vld [vmem:[%s3690_s24 + $0x68] sm:$0xff]  ;;  %v459_v50 = vld [vmem:[%s3690_s24 + $0xf0] sm:$0xff]  ;;  %3324 = vset.pattern.permute.xlu1 %v3545_v36  ;;  %3323 = vset.pattern.permute.xlu0 %v3545_v36  ;;  %v1119_v37 = vlaneseq }
  0x36   : > { %3140 = vmatpush3.bf16.msra.mxu0 %v3139_v4  ;;  %3174 = vmatpush3.bf16.msra.mxu1 %v3173_v6  ;;  %v383_v43 = vld [vmem:[%s3680_s15 + $0x20] sm:$0xff]  ;;  %v466_v49 = vld [vmem:[%s3690_s24 + $0x128] sm:$0xf]  ;;  %v460_v51 = vld [vmem:[%s3690_s24 + $0xf8] sm:$0xff] }
  0x37   : > { %3142 = vmatprep.subr.bf16.mxu0 %v3141_v7  ;;  %3176 = vmatprep.subr.bf16.mxu1 %v3175_v11  ;;  %v441_v44 = vld [vmem:[%s3690_s24 + $0x60] sm:$0xff]  ;;  %v382_v52 = vld [vmem:[%s3680_s15 + $0x18] sm:$0xff]  ;;  %v425_v55 = vld [vmem:[%s3750_s29 + $0x10] sm:$0xff]  ;;  %v3191_v56 = vpack.c.bf16 %v460_v51, %v459_v50  ;;  %v3831_v38 = vshrl.u32 %v1119_v37, 7  ;;  %v3546_v51 = vmov 1   ;;  %s4400_s15 = scalar_lea.vmem [#allocation6], %s2885_s8 }
  0x38   : > { %v465_v48 = vld [vmem:[%s3690_s24 + $0x120] sm:$0xff]  ;;  %v3189_v53 = vpack.c.bf16 %v442_v47, %v441_v44  ;;  %v443_v57 = vld [vmem:[%s3690_s24 + $0x70] sm:$0xff]  ;;  %v444_v58 = vld [vmem:[%s3690_s24 + $0x78] sm:$0xff]  ;;  %s2718_s16 = sshll.u32 %s4400_s15, 4  ;;  %s3431_s24 = scalar_lea.vmem %s4390_s10, 256  ;;  %s4433_s16 = int_to_ptr.vmem [resolvable:$true] %s2718_s16 }
  0x39   : > { %v3203_v54 = vpack.c.bf16 %v466_v49, %v465_v48  ;;  %v3193_v59 = vpack.c.bf16 %v444_v58, %v443_v57  ;;  %v428_v60 = vld [vmem:[%s3750_s29 + $0x28] sm:$0xff]  ;;  %v423_v61 = vld [vmem:[%s3750_s29] sm:$0xff]  ;;  %v426_v63 = vld [vmem:[%s3750_s29 + $0x18] sm:$0xff]  ;;  %vm1139_vm6 = vcmp.eq.s32.totalorder %v3831_v38, 0  ;;  %vm1186_vm8 = vcmp.eq.s32.totalorder %v3831_v38, 1  ;;  %p3432_p12 = scmp.ne.s32.totalorder %s4390_s10, %s3431_s24 }
  0x3a   : > { %3144 = vmatpush3.bf16.msra.mxu0 %v3143_v17  ;;  %3178 = vmatpush3.bf16.msra.mxu1 %v3177_v18  ;;  %v427_v62 = vld [vmem:[%s3750_s29 + $0x20] sm:$0xff]  ;;  %v468_v11 = vld [vmem:[#allocation2 + $0x8] sm:$0xff]  ;;  %v635_v20 = vld [vmem:[#allocation3] sm:$0xff]  ;;  %vm1233_vm10 = vcmp.eq.s32.totalorder %v3831_v38, 2  ;;  %vm1280_vm12 = vcmp.eq.s32.totalorder %v3831_v38, 3  ;;  %vm1327_vm13 = vcmp.eq.s32.totalorder %v3831_v38, 4 }
  0x3b   : > { %3146 = vmatprep.subr.bf16.mxu0 %v3145_v19  ;;  %3180 = vmatprep.subr.bf16.mxu1 %v3179_v23  ;;  %v467_v5 = vld [vmem:[#allocation2] sm:$0xff]  ;;  %v636_v30 = vld [vmem:[#allocation3 + $0x8] sm:$0xff]  ;;  %vm1374_vm14 = vcmp.eq.s32.totalorder %v3831_v38, 5  ;;  %vm1421_vm15 = vcmp.eq.s32.totalorder %v3831_v38, 6  ;;  %p3433_p13 = pnand %p3432_p12, %p3635_p4  ;;  %s3437_s29 = scalar_lea.vmem %s3436_s27, 512 }
  0x3c   : > { %p3439_p2 = scmp.lt.s32.totalorder %s3437_s29, %s3431_s24 }
  0x3d   : > { %p3434_p0 = pneg %p3433_p13 }
  0x3e   : > { %3148 = vmatpush3.bf16.msra.mxu0 %v3147_v31  ;;  %3182 = vmatpush3.bf16.msra.mxu1 %v3181_v32  ;;  %p3440_p3 = por %p3439_p2, %p3438_p1 }
  0x3f   : > { %3196 = vmatprep.subr.bf16.mxu0 %v3195_v34  ;;  %3184 = vmatprep.subr.bf16.mxu1 %v3183_v35 }
  0x40   : > { %p3441_p5 = pnand %p3440_p3, %p3434_p0 }
  0x41   : > { %545 = vmatmul.mubr.f32.vlgmr.msra.gmra.mrb[0].mxu0 %v379_v41 }
  0x42   : > { %549 = vmatprep.mubr.f32.mxu0 %v383_v43  ;;  %3198 = vmatpush3.bf16.msra.mxu0 %v3195_v34 }
  0x43   : > { %3186 = vmatpush3.bf16.msra.mxu1 %v3185_v42  ;;  %3200 = vmatprep.subr.bf16.mxu0 %v3199_v45 }
  0x44   : > { %3188 = vmatprep.subr.bf16.mxu1 %v3187_v46 }
  0x45   : > { %550 = vmatmul.mubr.f32.gmra.mrb[2].mxu0 %v382_v52  ;;  %v3851_v52 = vsub.s32 0, %v3831_v38 }
  0x46   : > { %3202 = vmatpush3.bf16.msra.mxu0 %v3199_v45  ;;  %3072 = vmatprep.mubr.msk.f32.mxu0 %vm469_vm1, %v425_v55 }
  0x47   : > { %3190 = vmatpush3.bf16.msra.mxu1 %v3189_v53  ;;  %3205 = vmatprep.subr.msk.bf16.mxu0 %vm3699_vm3, %v3203_v54 }
  0x48   : > { %3192 = vmatprep.subr.bf16.mxu1 %v3191_v56 }
  0x4a   : > { %3208 = vmatpush3.bf16.msk.msra.mxu0 %vm3699_vm3, %v3203_v54 }
  0x4b   : > { %3194 = vmatpush3.bf16.msra.mxu1 %v3193_v59 }
  0x4d   : > { %3073 = vmatmul.mubr.msk.f32.vlgmr.msra.gmra.mrb[4].mxu0 %vm469_vm1, %v428_v60  ;;  %vm1468_vm1 = vcmp.eq.s32.totalorder %v3831_v38, 7 }
  0x4e   : > { %711 = vmatmul.mubr.f32.vlgmr.msra.gmra.mrb[2].mxu1 %v423_v61 }
  0x4f   : > { %715 = vmatprep.mubr.f32.mxu1 %v427_v62 }
  0x52   : > { %716 = vmatmul.mubr.f32.gmra.mrb[4].mxu1 %v426_v63 }
 0x100   : > { %v3059_v29 = vpop.f32.mrb[0].mxu1 }
 0x101   : > { %v621_v1 = vpop.f32.mrb[1].mxu1 }
 0x114   : > { %v2961_v2 = vpop.f32.mrb[0].mxu0 }
 0x115   : > { %v2962_v3 = vpop.f32.mrb[1].mxu0 }
 0x116   : > { %v2963_v4 = vadd.f32 %v2962_v3, %v2961_v2 }
 0x118   : > { %v622_v6 = vadd.f32 %v2963_v4, %v621_v1  ;;  %v2964_v7 = vpop.f32.mrb[2].mxu0 }
 0x119   : > { %v2965_v8 = vpop.f32.mrb[3].mxu0 }
 0x11a   : > { %v630_v9 = vadd.f32 %v622_v6, %v467_v5  ;;  %v2966_v10 = vadd.f32 %v2965_v8, %v2964_v7  ;;  %v3547_v7 = vmov 2   ;;  %v3876_v8 = vand.u32 127, %v1119_v37 }
 0x11c   : > { %633 = vst.msk [vmem:[#allocation2] sm:$0xff] %vm374_vm4, %v630_v9  ;;  %v627_v12 = vadd.f32 %v3059_v29, %v2966_v10  ;;  %vm1124_vm9 = vcmp.eq.s32.totalorder %v3831_v38, %v3876_v8 }
 0x11d   : > { %v3881_v9 = vsel %vm1124_vm9, 1.0, %v3544_v0 }
 0x11e   : > { %v631_v13 = vadd.f32 %v627_v12, %v468_v11 }
 0x120   : > { %634 = vst.msk [vmem:[#allocation2 + $0x8] sm:$0xff] %vm374_vm4, %v631_v13  ;;  %v3074_v14 = vpop.f32.mrb[4].mxu0 }
 0x121   : > { %v3007_v15 = vpop.f32.mrb[2].mxu1  ;;  %v787_v16 = vpop.f32.mrb[5].mxu0 }
 0x122   : > { %v3008_v17 = vpop.f32.mrb[3].mxu1 }
 0x123   : > { %v3009_v18 = vadd.f32 %v3008_v17, %v3007_v15  ;;  %v803_v19 = vld [vmem:[#allocation2] sm:$0xff]  ;;  %v3893_v17 = vsub.s32 1, %v3831_v38 }
 0x124   : > { %3079 = vmatprep.mubr.msk.f32.mxu0 %vm374_vm4, %v803_v19 }
 0x125   : > { %v788_v21 = vadd.f32 %v3009_v18, %v787_v16  ;;  %v3010_v22 = vpop.f32.mrb[4].mxu1 }
 0x126   : > { %v3011_v23 = vpop.f32.mrb[5].mxu1 }
 0x127   : > { %v796_v24 = vadd.f32 %v788_v21, %v635_v20  ;;  %v804_v25 = vld [vmem:[#allocation2 + $0x8] sm:$0xff]  ;;  %v3012_v26 = vadd.f32 %v3011_v23, %v3010_v22 }
 0x128   : > { %v3209_v28 = vpack.c.bf16 %v804_v25, %v803_v19 }
 0x129   : > { %798 = vst.msk [vmem:[#allocation3] sm:$0xff] %vm374_vm4, %v796_v24  ;;  %v793_v31 = vadd.f32 %v3074_v14, %v3012_v26 }
 0x12a   : > { %3211 = vmatprep.subr.msk.bf16.mxu0 %vm3802_vm5, %v3209_v28 }
 0x12b   : > { %v797_v32 = vadd.f32 %v793_v31, %v636_v30  ;;  %3214 = vmatpush3.bf16.xpose.msk.msra.mxu0 %vm3802_vm5, %v3209_v28 }
 0x12d   : > { %799 = vst.msk [vmem:[#allocation3 + $0x8] sm:$0xff] %vm374_vm4, %v797_v32 }
 0x130   : > { %v805_v33 = vld [vmem:[#allocation3] sm:$0xff] }
 0x131   : > { %3086 = vmatprep.mubr.msk.f32.mxu1 %vm374_vm4, %v805_v33 }
 0x132   : > { %3080 = vmatmul.mubr.msk.f32.vlgmr.msra.gmra.mrb[6].mxu0 %vm374_vm4, %v804_v25 }
 0x133   : > { %3093 = vmatprep.mubr.msk.f32.mxu0 %vm374_vm4, %v803_v19 }
 0x134   : > { %v806_v34 = vld [vmem:[#allocation3 + $0x8] sm:$0xff] }
 0x135   : > { %v3215_v35 = vpack.c.bf16 %v806_v34, %v805_v33 }
 0x137   : > { %3217 = vmatprep.subr.msk.bf16.mxu1 %vm3802_vm5, %v3215_v35  ;;  %3223 = vmatprep.subr.msk.bf16.mxu0 %vm3802_vm5, %v3215_v35 }
 0x138   : > { %3220 = vmatpush3.bf16.xpose.msk.msra.mxu1 %vm3802_vm5, %v3215_v35  ;;  %3226 = vmatpush3.bf16.xpose.msk.msra.mxu0 %vm3802_vm5, %v3215_v35 }
 0x139   : > { %3229 = vmatprep.subr.msk.bf16.mxu1 %vm3802_vm5, %v3209_v28 }
 0x13f   : > { %3087 = vmatmul.mubr.msk.f32.vlgmr.msra.gmra.mrb[6].mxu1 %vm374_vm4, %v806_v34  ;;  %3094 = vmatmul.mubr.msk.f32.vlgmr.msra.gmra.mrb[8].mxu0 %vm374_vm4, %v804_v25 }
 0x140   : > { %3232 = vmatpush3.bf16.xpose.msk.msra.mxu1 %vm3802_vm5, %v3209_v28  ;;  %3100 = vmatprep.mubr.msk.f32.mxu1 %vm374_vm4, %v805_v33 }
 0x147   : > { %3101 = vmatmul.mubr.msk.f32.vlgmr.msra.gmra.mrb[8].mxu1 %vm374_vm4, %v806_v34 }
 0x205   : > { %v3834_v39 = vpop.f32.mrb[6].mxu0 }
 0x206   : > { %v879_v40 = vpop.f32.mrb[7].mxu0 }
 0x207   : > { %3367 = vrcp.f32 %v879_v40  ;;  %v1141_v41 = vsel %vm1139_vm6, 0.0, %v879_v40 }
 0x208   : > { %1145 = vperm.xlu1 %3324, %v1141_v41  }
 0x211   : > { %v3368_v42 = vpop.eup %3367 }
 0x212   : > { %v3838_v43 = vpop.f32.mrb[6].mxu1  ;;  %v3840_v44 = vpop.f32.mrb[8].mxu0  ;;  %1134 = vperm.xlu0 %3323, %v3368_v42  }
 0x213   : > { %v960_v45 = vpop.f32.mrb[7].mxu1  ;;  %v1035_v46 = vpop.f32.mrb[9].mxu0 }
 0x214   : > { %3369 = vrcp.f32 %v960_v45  ;;  %3114 = vmatprep.mubr.msk.f32.mxu1 %vm2516_vm7, %v1035_v46  ;;  %v1880_v47 = vsel %vm1139_vm6, 0.0, %v960_v45 }
 0x215   : > { %1884 = vperm.xlu1 %3324, %v1880_v47  }
 0x219   : > { %3326 = vset.pattern.permute.xlu1 %v3546_v51 }
 0x21a   : > { %v3845_v48 = vpop.f32.mrb[8].mxu1 }
 0x21b   : > { %v1110_v49 = vpop.f32.mrb[9].mxu1 }
 0x21c   : > { %3107 = vmatprep.mubr.msk.f32.mxu0 %vm2516_vm7, %v1110_v49 }
 0x21e   : > { %v3370_v50 = vpop.eup %3369 }
 0x21f   : > { %1875 = vperm.xlu0 %3323, %v3370_v50  }
 0x223   : > { %3325 = vset.pattern.permute.xlu0 %v3546_v51 }
 0x287   : > { %v1146_v56 = vpop.permute.xlu1 %1145 }
 0x291   : > { %v1135_v53 = vpop.permute.xlu0 %1134 }
 0x292   : > { %v1137_v54 = vmul.f32 %v1135_v53, %v879_v40  ;;  %v1138_v10 = vmul.f32 %v3881_v9, %v1135_v53  ;;  %v3936_v53 = vsub.s32 2, %v3831_v38 }
 0x294   : > { %v3854_v55 = vrot.slane %v1137_v54, %v3851_v52  ;;  %v3864_v63 = vpop.permute.xlu1 %1884  ;;  %v3885_v11 = vrot.slane %v1138_v10, %v3851_v52 }
 0x296   : > { %v1157_v57 = vmul.f32 %v3854_v55, %v1146_v56  ;;  %v1165_v12 = vmul.f32 %v3885_v11, %v1146_v56 }
 0x298   : > { %v1159_v58 = vsub.f32 %v879_v40, %v1157_v57  ;;  %v1167_v13 = vsub.f32 %v3881_v9, %v1165_v12 }
 0x29a   : > { %v1173_v59 = vsel %vm1139_vm6, %v3854_v55, %v1159_v58  ;;  %v1175_v14 = vsel %vm1139_vm6, %v3885_v11, %v1167_v13 }
 0x29b   : > { %3371 = vrcp.f32 %v1173_v59  ;;  %v1188_v6 = vsel %vm1186_vm8, 0.0, %v1173_v59 }
 0x29e   : > { %v3860_v60 = vpop.permute.xlu0 %1875 }
 0x29f   : > { %v1878_v61 = vmul.f32 %v3860_v60, %v960_v45 }
 0x2a1   : > { %v1895_v62 = vrot.slane %v1878_v61, %v3851_v52 }
 0x2a3   : > { %v1896_v29 = vmul.f32 %v1895_v62, %v3864_v63 }
 0x2a5   : > { %v3372_v1 = vpop.eup %3371  ;;  %v1898_v2 = vsub.f32 %v960_v45, %v1896_v29 }
 0x2a6   : > { %1181 = vperm.xlu0 %3325, %v3372_v1  }
 0x2a7   : > { %v1908_v3 = vsel %vm1139_vm6, %v1895_v62, %v1898_v2 }
 0x2a8   : > { %3373 = vrcp.f32 %v1908_v3  ;;  %v1921_v4 = vsel %vm1186_vm8, 0.0, %v1908_v3 }
 0x2aa   : > { %1925 = vperm.xlu0 %3325, %v1921_v4  }
 0x2ae   : > { %3328 = vset.pattern.permute.xlu0 %v3545_v36 }
 0x2af   : > { %1889 = vperm.xlu0 %3328, %v3838_v43  }
 0x2b2   : > { %v3374_v5 = vpop.eup %3373 }
 0x2b3   : > { %1916 = vperm.xlu1 %3326, %v3374_v5   ;;  %3329 = vset.pattern.permute.xlu0 %v3547_v7 }
 0x2b7   : > { %1192 = vperm.xlu1 %3326, %v1188_v6  }
 0x2bb   : > { %3327 = vset.pattern.permute.xlu1 %v3545_v36 }
 0x2bc   : > { %1150 = vperm.xlu1 %3327, %v3834_v39  }
 0x2c0   : > { %3330 = vset.pattern.permute.xlu1 %v3547_v7 }
 0x325   : > { %v1182_v15 = vpop.permute.xlu0 %1181 }
 0x326   : > { %v1185_v16 = vmul.f32 %v1182_v15, %v1175_v14  ;;  %v1184_v18 = vmul.f32 %v1182_v15, %v1173_v59 }
 0x328   : > { %v3901_v22 = vrot.slane %v1184_v18, %v3893_v17  ;;  %v3904_v23 = vrot.slane %v1185_v16, %v3893_v17 }
 0x329   : > { %v3897_v20 = vpop.permute.xlu0 %1925 }
 0x32e   : > { %v3913_v30 = vpop.permute.xlu0 %1889 }
 0x32f   : > { %v1897_v36 = vmul.f32 %v1895_v62, %v3913_v30 }
 0x331   : > { %v1899_v41 = vsub.f32 %v3838_v43, %v1897_v36  ;;  %v3548_v43 = vmov 3  }
 0x332   : > { %v3895_v19 = vpop.permute.xlu1 %1916 }
 0x333   : > { %v1919_v21 = vmul.f32 %v3895_v19, %v1908_v3 }
 0x335   : > { %v3907_v24 = vrot.slane %v1919_v21, %v3893_v17 }
 0x336   : > { %v1193_v25 = vpop.permute.xlu1 %1192 }
 0x337   : > { %v1937_v26 = vmul.f32 %v3907_v24, %v3897_v20  ;;  %v1204_v27 = vmul.f32 %v3901_v22, %v1193_v25  ;;  %v1212_v28 = vmul.f32 %v3904_v23, %v1193_v25 }
 0x339   : > { %v1206_v31 = vsub.f32 %v1173_v59, %v1204_v27  ;;  %v1214_v32 = vsub.f32 %v1175_v14, %v1212_v28  ;;  %v1939_v33 = vsub.f32 %v1908_v3, %v1937_v26  ;;  %v1879_v28 = vmul.f32 %v3881_v9, %v3860_v60 }
 0x33b   : > { %v1220_v34 = vsel %vm1186_vm8, %v3901_v22, %v1206_v31  ;;  %v1222_v35 = vsel %vm1186_vm8, %v3904_v23, %v1214_v32  ;;  %v1949_v40 = vsel %vm1186_vm8, %v3907_v24, %v1939_v33  ;;  %v1151_v46 = vpop.permute.xlu1 %1150  ;;  %v3983_v31 = vrot.slane %v1879_v28, %v3851_v52 }
 0x33c   : > { %v1235_v37 = vsel %vm1233_vm10, 0.0, %v1220_v34  ;;  %3375 = vrcp.f32 %v1220_v34  ;;  %v1158_v47 = vmul.f32 %v3854_v55, %v1151_v46  ;;  %v1962_v49 = vsel %vm1233_vm10, 0.0, %v1949_v40 }
 0x33d   : > { %1239 = vperm.xlu0 %3329, %v1235_v37   ;;  %3377 = vrcp.f32 %v1949_v40  ;;  %v1166_v10 = vmul.f32 %v3885_v11, %v1151_v46  ;;  %v1904_v32 = vmul.f32 %v3983_v31, %v3864_v63  ;;  %v1905_v28 = vmul.f32 %v3983_v31, %v3913_v30 }
 0x33e   : > { %v1160_v50 = vsub.f32 %v3834_v39, %v1158_v47  ;;  %v3550_v30 = vmov 5  }
 0x33f   : > { %v1906_v33 = vsub.f32 %v3881_v9, %v1904_v32 }
 0x341   : > { %3332 = vset.pattern.permute.xlu0 %v3546_v51 }
 0x342   : > { %1930 = vperm.xlu0 %3332, %v1899_v41  }
 0x346   : > { %v3376_v42 = vpop.eup %3375  ;;  %3334 = vset.pattern.permute.xlu0 %v3548_v43 }
 0x347   : > { %1228 = vperm.xlu1 %3330, %v3376_v42   ;;  %v3378_v45 = vpop.eup %3377 }
 0x34b   : > { %1957 = vperm.xlu1 %3330, %v3378_v45  }
 0x34f   : > { %1966 = vperm.xlu1 %3330, %v1962_v49  }
 0x353   : > { %3331 = vset.pattern.permute.xlu1 %v3546_v51  ;;  %v3941_v51 = vadd.s32 8, %v3831_v38 }
 0x354   : > { %1197 = vperm.xlu1 %3331, %v1160_v50  }
 0x355   : > { %vm1125_vm11 = vcmp.eq.s32.totalorder %v3941_v51, %v3876_v8  ;;  %vm1516_vm0 = vcmp.eq.s32.totalorder %v3941_v51, 8  ;;  %vm1563_vm2 = vcmp.eq.s32.totalorder %v3941_v51, 9  ;;  %vm1610_vm3 = vcmp.eq.s32.totalorder %v3941_v51, 10 }
 0x356   : > { %v3957_v13 = vsel %vm1125_vm11, 1.0, %v3544_v0  ;;  %vm1657_vm4 = vcmp.eq.s32.totalorder %v3941_v51, 11  ;;  %vm1704_vm5 = vcmp.eq.s32.totalorder %v3941_v51, 12  ;;  %vm1844_vm9 = vcmp.eq.s32.totalorder %v3941_v51, 15 }
 0x357   : > { %v1168_v18 = vsub.f32 %v3957_v13, %v1166_v10 }
 0x358   : > { %3333 = vset.pattern.permute.xlu1 %v3547_v7 }
 0x3bc   : > { %v1240_v59 = vpop.permute.xlu0 %1239 }
 0x3c1   : > { %v3959_v14 = vpop.permute.xlu0 %1930 }
 0x3c2   : > { %v1938_v11 = vmul.f32 %v3907_v24, %v3959_v14 }
 0x3c4   : > { %v1940_v27 = vsub.f32 %v1899_v41, %v1938_v11 }
 0x3c6   : > { %v1229_v54 = vpop.permute.xlu1 %1228 }
 0x3c7   : > { %v1231_v56 = vmul.f32 %v1229_v54, %v1220_v34  ;;  %v1232_v57 = vmul.f32 %v1229_v54, %v1222_v35 }
 0x3c9   : > { %v1250_v55 = vrot.slane %v1231_v56, %v3936_v53  ;;  %v1258_v58 = vrot.slane %v1232_v57, %v3936_v53 }
 0x3ca   : > { %v1958_v61 = vpop.permute.xlu1 %1957 }
 0x3cb   : > { %v1251_v62 = vmul.f32 %v1250_v55, %v1240_v59  ;;  %v1259_v39 = vmul.f32 %v1258_v58, %v1240_v59  ;;  %v1960_v29 = vmul.f32 %v1958_v61, %v1949_v40  ;;  %v4000_v59 = vsub.s32 3, %v3831_v38 }
 0x3cd   : > { %v1253_v1 = vsub.f32 %v1220_v34, %v1251_v62  ;;  %v1261_v2 = vsub.f32 %v1222_v35, %v1259_v39  ;;  %v1977_v3 = vrot.slane %v1960_v29, %v3936_v53  ;;  %v1910_v34 = vsel %vm1139_vm6, %v3983_v31, %v1906_v33 }
 0x3ce   : > { %v1967_v4 = vpop.permute.xlu1 %1966  ;;  %v1920_v35 = vmul.f32 %v3895_v19, %v1910_v34  ;;  %v3549_v62 = vmov 4   ;;  %vm1751_vm6 = vcmp.eq.s32.totalorder %v3941_v51, 13 }
 0x3cf   : > { %v3946_v5 = vsel %vm1233_vm10, %v1250_v55, %v1253_v1  ;;  %v1978_v6 = vmul.f32 %v1977_v3, %v1967_v4  ;;  %v3950_v7 = vsel %vm1233_vm10, %v1258_v58, %v1261_v2 }
 0x3d0   : > { %3379 = vrcp.f32 %v3946_v5  ;;  %v1282_v24 = vsel %vm1280_vm12, 0.0, %v3946_v5  ;;  %v1944_v36 = vrot.slane %v1920_v35, %v3893_v17 }
 0x3d1   : > { %v1980_v12 = vsub.f32 %v1949_v40, %v1978_v6 }
 0x3d2   : > { %v1945_v37 = vmul.f32 %v1944_v36, %v3897_v20  ;;  %v1946_v32 = vmul.f32 %v1944_v36, %v3959_v14 }
 0x3d3   : > { %v1198_v15 = vpop.permute.xlu1 %1197  ;;  %v3963_v16 = vsel %vm1233_vm10, %v1977_v3, %v1980_v12 }
 0x3d4   : > { %v1205_v21 = vmul.f32 %v3901_v22, %v1198_v15  ;;  %v1213_v8 = vmul.f32 %v3904_v23, %v1198_v15  ;;  %3381 = vrcp.f32 %v3963_v16  ;;  %v2003_v22 = vsel %vm1280_vm12, 0.0, %v3963_v16 }
 0x3d5   : > { %v1947_v40 = vsub.f32 %v1910_v34, %v1945_v37  ;;  %v1907_v34 = vsub.f32 %v3957_v13, %v1905_v28  ;;  %v4037_v13 = vsub.s32 4, %v3831_v38 }
 0x3d6   : > { %v3970_v25 = vsub.f32 %v1168_v18, %v1213_v8  ;;  %v1207_v0 = vsub.f32 %v1160_v50, %v1205_v21 }
 0x3d7   : > { %v1951_v60 = vsel %vm1186_vm8, %v1944_v36, %v1947_v40  ;;  %v1948_v40 = vsub.f32 %v1907_v34, %v1946_v32  ;;  %vm1798_vm8 = vcmp.eq.s32.totalorder %v3941_v51, 14 }
 0x3d8   : > { %1244 = vperm.xlu1 %3333, %v1207_v0   ;;  %v1961_v41 = vmul.f32 %v1958_v61, %v1951_v60 }
 0x3da   : > { %v3380_v26 = vpop.eup %3379  ;;  %v1985_v42 = vrot.slane %v1961_v41, %v3936_v53 }
 0x3db   : > { %1275 = vperm.xlu0 %3334, %v3380_v26  }
 0x3dc   : > { %1971 = vperm.xlu1 %3333, %v1940_v27   ;;  %v1986_v45 = vmul.f32 %v1985_v42, %v1967_v4 }
 0x3de   : > { %v3382_v23 = vpop.eup %3381  ;;  %v1988_v54 = vsub.f32 %v1951_v60, %v1986_v45 }
 0x3df   : > { %2007 = vperm.xlu0 %3334, %v2003_v22  }
 0x3e0   : > { %3335 = vset.pattern.permute.xlu1 %v3548_v43 }
 0x3e1   : > { %1998 = vperm.xlu1 %3335, %v3382_v23  }
 0x3e5   : > { %1286 = vperm.xlu1 %3335, %v1282_v24  }
 0x457   : > { %v1245_v63 = vpop.permute.xlu1 %1244 }
 0x458   : > { %v1252_v9 = vmul.f32 %v1250_v55, %v1245_v63  ;;  %v1260_v46 = vmul.f32 %v1258_v58, %v1245_v63  ;;  %v1992_v55 = vsel %vm1233_vm10, %v1985_v42, %v1988_v54 }
 0x45a   : > { %v1254_v47 = vsub.f32 %v1207_v0, %v1252_v9  ;;  %v1262_v49 = vsub.f32 %v3970_v25, %v1260_v46  ;;  %v1276_v50 = vpop.permute.xlu0 %1275 }
 0x45b   : > { %v1279_v19 = vmul.f32 %v1276_v50, %v3950_v7  ;;  %v1972_v43 = vpop.permute.xlu1 %1971  ;;  %v1278_v61 = vmul.f32 %v1276_v50, %v3946_v5 }
 0x45c   : > { %v1979_v20 = vmul.f32 %v1977_v3, %v1972_v43  ;;  %v1987_v56 = vmul.f32 %v1985_v42, %v1972_v43  ;;  %1291 = vperm.xlu1 %3335, %v1254_v47  }
 0x45d   : > { %v1297_v1 = vrot.slane %v1278_v61, %v4000_v59  ;;  %v1305_v2 = vrot.slane %v1279_v19, %v4000_v59 }
 0x45e   : > { %v1981_v57 = vsub.f32 %v1940_v27, %v1979_v20  ;;  %v2008_v6 = vpop.permute.xlu0 %2007  ;;  %v1989_v63 = vsub.f32 %v1948_v40, %v1987_v56 }
 0x460   : > { %2012 = vperm.xlu0 %3334, %v1981_v57   ;;  %v1999_v58 = vpop.permute.xlu1 %1998  ;;  %3336 = vset.pattern.permute.xlu1 %v3549_v62 }
 0x461   : > { %v2001_v39 = vmul.f32 %v1999_v58, %v3963_v16  ;;  %v2002_v29 = vmul.f32 %v1999_v58, %v1992_v55 }
 0x463   : > { %v2018_v3 = vrot.slane %v2001_v39, %v4000_v59  ;;  %v2026_v4 = vrot.slane %v2002_v29, %v4000_v59 }
 0x464   : > { %v1287_v10 = vpop.permute.xlu1 %1286  ;;  %3337 = vset.pattern.permute.xlu0 %v3549_v62 }
 0x465   : > { %v2019_v12 = vmul.f32 %v2018_v3, %v2008_v6  ;;  %v2027_v15 = vmul.f32 %v2026_v4, %v2008_v6  ;;  %v1298_v18 = vmul.f32 %v1297_v1, %v1287_v10  ;;  %v1306_v21 = vmul.f32 %v1305_v2, %v1287_v10 }
 0x467   : > { %v2021_v8 = vsub.f32 %v3963_v16, %v2019_v12  ;;  %v2029_v11 = vsub.f32 %v1992_v55, %v2027_v15  ;;  %v1300_v25 = vsub.f32 %v3946_v5, %v1298_v18  ;;  %v1308_v0 = vsub.f32 %v3950_v7, %v1306_v21 }
 0x469   : > { %v2031_v26 = vsel %vm1280_vm12, %v2018_v3, %v2021_v8  ;;  %v1314_v27 = vsel %vm1280_vm12, %v1297_v1, %v1300_v25  ;;  %v1316_v22 = vsel %vm1280_vm12, %v1305_v2, %v1308_v0  ;;  %v4021_v23 = vsel %vm1280_vm12, %v2026_v4, %v2029_v11 }
 0x46a   : > { %3383 = vrcp.f32 %v2031_v26  ;;  %v1329_v5 = vsel %vm1327_vm13, 0.0, %v1314_v27  ;;  %v2044_v7 = vsel %vm1327_vm13, 0.0, %v2031_v26 }
 0x46b   : > { %3385 = vrcp.f32 %v1314_v27 }
 0x474   : > { %v3384_v16 = vpop.eup %3383 }
 0x475   : > { %v3386_v24 = vpop.eup %3385  ;;  %2039 = vperm.xlu0 %3337, %v3384_v16  }
 0x476   : > { %1322 = vperm.xlu1 %3336, %v3386_v24   ;;  %v3551_v24 = vmov 6  }
 0x47a   : > { %1333 = vperm.xlu1 %3336, %v1329_v5  }
 0x47e   : > { %2048 = vperm.xlu1 %3336, %v2044_v7  }
 0x4db   : > { %v1292_v33 = vpop.permute.xlu1 %1291 }
 0x4dc   : > { %v1299_v35 = vmul.f32 %v1297_v1, %v1292_v33  ;;  %v1307_v37 = vmul.f32 %v1305_v2, %v1292_v33  ;;  %v4059_v33 = vsub.s32 5, %v3831_v38 }
 0x4de   : > { %v1301_v60 = vsub.f32 %v1254_v47, %v1299_v35  ;;  %v4032_v41 = vsub.f32 %v1262_v49, %v1307_v37 }
 0x4df   : > { %v2013_v42 = vpop.permute.xlu0 %2012 }
 0x4e0   : > { %v2020_v45 = vmul.f32 %v2018_v3, %v2013_v42  ;;  %v2028_v9 = vmul.f32 %v2026_v4, %v2013_v42  ;;  %1338 = vperm.xlu0 %3337, %v1301_v60  }
 0x4e2   : > { %v2022_v46 = vsub.f32 %v1981_v57, %v2020_v45  ;;  %v4034_v50 = vsub.f32 %v1989_v63, %v2028_v9 }
 0x4e4   : > { %2053 = vperm.xlu1 %3336, %v2022_v46   ;;  %3338 = vset.pattern.permute.xlu0 %v3550_v30 }
 0x4e8   : > { %3339 = vset.pattern.permute.xlu1 %v3550_v30 }
 0x4f4   : > { %v2040_v31 = vpop.permute.xlu0 %2039 }
 0x4f5   : > { %v1323_v14 = vpop.permute.xlu1 %1322  ;;  %v2042_v43 = vmul.f32 %v2040_v31, %v2031_v26  ;;  %v2043_v12 = vmul.f32 %v2040_v31, %v4021_v23 }
 0x4f6   : > { %v1325_v36 = vmul.f32 %v1323_v14, %v1314_v27  ;;  %v1326_v47 = vmul.f32 %v1323_v14, %v1316_v22 }
 0x4f7   : > { %v2059_v57 = vrot.slane %v2042_v43, %v4037_v13  ;;  %v2067_v8 = vrot.slane %v2043_v12, %v4037_v13  ;;  %v3552_v12 = vmov 7  }
 0x4f8   : > { %v1344_v49 = vrot.slane %v1325_v36, %v4037_v13  ;;  %v1352_v19 = vrot.slane %v1326_v47, %v4037_v13 }
 0x4f9   : > { %v1334_v54 = vpop.permute.xlu1 %1333 }
 0x4fa   : > { %v1345_v20 = vmul.f32 %v1344_v49, %v1334_v54  ;;  %v1353_v56 = vmul.f32 %v1352_v19, %v1334_v54 }
 0x4fc   : > { %v1347_v61 = vsub.f32 %v1314_v27, %v1345_v20  ;;  %v1355_v55 = vsub.f32 %v1316_v22, %v1353_v56 }
 0x4fd   : > { %v2049_v58 = vpop.permute.xlu1 %2048 }
 0x4fe   : > { %v1361_v62 = vsel %vm1327_vm13, %v1344_v49, %v1347_v61  ;;  %v2060_v39 = vmul.f32 %v2059_v57, %v2049_v58  ;;  %v1363_v29 = vsel %vm1327_vm13, %v1352_v19, %v1355_v55  ;;  %v2068_v5 = vmul.f32 %v2067_v8, %v2049_v58 }
 0x4ff   : > { %3387 = vrcp.f32 %v1361_v62  ;;  %v1376_v10 = vsel %vm1374_vm14, 0.0, %v1361_v62 }
 0x500   : > { %v2062_v1 = vsub.f32 %v2031_v26, %v2060_v39  ;;  %v2070_v7 = vsub.f32 %v4021_v23, %v2068_v5 }
 0x502   : > { %v2072_v2 = vsel %vm1327_vm13, %v2059_v57, %v2062_v1  ;;  %v2074_v35 = vsel %vm1327_vm13, %v2067_v8, %v2070_v7 }
 0x503   : > { %3389 = vrcp.f32 %v2072_v2  ;;  %v2085_v6 = vsel %vm1374_vm14, 0.0, %v2072_v2 }
 0x509   : > { %v3388_v3 = vpop.eup %3387 }
 0x50a   : > { %1369 = vperm.xlu0 %3338, %v3388_v3  }
 0x50d   : > { %v3390_v4 = vpop.eup %3389 }
 0x50e   : > { %2089 = vperm.xlu0 %3338, %v2085_v6   ;;  %2080 = vperm.xlu1 %3339, %v3390_v4  }
 0x512   : > { %1380 = vperm.xlu1 %3339, %v1376_v10  }
 0x55f   : > { %v1339_v15 = vpop.permute.xlu0 %1338 }
 0x560   : > { %v1346_v18 = vmul.f32 %v1344_v49, %v1339_v15  ;;  %v1354_v21 = vmul.f32 %v1352_v19, %v1339_v15  ;;  %v4087_v15 = vsub.s32 6, %v3831_v38 }
 0x562   : > { %v1348_v11 = vsub.f32 %v1301_v60, %v1346_v18  ;;  %v1356_v25 = vsub.f32 %v4032_v41, %v1354_v21 }
 0x563   : > { %v2054_v0 = vpop.permute.xlu1 %2053 }
 0x564   : > { %v2061_v26 = vmul.f32 %v2059_v57, %v2054_v0  ;;  %v2069_v27 = vmul.f32 %v2067_v8, %v2054_v0  ;;  %1385 = vperm.xlu1 %3339, %v1348_v11  }
 0x566   : > { %v2063_v22 = vsub.f32 %v2022_v46, %v2061_v26  ;;  %v2071_v16 = vsub.f32 %v4034_v50, %v2069_v27 }
 0x568   : > { %2094 = vperm.xlu0 %3338, %v2063_v22   ;;  %3340 = vset.pattern.permute.xlu1 %v3551_v24 }
 0x56c   : > { %3341 = vset.pattern.permute.xlu0 %v3551_v24 }
 0x589   : > { %v1370_v28 = vpop.permute.xlu0 %1369 }
 0x58a   : > { %v1373_v32 = vmul.f32 %v1370_v28, %v1363_v29  ;;  %v1372_v34 = vmul.f32 %v1370_v28, %v1361_v62 }
 0x58c   : > { %v1391_v41 = vrot.slane %v1372_v34, %v4059_v33  ;;  %v1399_v42 = vrot.slane %v1373_v32, %v4059_v33 }
 0x58d   : > { %v2081_v37 = vpop.permute.xlu1 %2080  ;;  %v2090_v45 = vpop.permute.xlu0 %2089 }
 0x58e   : > { %v2083_v40 = vmul.f32 %v2081_v37, %v2072_v2  ;;  %v2084_v60 = vmul.f32 %v2081_v37, %v2074_v35 }
 0x590   : > { %v2100_v63 = vrot.slane %v2083_v40, %v4059_v33  ;;  %v2108_v23 = vrot.slane %v2084_v60, %v4059_v33 }
 0x591   : > { %v1381_v9 = vpop.permute.xlu1 %1380 }
 0x592   : > { %v2101_v46 = vmul.f32 %v2100_v63, %v2090_v45  ;;  %v2109_v50 = vmul.f32 %v2108_v23, %v2090_v45  ;;  %v1392_v30 = vmul.f32 %v1391_v41, %v1381_v9  ;;  %v1400_v14 = vmul.f32 %v1399_v42, %v1381_v9 }
 0x594   : > { %v2103_v31 = vsub.f32 %v2072_v2, %v2101_v46  ;;  %v2111_v36 = vsub.f32 %v2074_v35, %v2109_v50  ;;  %v1394_v47 = vsub.f32 %v1361_v62, %v1392_v30  ;;  %v1402_v49 = vsub.f32 %v1363_v29, %v1400_v14 }
 0x596   : > { %v2113_v19 = vsel %vm1374_vm14, %v2100_v63, %v2103_v31  ;;  %v1408_v43 = vsel %vm1374_vm14, %v1391_v41, %v1394_v47  ;;  %v1410_v54 = vsel %vm1374_vm14, %v1399_v42, %v1402_v49  ;;  %v2115_v20 = vsel %vm1374_vm14, %v2108_v23, %v2111_v36 }
 0x597   : > { %3391 = vrcp.f32 %v2113_v19  ;;  %v1423_v61 = vsel %vm1421_vm15, 0.0, %v1408_v43  ;;  %v2126_v55 = vsel %vm1421_vm15, 0.0, %v2113_v19 }
 0x598   : > { %3393 = vrcp.f32 %v1408_v43 }
 0x5a1   : > { %v3392_v56 = vpop.eup %3391 }
 0x5a2   : > { %v3394_v57 = vpop.eup %3393  ;;  %2121 = vperm.xlu0 %3341, %v3392_v56  }
 0x5a3   : > { %1416 = vperm.xlu1 %3340, %v3394_v57  }
 0x5a7   : > { %1427 = vperm.xlu1 %3340, %v1423_v61  }
 0x5ab   : > { %2130 = vperm.xlu1 %3340, %v2126_v55   ;;  %v4118_v55 = vsub.s32 7, %v3831_v38 }
 0x5e3   : > { %v1386_v58 = vpop.permute.xlu1 %1385 }
 0x5e4   : > { %v1393_v62 = vmul.f32 %v1391_v41, %v1386_v58  ;;  %v1401_v39 = vmul.f32 %v1399_v42, %v1386_v58 }
 0x5e6   : > { %v1395_v29 = vsub.f32 %v1348_v11, %v1393_v62  ;;  %v4080_v1 = vsub.f32 %v1356_v25, %v1401_v39 }
 0x5e7   : > { %v2095_v2 = vpop.permute.xlu0 %2094 }
 0x5e8   : > { %v2102_v3 = vmul.f32 %v2100_v63, %v2095_v2  ;;  %v2110_v4 = vmul.f32 %v2108_v23, %v2095_v2  ;;  %1432 = vperm.xlu0 %3341, %v1395_v29  }
 0x5ea   : > { %v2104_v6 = vsub.f32 %v2063_v22, %v2102_v3  ;;  %v4082_v10 = vsub.f32 %v2071_v16, %v2110_v4 }
 0x5ec   : > { %2135 = vperm.xlu1 %3340, %v2104_v6   ;;  %3342 = vset.pattern.permute.xlu0 %v3552_v12 }
 0x5f0   : > { %3343 = vset.pattern.permute.xlu1 %v3552_v12 }
 0x621   : > { %v2122_v21 = vpop.permute.xlu0 %2121 }
 0x622   : > { %v1417_v18 = vpop.permute.xlu1 %1416  ;;  %v2124_v26 = vmul.f32 %v2122_v21, %v2113_v19  ;;  %v2125_v27 = vmul.f32 %v2122_v21, %v2115_v20 }
 0x623   : > { %v1419_v8 = vmul.f32 %v1417_v18, %v1408_v43  ;;  %v1420_v11 = vmul.f32 %v1417_v18, %v1410_v54 }
 0x624   : > { %v2141_v5 = vrot.slane %v2124_v26, %v4087_v15  ;;  %v2149_v7 = vrot.slane %v2125_v27, %v4087_v15 }
 0x625   : > { %v1438_v25 = vrot.slane %v1419_v8, %v4087_v15  ;;  %v1446_v0 = vrot.slane %v1420_v11, %v4087_v15 }
 0x626   : > { %v1428_v22 = vpop.permute.xlu1 %1427 }
 0x627   : > { %v1439_v16 = vmul.f32 %v1438_v25, %v1428_v22  ;;  %v1447_v24 = vmul.f32 %v1446_v0, %v1428_v22 }
 0x629   : > { %v1441_v28 = vsub.f32 %v1408_v43, %v1439_v16  ;;  %v1449_v32 = vsub.f32 %v1410_v54, %v1447_v24  ;;  %v3553_v54 = vmov 8  }
 0x62a   : > { %v2131_v34 = vpop.permute.xlu1 %2130 }
 0x62b   : > { %v4095_v35 = vsel %vm1421_vm15, %v1438_v25, %v1441_v28  ;;  %v2142_v37 = vmul.f32 %v2141_v5, %v2131_v34  ;;  %v2150_v40 = vmul.f32 %v2149_v7, %v2131_v34  ;;  %v4099_v60 = vsel %vm1421_vm15, %v1446_v0, %v1449_v32 }
 0x62c   : > { %3395 = vrcp.f32 %v4095_v35  ;;  %v1470_v24 = vsel %vm1468_vm1, 0.0, %v4095_v35 }
 0x62d   : > { %v2144_v41 = vsub.f32 %v2113_v19, %v2142_v37  ;;  %v2152_v42 = vsub.f32 %v2115_v20, %v2150_v40 }
 0x62f   : > { %v4104_v63 = vsel %vm1421_vm15, %v2141_v5, %v2144_v41  ;;  %v4108_v23 = vsel %vm1421_vm15, %v2149_v7, %v2152_v42 }
 0x630   : > { %3397 = vrcp.f32 %v4104_v63 }
 0x636   : > { %v3396_v45 = vpop.eup %3395 }
 0x637   : > { %1463 = vperm.xlu0 %3342, %v3396_v45  }
 0x63a   : > { %v3398_v9 = vpop.eup %3397 }
 0x63b   : > { %2162 = vperm.xlu1 %3343, %v3398_v9  }
 0x667   : > { %v1433_v46 = vpop.permute.xlu0 %1432 }
 0x668   : > { %v1440_v50 = vmul.f32 %v1438_v25, %v1433_v46  ;;  %v1448_v30 = vmul.f32 %v1446_v0, %v1433_v46 }
 0x66a   : > { %v1442_v14 = vsub.f32 %v1395_v29, %v1440_v50  ;;  %v1450_v31 = vsub.f32 %v4080_v1, %v1448_v30 }
 0x66b   : > { %v2136_v36 = vpop.permute.xlu1 %2135 }
 0x66c   : > { %v2143_v47 = vmul.f32 %v2141_v5, %v2136_v36  ;;  %v2151_v49 = vmul.f32 %v2149_v7, %v2136_v36  ;;  %1479 = vperm.xlu1 %3343, %v1442_v14   ;;  %v2167_v5 = vsel %vm1468_vm1, 0.0, %v4104_v63  ;;  %v3554_v7 = vmov 9  }
 0x66e   : > { %v2145_v19 = vsub.f32 %v2104_v6, %v2143_v47  ;;  %v2153_v43 = vsub.f32 %v4082_v10, %v2151_v49 }
 0x670   : > { %2176 = vperm.xlu0 %3342, %v2145_v19   ;;  %3344 = vset.pattern.permute.xlu1 %v3553_v54 }
 0x674   : > { %3345 = vset.pattern.permute.xlu0 %v3553_v54 }
 0x6b6   : > { %v1464_v20 = vpop.permute.xlu0 %1463 }
 0x6b7   : > { %v1467_v56 = vmul.f32 %v1464_v20, %v4099_v60  ;;  %v1466_v58 = vmul.f32 %v1464_v20, %v4095_v35 }
 0x6b9   : > { %v4122_v62 = vrot.slane %v1466_v58, %v4118_v55  ;;  %v4125_v39 = vrot.slane %v1467_v56, %v4118_v55 }
 0x6ba   : > { %v2163_v57 = vpop.permute.xlu1 %2162 }
 0x6bb   : > { %v2166_v61 = vmul.f32 %v2163_v57, %v4108_v23  ;;  %v2165_v29 = vmul.f32 %v2163_v57, %v4104_v63 }
 0x6bd   : > { %v4131_v4 = vrot.slane %v2165_v29, %v4118_v55  ;;  %v4134_v6 = vrot.slane %v2166_v61, %v4118_v55 }
 0x6eb   : > { %v1480_v1 = vpop.permute.xlu1 %1479 }
 0x6ec   : > { %v1487_v2 = vmul.f32 %v4122_v62, %v1480_v1  ;;  %v1495_v3 = vmul.f32 %v4125_v39, %v1480_v1 }
 0x6ee   : > { %v1489_v10 = vsub.f32 %v1442_v14, %v1487_v2  ;;  %v1497_v18 = vsub.f32 %v1450_v31, %v1495_v3 }
 0x6ef   : > { %v2177_v21 = vpop.permute.xlu0 %2176 }
 0x6f0   : > { %3399 = vrcp.f32 %v1489_v10  ;;  %v2184_v8 = vmul.f32 %v4131_v4, %v2177_v21  ;;  %v2192_v11 = vmul.f32 %v4134_v6, %v2177_v21  ;;  %v1518_v22 = vsel %vm1516_vm0, 0.0, %v1489_v10 }
 0x6f2   : > { %v2186_v25 = vsub.f32 %v2145_v19, %v2184_v8  ;;  %v2194_v0 = vsub.f32 %v2153_v43, %v2192_v11 }
 0x6f4   : > { %3401 = vrcp.f32 %v2186_v25  ;;  %v2209_v16 = vsel %vm1516_vm0, 0.0, %v2186_v25 }
 0x6fa   : > { %v3400_v26 = vpop.eup %3399 }
 0x6fb   : > { %1510 = vperm.xlu1 %3344, %v3400_v26   ;;  %v3555_v26 = vmov 10  }
 0x6fe   : > { %v3402_v27 = vpop.eup %3401 }
 0x6ff   : > { %1526 = vperm.xlu1 %3344, %v1518_v22   ;;  %2203 = vperm.xlu0 %3345, %v3402_v27  }
 0x703   : > { %2217 = vperm.xlu1 %3344, %v2209_v16   ;;  %3346 = vset.pattern.permute.xlu0 %v3552_v12 }
 0x704   : > { %1474 = vperm.xlu0 %3346, %v1470_v24  }
 0x707   : > { %3347 = vset.pattern.permute.xlu1 %v3552_v12 }
 0x708   : > { %2171 = vperm.xlu1 %3347, %v2167_v5   ;;  %3349 = vset.pattern.permute.xlu0 %v3554_v7 }
 0x70c   : > { %3348 = vset.pattern.permute.xlu1 %v3554_v7 }
 0x77a   : > { %v1511_v28 = vpop.permute.xlu1 %1510 }
 0x77b   : > { %v1513_v32 = vmul.f32 %v1511_v28, %v1489_v10  ;;  %v1514_v34 = vmul.f32 %v1511_v28, %v1497_v18 }
 0x77d   : > { %v4155_v37 = vrot.slane %v1513_v32, %v3851_v52  ;;  %v4158_v40 = vrot.slane %v1514_v34, %v3851_v52 }
 0x77e   : > { %v1527_v12 = vpop.permute.xlu1 %1526  ;;  %v2204_v41 = vpop.permute.xlu0 %2203 }
 0x77f   : > { %v1534_v42 = vmul.f32 %v4155_v37, %v1527_v12  ;;  %v1542_v45 = vmul.f32 %v4158_v40, %v1527_v12  ;;  %v2206_v9 = vmul.f32 %v2204_v41, %v2186_v25  ;;  %v2207_v46 = vmul.f32 %v2204_v41, %v2194_v0 }
 0x781   : > { %v1536_v50 = vsub.f32 %v1489_v10, %v1534_v42  ;;  %v1544_v30 = vsub.f32 %v1497_v18, %v1542_v45  ;;  %v4163_v14 = vrot.slane %v2206_v9, %v3851_v52  ;;  %v4166_v31 = vrot.slane %v2207_v46, %v3851_v52 }
 0x782   : > { %v2218_v36 = vpop.permute.xlu1 %2217 }
 0x783   : > { %v1550_v47 = vsel %vm1516_vm0, %v4155_v37, %v1536_v50  ;;  %v2225_v49 = vmul.f32 %v4163_v14, %v2218_v36  ;;  %v2233_v19 = vmul.f32 %v4166_v31, %v2218_v36  ;;  %v1475_v43 = vpop.permute.xlu0 %1474  ;;  %v1552_v20 = vsel %vm1516_vm0, %v4158_v40, %v1544_v30 }
 0x784   : > { %3403 = vrcp.f32 %v1550_v47  ;;  %v1494_v56 = vmul.f32 %v4125_v39, %v1475_v43  ;;  %v1486_v21 = vmul.f32 %v4122_v62, %v1475_v43  ;;  %v1565_v11 = vsel %vm1563_vm2, 0.0, %v1550_v47 }
 0x785   : > { %v2227_v57 = vsub.f32 %v2186_v25, %v2225_v49  ;;  %v2235_v52 = vsub.f32 %v2194_v0, %v2233_v19 }
 0x786   : > { %v1496_v61 = vsub.f32 %v4099_v60, %v1494_v56 }
 0x787   : > { %v2237_v58 = vsel %vm1516_vm0, %v4163_v14, %v2227_v57  ;;  %v2172_v29 = vpop.permute.xlu1 %2171  ;;  %v2239_v1 = vsel %vm1516_vm0, %v4166_v31, %v2235_v52 }
 0x788   : > { %3405 = vrcp.f32 %v2237_v58  ;;  %v2191_v2 = vmul.f32 %v4134_v6, %v2172_v29  ;;  %v4188_v3 = vsel %vm1468_vm1, %v4125_v39, %v1496_v61  ;;  %v1488_v39 = vsub.f32 %v4095_v35, %v1486_v21 }
 0x789   : > { %v2183_v25 = vmul.f32 %v4131_v4, %v2172_v29 }
 0x78a   : > { %v2193_v10 = vsub.f32 %v4108_v23, %v2191_v2  ;;  %v2250_v23 = vsel %vm1563_vm2, 0.0, %v2237_v58  ;;  %v1502_v0 = vsel %vm1468_vm1, %v4122_v62, %v1488_v39 }
 0x78c   : > { %v4194_v60 = vsel %vm1468_vm1, %v4134_v6, %v2193_v10  ;;  %v2185_v6 = vsub.f32 %v4104_v63, %v2183_v25 }
 0x78e   : > { %v3404_v18 = vpop.eup %3403  ;;  %v2195_v35 = vsel %vm1468_vm1, %v4131_v4, %v2185_v6 }
 0x78f   : > { %1557 = vperm.xlu1 %3348, %v3404_v18  }
 0x792   : > { %v3406_v8 = vpop.eup %3405 }
 0x793   : > { %1573 = vperm.xlu1 %3348, %v1565_v11   ;;  %2244 = vperm.xlu0 %3349, %v3406_v8  }
 0x797   : > { %2258 = vperm.xlu1 %3348, %v2250_v23   ;;  %3350 = vset.pattern.permute.xlu0 %v3553_v54 }
 0x798   : > { %1521 = vperm.xlu0 %3350, %v1502_v0  }
 0x79b   : > { %3351 = vset.pattern.permute.xlu1 %v3553_v54 }
 0x79c   : > { %2212 = vperm.xlu1 %3351, %v2195_v35   ;;  %3353 = vset.pattern.permute.xlu0 %v3555_v26 }
 0x7a0   : > { %3352 = vset.pattern.permute.xlu1 %v3555_v26 }
 0x80e   : > { %v1558_v27 = vpop.permute.xlu1 %1557 }
 0x80f   : > { %v1560_v63 = vmul.f32 %v1558_v27, %v1550_v47  ;;  %v1561_v22 = vmul.f32 %v1558_v27, %v1552_v20 }
 0x811   : > { %v4214_v16 = vrot.slane %v1560_v63, %v3893_v17  ;;  %v4217_v24 = vrot.slane %v1561_v22, %v3893_v17 }
 0x812   : > { %v1574_v62 = vpop.permute.xlu1 %1573  ;;  %v2245_v5 = vpop.permute.xlu0 %2244 }
 0x813   : > { %v1581_v54 = vmul.f32 %v4214_v16, %v1574_v62  ;;  %v1589_v38 = vmul.f32 %v4217_v24, %v1574_v62  ;;  %v2247_v4 = vmul.f32 %v2245_v5, %v2237_v58  ;;  %v2248_v28 = vmul.f32 %v2245_v5, %v2239_v1 }
 0x815   : > { %v1583_v32 = vsub.f32 %v1550_v47, %v1581_v54  ;;  %v1591_v34 = vsub.f32 %v1552_v20, %v1589_v38  ;;  %v4222_v12 = vrot.slane %v2247_v4, %v3893_v17  ;;  %v4225_v41 = vrot.slane %v2248_v28, %v3893_v17 }
 0x816   : > { %v2259_v42 = vpop.permute.xlu1 %2258 }
 0x817   : > { %v1597_v45 = vsel %vm1563_vm2, %v4214_v16, %v1583_v32  ;;  %v2266_v9 = vmul.f32 %v4222_v12, %v2259_v42  ;;  %v2274_v46 = vmul.f32 %v4225_v41, %v2259_v42  ;;  %v1522_v50 = vpop.permute.xlu0 %1521  ;;  %v1599_v30 = vsel %vm1563_vm2, %v4217_v24, %v1591_v34 }
 0x818   : > { %3407 = vrcp.f32 %v1597_v45  ;;  %v1541_v36 = vmul.f32 %v4158_v40, %v1522_v50  ;;  %v1533_v61 = vmul.f32 %v4155_v37, %v1522_v50  ;;  %v3556_v37 = vmov 11  }
 0x819   : > { %v2268_v47 = vsub.f32 %v2237_v58, %v2266_v9  ;;  %v2276_v17 = vsub.f32 %v2239_v1, %v2274_v46  ;;  %v1612_v58 = vsel %vm1610_vm3, 0.0, %v1597_v45 }
 0x81a   : > { %v1543_v49 = vsub.f32 %v4188_v3, %v1541_v36  ;;  %v1535_v29 = vsub.f32 %v1502_v0, %v1533_v61 }
 0x81b   : > { %v2278_v19 = vsel %vm1563_vm2, %v4222_v12, %v2268_v47  ;;  %v2213_v43 = vpop.permute.xlu1 %2212  ;;  %v2280_v20 = vsel %vm1563_vm2, %v4225_v41, %v2276_v17 }
 0x81c   : > { %3409 = vrcp.f32 %v2278_v19  ;;  %v2232_v56 = vmul.f32 %v4166_v31, %v2213_v43  ;;  %v2224_v1 = vmul.f32 %v4163_v14, %v2213_v43  ;;  %v2291_v31 = vsel %vm1610_vm3, 0.0, %v2278_v19 }
 0x81e   : > { %v2234_v57 = vsub.f32 %v4194_v60, %v2232_v56  ;;  %v2226_v2 = vsub.f32 %v2195_v35, %v2224_v1 }
 0x822   : > { %v3408_v52 = vpop.eup %3407 }
 0x823   : > { %1604 = vperm.xlu1 %3352, %v3408_v52  }
 0x826   : > { %v3410_v40 = vpop.eup %3409 }
 0x827   : > { %1620 = vperm.xlu1 %3352, %v1612_v58   ;;  %2285 = vperm.xlu0 %3353, %v3410_v40  }
 0x82b   : > { %2299 = vperm.xlu1 %3352, %v2291_v31   ;;  %3354 = vset.pattern.permute.xlu0 %v3554_v7 }
 0x82c   : > { %1568 = vperm.xlu0 %3354, %v1535_v29  }
 0x82f   : > { %3355 = vset.pattern.permute.xlu1 %v3554_v7 }
 0x830   : > { %2253 = vperm.xlu1 %3355, %v2226_v2   ;;  %3357 = vset.pattern.permute.xlu0 %v3556_v37 }
 0x834   : > { %3356 = vset.pattern.permute.xlu1 %v3555_v26 }
 0x8a2   : > { %v1605_v3 = vpop.permute.xlu1 %1604 }
 0x8a3   : > { %v1607_v10 = vmul.f32 %v1605_v3, %v1597_v45  ;;  %v1608_v60 = vmul.f32 %v1605_v3, %v1599_v30 }
 0x8a5   : > { %v1626_v18 = vrot.slane %v1607_v10, %v3936_v53  ;;  %v1634_v14 = vrot.slane %v1608_v60, %v3936_v53 }
 0x8a6   : > { %v1621_v21 = vpop.permute.xlu1 %1620  ;;  %v2286_v8 = vpop.permute.xlu0 %2285 }
 0x8a7   : > { %v1628_v11 = vmul.f32 %v1626_v18, %v1621_v21  ;;  %v1636_v39 = vmul.f32 %v1634_v14, %v1621_v21  ;;  %v2288_v25 = vmul.f32 %v2286_v8, %v2278_v19  ;;  %v2289_v23 = vmul.f32 %v2286_v8, %v2280_v20 }
 0x8a9   : > { %v1630_v6 = vsub.f32 %v1597_v45, %v1628_v11  ;;  %v1638_v0 = vsub.f32 %v1599_v30, %v1636_v39  ;;  %v2305_v7 = vrot.slane %v2288_v25, %v3936_v53  ;;  %v2313_v35 = vrot.slane %v2289_v23, %v3936_v53 }
 0x8aa   : > { %v2300_v26 = vpop.permute.xlu1 %2299 }
 0x8ab   : > { %v4260_v27 = vsel %vm1610_vm3, %v1626_v18, %v1630_v6  ;;  %v2307_v63 = vmul.f32 %v2305_v7, %v2300_v26  ;;  %v2315_v22 = vmul.f32 %v2313_v35, %v2300_v26  ;;  %v1569_v62 = vpop.permute.xlu0 %1568  ;;  %v4264_v5 = vsel %vm1610_vm3, %v1634_v14, %v1638_v0 }
 0x8ac   : > { %3411 = vrcp.f32 %v4260_v27  ;;  %v1580_v54 = vmul.f32 %v4214_v16, %v1569_v62  ;;  %v1588_v38 = vmul.f32 %v4217_v24, %v1569_v62  ;;  %v1659_v36 = vsel %vm1657_vm4, 0.0, %v4260_v27 }
 0x8ad   : > { %v2309_v4 = vsub.f32 %v2278_v19, %v2307_v63  ;;  %v2317_v53 = vsub.f32 %v2280_v20, %v2315_v22 }
 0x8ae   : > { %v1582_v28 = vsub.f32 %v1535_v29, %v1580_v54  ;;  %v4269_v32 = vsub.f32 %v1543_v49, %v1588_v38  ;;  %v3557_v29 = vmov 12  }
 0x8af   : > { %v2319_v34 = vsel %vm1610_vm3, %v2305_v7, %v2309_v4  ;;  %v2254_v42 = vpop.permute.xlu1 %2253  ;;  %v2321_v45 = vsel %vm1610_vm3, %v2313_v35, %v2317_v53 }
 0x8b0   : > { %3413 = vrcp.f32 %v2319_v34  ;;  %v2265_v9 = vmul.f32 %v4222_v12, %v2254_v42  ;;  %v2273_v46 = vmul.f32 %v4225_v41, %v2254_v42  ;;  %1615 = vperm.xlu1 %3356, %v1582_v28   ;;  %v2332_v12 = vsel %vm1657_vm4, 0.0, %v2319_v34 }
 0x8b2   : > { %v2267_v16 = vsub.f32 %v2226_v2, %v2265_v9  ;;  %v4277_v24 = vsub.f32 %v2234_v57, %v2273_v46  ;;  %v3558_v9 = vmov 13  }
 0x8b4   : > { %2294 = vperm.xlu1 %3356, %v2267_v16  }
 0x8b6   : > { %v3412_v50 = vpop.eup %3411 }
 0x8b7   : > { %1651 = vperm.xlu0 %3357, %v3412_v50  }
 0x8b8   : > { %3358 = vset.pattern.permute.xlu1 %v3556_v37 }
 0x8ba   : > { %v3414_v30 = vpop.eup %3413 }
 0x8bb   : > { %1667 = vperm.xlu0 %3357, %v1659_v36   ;;  %2326 = vperm.xlu1 %3358, %v3414_v30  }
 0x8bf   : > { %2340 = vperm.xlu1 %3358, %v2332_v12  }
 0x92f   : > { %v1616_v41 = vpop.permute.xlu1 %1615 }
 0x930   : > { %v1627_v47 = vmul.f32 %v1626_v18, %v1616_v41  ;;  %v1635_v17 = vmul.f32 %v1634_v14, %v1616_v41 }
 0x932   : > { %v1629_v49 = vsub.f32 %v1582_v28, %v1627_v47  ;;  %v1637_v19 = vsub.f32 %v4269_v32, %v1635_v17 }
 0x933   : > { %v2295_v43 = vpop.permute.xlu1 %2294 }
 0x934   : > { %v2306_v20 = vmul.f32 %v2305_v7, %v2295_v43  ;;  %v2314_v56 = vmul.f32 %v2313_v35, %v2295_v43  ;;  %1662 = vperm.xlu0 %3357, %v1629_v49  }
 0x936   : > { %v2308_v57 = vsub.f32 %v2267_v16, %v2306_v20  ;;  %v2316_v52 = vsub.f32 %v4277_v24, %v2314_v56  ;;  %v1652_v40 = vpop.permute.xlu0 %1651 }
 0x937   : > { %v1654_v61 = vmul.f32 %v1652_v40, %v4260_v27  ;;  %v1655_v58 = vmul.f32 %v1652_v40, %v4264_v5 }
 0x938   : > { %2335 = vperm.xlu1 %3358, %v2308_v57   ;;  %3359 = vset.pattern.permute.xlu0 %v3557_v29 }
 0x939   : > { %v1673_v1 = vrot.slane %v1654_v61, %v4000_v59  ;;  %v1681_v31 = vrot.slane %v1655_v58, %v4000_v59 }
 0x93a   : > { %v2327_v2 = vpop.permute.xlu1 %2326  ;;  %v1668_v37 = vpop.permute.xlu0 %1667 }
 0x93b   : > { %v2329_v3 = vmul.f32 %v2327_v2, %v2319_v34  ;;  %v2330_v10 = vmul.f32 %v2327_v2, %v2321_v45  ;;  %v1675_v60 = vmul.f32 %v1673_v1, %v1668_v37  ;;  %v1683_v18 = vmul.f32 %v1681_v31, %v1668_v37 }
 0x93c   : > { %3360 = vset.pattern.permute.xlu1 %v3557_v29 }
 0x93d   : > { %v2346_v14 = vrot.slane %v2329_v3, %v4000_v59  ;;  %v2354_v21 = vrot.slane %v2330_v10, %v4000_v59  ;;  %v1677_v8 = vsub.f32 %v4260_v27, %v1675_v60  ;;  %v1685_v11 = vsub.f32 %v4264_v5, %v1683_v18 }
 0x93e   : > { %v2341_v39 = vpop.permute.xlu1 %2340 }
 0x93f   : > { %v1691_v25 = vsel %vm1657_vm4, %v1673_v1, %v1677_v8  ;;  %v2348_v23 = vmul.f32 %v2346_v14, %v2341_v39  ;;  %v2356_v6 = vmul.f32 %v2354_v21, %v2341_v39  ;;  %v1693_v0 = vsel %vm1657_vm4, %v1681_v31, %v1685_v11 }
 0x940   : > { %3415 = vrcp.f32 %v1691_v25  ;;  %v1706_v62 = vsel %vm1704_vm5, 0.0, %v1691_v25 }
 0x941   : > { %v2350_v7 = vsub.f32 %v2319_v34, %v2348_v23  ;;  %v2358_v35 = vsub.f32 %v2321_v45, %v2356_v6 }
 0x943   : > { %v2360_v26 = vsel %vm1657_vm4, %v2346_v14, %v2350_v7  ;;  %v2362_v59 = vsel %vm1657_vm4, %v2354_v21, %v2358_v35 }
 0x944   : > { %3417 = vrcp.f32 %v2360_v26  ;;  %v2373_v22 = vsel %vm1704_vm5, 0.0, %v2360_v26 }
 0x94a   : > { %v3416_v27 = vpop.eup %3415 }
 0x94b   : > { %1698 = vperm.xlu0 %3359, %v3416_v27  }
 0x94e   : > { %v3418_v63 = vpop.eup %3417 }
 0x94f   : > { %2367 = vperm.xlu1 %3360, %v3418_v63   ;;  %2381 = vperm.xlu0 %3359, %v2373_v22  }
 0x953   : > { %1714 = vperm.xlu1 %3360, %v1706_v62  }
 0x9b3   : > { %v1663_v5 = vpop.permute.xlu0 %1662 }
 0x9b4   : > { %v1674_v54 = vmul.f32 %v1673_v1, %v1663_v5  ;;  %v1682_v38 = vmul.f32 %v1681_v31, %v1663_v5 }
 0x9b6   : > { %v1676_v4 = vsub.f32 %v1629_v49, %v1674_v54  ;;  %v4308_v53 = vsub.f32 %v1637_v19, %v1682_v38 }
 0x9b7   : > { %v2336_v28 = vpop.permute.xlu1 %2335 }
 0x9b8   : > { %v2347_v32 = vmul.f32 %v2346_v14, %v2336_v28  ;;  %v2355_v34 = vmul.f32 %v2354_v21, %v2336_v28  ;;  %1709 = vperm.xlu1 %3360, %v1676_v4  }
 0x9ba   : > { %v2349_v42 = vsub.f32 %v2308_v57, %v2347_v32  ;;  %v4310_v45 = vsub.f32 %v2316_v52, %v2355_v34 }
 0x9bc   : > { %2376 = vperm.xlu0 %3359, %v2349_v42   ;;  %3361 = vset.pattern.permute.xlu1 %v3558_v9 }
 0x9c0   : > { %3362 = vset.pattern.permute.xlu0 %v3558_v9 }
 0x9ca   : > { %v1699_v46 = vpop.permute.xlu0 %1698 }
 0x9cb   : > { %v1702_v16 = vmul.f32 %v1699_v46, %v1693_v0  ;;  %v1701_v24 = vmul.f32 %v1699_v46, %v1691_v25 }
 0x9cd   : > { %v1720_v12 = vrot.slane %v1701_v24, %v4037_v13  ;;  %v1728_v41 = vrot.slane %v1702_v16, %v4037_v13 }
 0x9ce   : > { %v2368_v50 = vpop.permute.xlu1 %2367  ;;  %v2382_v49 = vpop.permute.xlu0 %2381 }
 0x9cf   : > { %v2370_v30 = vmul.f32 %v2368_v50, %v2360_v26  ;;  %v2371_v36 = vmul.f32 %v2368_v50, %v2362_v59 }
 0x9d1   : > { %v2387_v47 = vrot.slane %v2370_v30, %v4037_v13  ;;  %v2395_v17 = vrot.slane %v2371_v36, %v4037_v13 }
 0x9d2   : > { %v1715_v19 = vpop.permute.xlu1 %1714 }
 0x9d3   : > { %v2389_v43 = vmul.f32 %v2387_v47, %v2382_v49  ;;  %v2397_v20 = vmul.f32 %v2395_v17, %v2382_v49  ;;  %v1722_v56 = vmul.f32 %v1720_v12, %v1715_v19  ;;  %v1730_v57 = vmul.f32 %v1728_v41, %v1715_v19 }
 0x9d5   : > { %v2391_v52 = vsub.f32 %v2360_v26, %v2389_v43  ;;  %v2399_v40 = vsub.f32 %v2362_v59, %v2397_v20  ;;  %v1724_v61 = vsub.f32 %v1691_v25, %v1722_v56  ;;  %v1732_v58 = vsub.f32 %v1693_v0, %v1730_v57 }
 0x9d6   : > { %v3559_v0 = vmov 14  }
 0x9d7   : > { %v2401_v29 = vsel %vm1704_vm5, %v2387_v47, %v2391_v52  ;;  %v1738_v1 = vsel %vm1704_vm5, %v1720_v12, %v1724_v61  ;;  %v1740_v31 = vsel %vm1704_vm5, %v1728_v41, %v1732_v58  ;;  %v4324_v13 = vsel %vm1704_vm5, %v2395_v17, %v2399_v40 }
 0x9d8   : > { %3419 = vrcp.f32 %v2401_v29  ;;  %v1753_v3 = vsel %vm1751_vm6, 0.0, %v1738_v1  ;;  %v2414_v10 = vsel %vm1751_vm6, 0.0, %v2401_v29  ;;  %v3560_v52 = vmov 15  }
 0x9d9   : > { %3421 = vrcp.f32 %v1738_v1 }
 0x9e2   : > { %v3420_v2 = vpop.eup %3419 }
 0x9e3   : > { %v3422_v37 = vpop.eup %3421  ;;  %2408 = vperm.xlu0 %3362, %v3420_v2  }
 0x9e4   : > { %1745 = vperm.xlu1 %3361, %v3422_v37  }
 0x9e8   : > { %1761 = vperm.xlu1 %3361, %v1753_v3  }
 0x9ec   : > { %2422 = vperm.xlu1 %3361, %v2414_v10  }
 0xa37   : > { %v1710_v60 = vpop.permute.xlu1 %1709 }
 0xa38   : > { %v1721_v18 = vmul.f32 %v1720_v12, %v1710_v60  ;;  %v1729_v14 = vmul.f32 %v1728_v41, %v1710_v60 }
 0xa3a   : > { %v1723_v21 = vsub.f32 %v1676_v4, %v1721_v18  ;;  %v1731_v8 = vsub.f32 %v4308_v53, %v1729_v14 }
 0xa3b   : > { %v2377_v11 = vpop.permute.xlu0 %2376 }
 0xa3c   : > { %v2388_v39 = vmul.f32 %v2387_v47, %v2377_v11  ;;  %v2396_v25 = vmul.f32 %v2395_v17, %v2377_v11  ;;  %1756 = vperm.xlu0 %3362, %v1723_v21  }
 0xa3e   : > { %v2390_v23 = vsub.f32 %v2349_v42, %v2388_v39  ;;  %v2398_v6 = vsub.f32 %v4310_v45, %v2396_v25 }
 0xa40   : > { %2417 = vperm.xlu1 %3361, %v2390_v23   ;;  %3363 = vset.pattern.permute.xlu0 %v3559_v0 }
 0xa44   : > { %3364 = vset.pattern.permute.xlu1 %v3559_v0 }
 0xa62   : > { %v2409_v35 = vpop.permute.xlu0 %2408 }
 0xa63   : > { %v1746_v7 = vpop.permute.xlu1 %1745  ;;  %v2411_v22 = vmul.f32 %v2409_v35, %v2401_v29  ;;  %v2412_v30 = vmul.f32 %v2409_v35, %v4324_v13 }
 0xa64   : > { %v1748_v26 = vmul.f32 %v1746_v7, %v1738_v1  ;;  %v1749_v59 = vmul.f32 %v1746_v7, %v1740_v31 }
 0xa65   : > { %v2428_v38 = vrot.slane %v2411_v22, %v4059_v33  ;;  %v2436_v47 = vrot.slane %v2412_v30, %v4059_v33 }
 0xa66   : > { %v1767_v27 = vrot.slane %v1748_v26, %v4059_v33  ;;  %v1775_v63 = vrot.slane %v1749_v59, %v4059_v33 }
 0xa67   : > { %v1762_v62 = vpop.permute.xlu1 %1761 }
 0xa68   : > { %v1769_v5 = vmul.f32 %v1767_v27, %v1762_v62  ;;  %v1777_v54 = vmul.f32 %v1775_v63, %v1762_v62 }
 0xa6a   : > { %v1771_v4 = vsub.f32 %v1738_v1, %v1769_v5  ;;  %v1779_v53 = vsub.f32 %v1740_v31, %v1777_v54 }
 0xa6b   : > { %v2423_v28 = vpop.permute.xlu1 %2422 }
 0xa6c   : > { %v1785_v32 = vsel %vm1751_vm6, %v1767_v27, %v1771_v4  ;;  %v2430_v34 = vmul.f32 %v2428_v38, %v2423_v28  ;;  %v1787_v42 = vsel %vm1751_vm6, %v1775_v63, %v1779_v53  ;;  %v2438_v40 = vmul.f32 %v2436_v47, %v2423_v28 }
 0xa6d   : > { %3423 = vrcp.f32 %v1785_v32  ;;  %v1800_v50 = vsel %vm1798_vm8, 0.0, %v1785_v32 }
 0xa6e   : > { %v2432_v45 = vsub.f32 %v2401_v29, %v2430_v34  ;;  %v2440_v61 = vsub.f32 %v4324_v13, %v2438_v40 }
 0xa70   : > { %v2442_v9 = vsel %vm1751_vm6, %v2428_v38, %v2432_v45  ;;  %v2444_v1 = vsel %vm1751_vm6, %v2436_v47, %v2440_v61 }
 0xa71   : > { %3425 = vrcp.f32 %v2442_v9  ;;  %v2455_v24 = vsel %vm1798_vm8, 0.0, %v2442_v9 }
 0xa77   : > { %v3424_v46 = vpop.eup %3423 }
 0xa78   : > { %1792 = vperm.xlu0 %3363, %v3424_v46  }
 0xa7b   : > { %v3426_v16 = vpop.eup %3425 }
 0xa7c   : > { %2463 = vperm.xlu0 %3363, %v2455_v24   ;;  %2449 = vperm.xlu1 %3364, %v3426_v16  }
 0xa80   : > { %1808 = vperm.xlu1 %3364, %v1800_v50  }
 0xabb   : > { %v1757_v36 = vpop.permute.xlu0 %1756 }
 0xabc   : > { %v1768_v12 = vmul.f32 %v1767_v27, %v1757_v36  ;;  %v1776_v41 = vmul.f32 %v1775_v63, %v1757_v36 }
 0xabe   : > { %v1770_v17 = vsub.f32 %v1723_v21, %v1768_v12  ;;  %v4349_v49 = vsub.f32 %v1731_v8, %v1776_v41 }
 0xabf   : > { %v2418_v19 = vpop.permute.xlu1 %2417 }
 0xac0   : > { %v2429_v43 = vmul.f32 %v2428_v38, %v2418_v19  ;;  %v2437_v20 = vmul.f32 %v2436_v47, %v2418_v19  ;;  %1803 = vperm.xlu1 %3364, %v1770_v17  }
 0xac2   : > { %v2431_v56 = vsub.f32 %v2390_v23, %v2429_v43  ;;  %v4351_v57 = vsub.f32 %v2398_v6, %v2437_v20 }
 0xac4   : > { %2458 = vperm.xlu0 %3363, %v2431_v56   ;;  %3365 = vset.pattern.permute.xlu1 %v3560_v52 }
 0xac8   : > { %3366 = vset.pattern.permute.xlu0 %v3560_v52 }
 0xaf7   : > { %v1793_v58 = vpop.permute.xlu0 %1792 }
 0xaf8   : > { %v1796_v29 = vmul.f32 %v1793_v58, %v1787_v42  ;;  %v1795_v33 = vmul.f32 %v1793_v58, %v1785_v32 }
 0xafa   : > { %v1814_v3 = vrot.slane %v1795_v33, %v4087_v15  ;;  %v1822_v10 = vrot.slane %v1796_v29, %v4087_v15 }
 0xafb   : > { %v2450_v31 = vpop.permute.xlu1 %2449  ;;  %v2464_v14 = vpop.permute.xlu0 %2463 }
 0xafc   : > { %v2452_v2 = vmul.f32 %v2450_v31, %v2442_v9  ;;  %v2453_v37 = vmul.f32 %v2450_v31, %v2444_v1 }
 0xafe   : > { %v2469_v60 = vrot.slane %v2452_v2, %v4087_v15  ;;  %v2477_v18 = vrot.slane %v2453_v37, %v4087_v15 }
 0xaff   : > { %v1809_v21 = vpop.permute.xlu1 %1808 }
 0xb00   : > { %v2471_v13 = vmul.f32 %v2469_v60, %v2464_v14  ;;  %v2479_v8 = vmul.f32 %v2477_v18, %v2464_v14  ;;  %v1816_v11 = vmul.f32 %v1814_v3, %v1809_v21  ;;  %v1824_v39 = vmul.f32 %v1822_v10, %v1809_v21 }
 0xb02   : > { %v2473_v25 = vsub.f32 %v2442_v9, %v2471_v13  ;;  %v2481_v23 = vsub.f32 %v2444_v1, %v2479_v8  ;;  %v1818_v6 = vsub.f32 %v1785_v32, %v1816_v11  ;;  %v1826_v0 = vsub.f32 %v1787_v42, %v1824_v39 }
 0xb04   : > { %v2483_v7 = vsel %vm1798_vm8, %v2469_v60, %v2473_v25  ;;  %v1832_v35 = vsel %vm1798_vm8, %v1814_v3, %v1818_v6  ;;  %v1834_v26 = vsel %vm1798_vm8, %v1822_v10, %v1826_v0  ;;  %v2485_v15 = vsel %vm1798_vm8, %v2477_v18, %v2481_v23 }
 0xb05   : > { %3427 = vrcp.f32 %v2483_v7  ;;  %v1846_v63 = vsel %vm1844_vm9, 0.0, %v1832_v35  ;;  %v2495_v22 = vsel %vm1844_vm9, 0.0, %v2483_v7 }
 0xb06   : > { %3429 = vrcp.f32 %v1832_v35 }
 0xb0f   : > { %v3428_v59 = vpop.eup %3427 }
 0xb10   : > { %v3430_v27 = vpop.eup %3429  ;;  %2490 = vperm.xlu0 %3366, %v3428_v59  }
 0xb11   : > { %1839 = vperm.xlu1 %3365, %v3430_v27  }
 0xb15   : > { %1854 = vperm.xlu1 %3365, %v1846_v63  }
 0xb19   : > { %2503 = vperm.xlu1 %3365, %v2495_v22  }
 0xb3f   : > { %v1804_v62 = vpop.permute.xlu1 %1803 }
 0xb40   : > { %v1815_v5 = vmul.f32 %v1814_v3, %v1804_v62  ;;  %v1823_v54 = vmul.f32 %v1822_v10, %v1804_v62 }
 0xb42   : > { %v1817_v38 = vsub.f32 %v1770_v17, %v1815_v5  ;;  %v1825_v4 = vsub.f32 %v4349_v49, %v1823_v54 }
 0xb43   : > { %v2459_v53 = vpop.permute.xlu0 %2458 }
 0xb44   : > { %v2470_v28 = vmul.f32 %v2469_v60, %v2459_v53  ;;  %v2478_v32 = vmul.f32 %v2477_v18, %v2459_v53  ;;  %1849 = vperm.xlu0 %3366, %v1817_v38  }
 0xb46   : > { %v2472_v34 = vsub.f32 %v2431_v56, %v2470_v28  ;;  %v2480_v42 = vsub.f32 %v4351_v57, %v2478_v32 }
 0xb48   : > { %2498 = vperm.xlu1 %3365, %v2472_v34  }
 0xb8f   : > { %v2491_v46 = vpop.permute.xlu0 %2490 }
 0xb90   : > { %v1840_v45 = vpop.permute.xlu1 %1839  ;;  %v2493_v50 = vmul.f32 %v2491_v46, %v2485_v15 }
 0xb91   : > { %v1842_v9 = vmul.f32 %v1840_v45, %v1834_v26 }
 0xb92   : > { %v2509_v12 = vrot.slane %v2493_v50, %v4118_v55 }
 0xb93   : > { %v1860_v24 = vrot.slane %v1842_v9, %v4118_v55 }
 0xb94   : > { %v1855_v16 = vpop.permute.xlu1 %1854 }
 0xb95   : > { %v1862_v30 = vmul.f32 %v1860_v24, %v1855_v16 }
 0xb97   : > { %v1864_v41 = vsub.f32 %v1834_v26, %v1862_v30 }
 0xb98   : > { %v2504_v36 = vpop.permute.xlu1 %2503 }
 0xb99   : > { %v2511_v47 = vmul.f32 %v2509_v12, %v2504_v36  ;;  %v1870_v56 = vsel %vm1844_vm9, %v1860_v24, %v1864_v41 }
 0xb9b   : > { %v2513_v43 = vsub.f32 %v2485_v15, %v2511_v47 }
 0xb9d   : > { %v2515_v55 = vsel %vm1844_vm9, %v2509_v12, %v2513_v43 }
 0xbc3   : > { %v1850_v17 = vpop.permute.xlu0 %1849 }
 0xbc4   : > { %v1861_v49 = vmul.f32 %v1860_v24, %v1850_v17 }
 0xbc6   : > { %v1863_v19 = vsub.f32 %v1825_v4, %v1861_v49 }
 0xbc7   : > { %v2499_v20 = vpop.permute.xlu1 %2498 }
 0xbc8   : > { %v2510_v57 = vmul.f32 %v2509_v12, %v2499_v20  ;;  %v3233_v52 = vpack.c.bf16 %v1870_v56, %v1863_v19 }
 0xbca   : > { %v2512_v40 = vsub.f32 %v2480_v42, %v2510_v57  ;;  %3234 = vmatprep.subr.bf16.mxu0 %v3233_v52 }
 0xbcb   : > { %3236 = vmatpush3.bf16.msra.mxu0 %v3233_v52 }
 0xbcc   : > { %v3237_v61 = vpack.c.bf16 %v2515_v55, %v2512_v40 }
 0xbce   : > { %3108 = vmatmul.mubr.msk.f32.vlgmr.msra.gmra.mrb[10].mxu0 %vm2516_vm7, %v3845_v48  ;;  %3238 = vmatprep.subr.bf16.mxu1 %v3237_v61 }
 0xbcf   : > { %3240 = vmatpush3.bf16.msra.mxu1 %v3237_v61 }
 0xbd2   : > { %3115 = vmatmul.mubr.msk.f32.vlgmr.msra.gmra.mrb[10].mxu1 %vm2516_vm7, %v3840_v44 }
 0xca1   : > { %v3109_v44 = vpop.f32.mrb[10].mxu0 }
 0xca2   : > { %2599 = vst.msk [vmem:[%s322_s9 + $0x8] sm:$0xff] %vm2516_vm7, %v3109_v44  ;;  %v2589_v48 = vpop.f32.mrb[11].mxu0 }
 0xca3   : > { %2598 = vst.msk [vmem:[%s322_s9] sm:$0xff] %vm2516_vm7, %v2589_v48 }
 0xca4   : > { %3444 = shalt.err (!%p3441_p5)
}
 0xca5   : > { %s3445_s8 = scalar_lea.hbm %s4397_s14, 256  ;;  %s3449_s13 = scalar_lea.hbm %s4499_s4, 512 }
 0xca6   : > { %p3446_p6 = scmp.ne.s32.totalorder %s4397_s14, %s3445_s8  ;;  %p3450_p10 = scmp.lt.u32.totalorder %s4397_s14, %s4499_s4 }
 0xca7   : > { %p3451_p11 = scmp.lt.u32.totalorder %s3449_s13, %s3445_s8  ;;  %p3453_p13 = scmp.lt.u32.totalorder %s3445_s8, %s4397_s14 }
 0xca8   : > { %p3447_p7 = pnand %p3446_p6, %p3635_p4 }
 0xca9   : > { %p3452_p12 = por %p3451_p11, %p3450_p10 }
 0xcaa   : > { %p3448_p9 = pneg %p3447_p7 }
 0xcab   : > { %p3454_p0 = por %p3453_p13, %p3452_p12 }
 0xcad   : > { %p3455_p1 = pnand %p3454_p0, %p3448_p9 }
 0xcaf   : > { %3458 = shalt.err (!%p3455_p1)
}
 0xcb0   : > { %s3562_s24 = smov 128   ;;  %s3563_s29 = smov 8   ;;  %v3116_v51 = vpop.f32.mrb[10].mxu1 }
 0xcb1   : > { %3243 = dma.vmem_to_hbm [thread:$0]  (%p3635_p4), %s4390_s10, 256, %s4397_s14, %s2684_s17, %s3562_s24, %s3562_s24, %s3563_s29   ;;  %v2672_v58 = vpop.f32.mrb[11].mxu1 }
 0xcb2   : > { %s4440_s12 = scalar_lea.hbm %s4500_s5, %s2927_s11  ;;  %2682 = vst.msk [vmem:[%s4400_s15 + $0x8] sm:$0xff] %vm2516_vm7, %v3116_v51  ;;  %2681 = vst.msk [vmem:[%s4400_s15] sm:$0xff] %vm2516_vm7, %v2672_v58  ;;  %s2689_s13 = scalar_lea.sflag [#allocation7], %s4386_s7 }
 0xcb3   : > { %s3459_s10 = scalar_lea.vmem %s4433_s16, 256  ;;  %s3564_s21 = smov [#allocation6]  }
 0xcb4   : > { %p3460_p2 = scmp.ne.s32.totalorder %s4433_s16, %s3459_s10  ;;  %s3463_s14 = sshll.u32 %s3564_s21, 4  ;;  %s3464_s14 = int_to_ptr.vmem [resolvable:$false] %s3463_s14 }
 0xcb5   : > { %s3465_s17 = scalar_lea.vmem %s3464_s14, 512  ;;  %p3466_p6 = scmp.lt.s32.totalorder %s4433_s16, %s3464_s14 }
 0xcb6   : > { %p3461_p3 = pnand %p3460_p2, %p3635_p4  ;;  %p3467_p7 = scmp.lt.s32.totalorder %s3465_s17, %s3459_s10 }
 0xcb8   : > { %p3462_p5 = pneg %p3461_p3  ;;  %p3468_p9 = por %p3467_p7, %p3466_p6 }
 0xcba   : > { %p3469_p10 = pnand %p3468_p9, %p3462_p5 }
 0xcbc   : > { %3472 = shalt.err (!%p3469_p10)
}
 0xcbd   : > { %s3473_s11 = scalar_lea.hbm %s4440_s12, 256  ;;  %s3477_s27 = scalar_lea.hbm %s4500_s5, 512 }
 0xcbe   : > { %p3474_p11 = scmp.ne.s32.totalorder %s4440_s12, %s3473_s11  ;;  %p3478_p0 = scmp.lt.u32.totalorder %s4440_s12, %s4500_s5 }
 0xcbf   : > { %p3479_p1 = scmp.lt.u32.totalorder %s3477_s27, %s3473_s11  ;;  %p3481_p3 = scmp.lt.u32.totalorder %s3473_s11, %s4440_s12 }
 0xcc0   : > { %p3475_p12 = pnand %p3474_p11, %p3635_p4 }
 0xcc1   : > { %p3480_p2 = por %p3479_p1, %p3478_p0 }
 0xcc2   : > { %p3476_p13 = pneg %p3475_p12 }
 0xcc3   : > { %p3482_p5 = por %p3481_p3, %p3480_p2 }
 0xcc5   : > { %p3483_p6 = pnand %p3482_p5, %p3476_p13 }
 0xcc7   : > { %3486 = shalt.err (!%p3483_p6)
}
 0xcc8   : > { %3244 = dma.vmem_to_hbm [thread:$0]  (%p3635_p4), %s4433_s16, 256, %s4440_s12, %s2689_s13, %s3562_s24, %s3562_s24, %s3563_s29  }
 0xcc9 PF: > { %p3254_p7 = scmp.ge.s32.totalorder %s3541_s23, 2  ;;  %s2733_s10 = sand.u32 1, %s3521_s18  }
 0xcca   : > { %s2734_s21 = scalar_lea.sflag [#allocation5], %s2733_s10 }
 0xccb   : > { %p3248_p9 = pnand %p3254_p7, %p3642_p8 }
 0xccd   : > { %3512 = dma.done.wait (!%p3248_p9), %s2734_s21, 256  }
 0xcce   : > { %3514 = vsyncadd (!%p3248_p9), %s2734_s21, 4294967040  ;;  %s2743_s28 = scalar_lea.sflag [#allocation7], %s2733_s10 }
 0xccf   : > { %3516 = dma.done.wait (!%p3248_p9), %s2743_s28, 256  }
 0xcd0   : > { %3518 = vsyncadd (!%p3248_p9), %s2743_s28, 4294967040  ;;  %s22_s23 = sadd.s32 1, %s3541_s23   ;;  %s4507_s18 = smov %s3525_s19 }
 0xcd1   : > { %p19_p10 = scmp.ge.s32.totalorder %s22_s23, 4   ;;  %s4508_s19 = smov %s3529_s20 }
 0xcd2   : > { %s4509_s20 = smov %s3648_s6  ;;  %s4510_s21 = smov %s3537_s22 }
 0xcd3   : > { %s4511_s22 = smov %s4513_s26  ;;  %21 = sbr.rel (!%p19_p10) target bundleno = 6 (0x6), region = 105 }
 0xcda   :  { %2748 = vsyncpa [#allocation5], 1 }
 0xcdb   :  { %2750 = vsyncpa [#allocation5 + $0x1], 1 }
 0xcdc   :  { %2751 = vsyncpa [#allocation7], 1 }
 0xcdd   :  { %2753 = vsyncpa [#allocation7 + $0x1], 1 }

</bundles_post_ra>
